<compile_context>
chip_gen: v7x
topology: tpu7x:2x2x1
jax: 0.10.0
libtpu: 0.0.40
codegen_flags: <defaults>
</compile_context>

<pallas_src>
import math

import jax
import jax.numpy as jnp
from jax.experimental import pallas as pl
from jax.experimental.pallas import tpu as pltpu

# ----------------------------- model config ---------------------------------
B = 2                  # batch
IMG_C, IMG_HW = 3, 16  # image channels / spatial size
PATCH = 8              # SigLIP patch size -> (16/8)^2 = 4 patches
N_PATCH = (IMG_HW // PATCH) ** 2
PATCH_DIM = IMG_C * PATCH * PATCH
V_HID, V_HEADS, V_MLP, V_LAYERS = 64, 4, 128, 2      # vision tower
T_HID, T_HEADS, T_MLP, T_LAYERS = 128, 4, 256, 2     # language model
VOCAB = 512
S_TEXT = 8
LN_EPS = 1e-6          # SigLIP LayerNorm eps
RMS_EPS = 1e-5         # Llama RMSNorm eps

BF16 = jnp.bfloat16
F32 = jnp.float32

# Order in which the shared (non-batched) parameter arrays reach the kernel.
PARAM_ORDER = (
    "patch_w", "patch_posb",
    "v_vec", "v_wqkv", "v_wo", "v_fc1_w", "v_fc2_w",
    "head_vec", "p_w1", "p_w2",
    "cos", "sin",
    "t_gam", "t_wqkv", "t_wo", "t_wgu", "t_wd", "lm_head_w",
)


# ----------------------------- in-kernel helpers ------------------------------
def _mxu(x_f32, w_bf16):
    """bf16 MXU matmul with f32 accumulation."""
    return jnp.dot(x_f32.astype(BF16), w_bf16, preferred_element_type=F32)


def _layernorm(x, g, b):
    mu = jnp.mean(x, axis=-1, keepdims=True)
    xc = x - mu
    var = jnp.mean(xc * xc, axis=-1, keepdims=True)
    return xc * jax.lax.rsqrt(var + LN_EPS) * g + b


def _rmsnorm(x, g):
    var = jnp.mean(x * x, axis=-1, keepdims=True)
    return x * jax.lax.rsqrt(var + RMS_EPS) * g


def _gelu_tanh(x):
    # gelu_pytorch_tanh (SigLIP MLP & projector); Python literals only, so the
    # kernel never closes over a traced constant.
    return 0.5 * x * (1.0 + jnp.tanh(0.7978845608028654 * (x + 0.044715 * x * x * x)))


def _silu(x):
    return x * (1.0 / (1.0 + jnp.exp(-x)))


def _mha(qkv, n_heads, mask, cos, sin):
    """All-head attention on one (S, 3*D) fused-QKV slab (static head unroll)."""
    S, D3 = qkv.shape
    D = D3 // 3
    hd = D // n_heads
    scale = 1.0 / math.sqrt(hd)

    def rope(x):  # (S, hd) Llama rotate-half
        xr = jnp.concatenate([-x[:, hd // 2:], x[:, :hd // 2]], axis=-1)
        return x * cos + xr * sin

    outs = []
    for h in range(n_heads):
        q = qkv[:, h * hd:(h + 1) * hd]
        k = qkv[:, D + h * hd:D + (h + 1) * hd]
        v = qkv[:, 2 * D + h * hd:2 * D + (h + 1) * hd]
        if cos is not None:
            q = rope(q)
            k = rope(k)
        # q @ k^T via dot_general (no explicit transpose)
        s = jax.lax.dot_general(q.astype(BF16), k.astype(BF16),
                                (((1,), (1,)), ((), ())),
                                preferred_element_type=F32) * scale
        if mask is not None:
            s = s + mask                       # additive causal+padding mask
        s = s - jnp.max(s, axis=-1, keepdims=True)
        e = jnp.exp(s)
        # approx reciprocal -> EUP, ~1e-3 rel. error (documented)
        p = e * pl.reciprocal(jnp.sum(e, axis=-1, keepdims=True), approx=True)
        outs.append(jnp.dot(p.astype(BF16), v.astype(BF16),
                            preferred_element_type=F32))
    return jnp.concatenate(outs, axis=-1)      # (S, D)


# ----------------------------- the fused kernel -------------------------------
def _vlm_kernel(patches_ref, text_ref, mask_ref, *rest):
    """One grid step = one batch element; whole VLM forward, VMEM-resident."""
    out_ref = rest[-1]
    p = dict(zip(PARAM_ORDER, rest[:-1]))

    # ---------------- SigLIP-style vision tower ----------------
    x = patches_ref[0].astype(F32)                               # (S_img, 192)
    h = _mxu(x, p["patch_w"][...]) + p["patch_posb"][...]        # (S_img, 64)

    for l in range(V_LAYERS):
        vec = p["v_vec"][l]                                      # (8, 192) f32 slab
        ln1_g, ln1_b = vec[0:1, :V_HID], vec[1:2, :V_HID]
        bqkv = vec[2:3, :3 * V_HID]
        bo = vec[3:4, :V_HID]
        ln2_g, ln2_b = vec[4:5, :V_HID], vec[5:6, :V_HID]
        fc1_b = vec[6:7, :V_MLP]
        fc2_b = vec[7:8, :V_HID]

        qkv = _mxu(_layernorm(h, ln1_g, ln1_b), p["v_wqkv"][l]) + bqkv
        attn = _mha(qkv, V_HEADS, mask=None, cos=None, sin=None)
        h = h + _mxu(attn, p["v_wo"][l]) + bo
        f = _gelu_tanh(_mxu(_layernorm(h, ln2_g, ln2_b), p["v_fc1_w"][l]) + fc1_b)
        h = h + _mxu(f, p["v_fc2_w"][l]) + fc2_b

    # ---------------- post-LN + MLP projector (encode_image) ----------------
    hv = p["head_vec"][...]                                      # (4, 128) f32 slab
    h = _layernorm(h, hv[0:1, :V_HID], hv[1:2, :V_HID])
    h = _gelu_tanh(_mxu(h, p["p_w1"][...]) + hv[2:3, :T_HID])
    img = _mxu(h, p["p_w2"][...]) + hv[3:4, :T_HID]              # (S_img, 128)

    # ---------------- multimodal fusion (prepend image features) -------------
    seq = jnp.concatenate([img, text_ref[0].astype(F32)], axis=0)  # (S_tot, 128)
    mask = mask_ref[0]                                           # (S_tot, S_tot)
    cos, sin = p["cos"][...], p["sin"][...]                      # (S_tot, hd)

    # ---------------- SmolLM2 / Llama-style causal LM ------------------------
    gam = p["t_gam"][...]                                        # (2L+1, 128)
    for l in range(T_LAYERS):
        qkv = _mxu(_rmsnorm(seq, gam[2 * l:2 * l + 1]), p["t_wqkv"][l])
        attn = _mha(qkv, T_HEADS, mask=mask, cos=cos, sin=sin)
        seq = seq + _mxu(attn, p["t_wo"][l])
        gu = _mxu(_rmsnorm(seq, gam[2 * l + 1:2 * l + 2]), p["t_wgu"][l])
        f = _silu(gu[:, :T_MLP]) * gu[:, T_MLP:]                 # SwiGLU (gate|up)
        seq = seq + _mxu(f, p["t_wd"][l])

    # final RMSNorm + tied (bias-free) lm_head
    xn = _rmsnorm(seq, gam[2 * T_LAYERS:2 * T_LAYERS + 1])
    out_ref[0] = _mxu(xn, p["lm_head_w"][...]).astype(out_ref.dtype)


# ----------------------------- pallas_call wrapper ----------------------------
def _batch_spec(shape):
    nd = len(shape)
    return pl.BlockSpec((1,) + tuple(shape[1:]),
                        lambda b, _n=nd: (b,) + (0,) * (_n - 1))


def _fixed_spec(shape):
    nd = len(shape)
    return pl.BlockSpec(tuple(shape), lambda b, _n=nd: (0,) * _n)


@jax.jit
def smollm2_vision_forward(params, input_ids, attention_mask, pixel_values):
    Bi, C, H, W = pixel_values.shape
    nh, nw = H // PATCH, W // PATCH
    S_img = nh * nw
    S_txt = input_ids.shape[1]
    S_tot = S_img + S_txt

    # conv(kernel==stride==PATCH) patch extraction -> (B, S_img, C*P*P),
    # flattened in (C, ph, pw) order to match nn.Conv2d weight layout.
    patches = pixel_values.reshape(Bi, C, nh, PATCH, nw, PATCH)
    patches = patches.transpose(0, 2, 4, 1, 3, 5).reshape(Bi, S_img, C * PATCH * PATCH)

    # language_model.get_input_embeddings()(input_ids): gather stays in XLA.
    text_emb = jnp.take(params["embed"], input_ids, axis=0)      # (B, S_txt, 128)

    # image_token_positions is None -> prepend image features (else-branch of
    # prepare_inputs_for_multimodal); image tokens are always attended.
    full_mask = jnp.concatenate(
        [jnp.ones((Bi, S_img), attention_mask.dtype), attention_mask], axis=1)
    keep = full_mask[:, None, :] > 0                              # (B, 1, S_tot)
    qi = jnp.arange(S_tot)[:, None]
    ki = jnp.arange(S_tot)[None, :]
    causal = (ki <= qi)[None, :, :]                               # (1, S_tot, S_tot)
    add_mask = jnp.where(causal & keep, 0.0, -1e9).astype(F32)    # (B, S_tot, S_tot)

    # Llama RoPE tables (S_tot, head_dim), duplicated halves.
    hd = T_HID // T_HEADS
    inv_freq = 1.0 / (10000.0 ** (jnp.arange(0, hd, 2, dtype=F32) / hd))
    freqs = jnp.arange(S_tot, dtype=F32)[:, None] * inv_freq[None, :]
    cos = jnp.concatenate([jnp.cos(freqs)] * 2, axis=-1)
    sin = jnp.concatenate([jnp.sin(freqs)] * 2, axis=-1)

    kp = dict(params)
    kp["cos"], kp["sin"] = cos, sin
    flat = [kp[name] for name in PARAM_ORDER]

    out_shape = jax.ShapeDtypeStruct((Bi, S_tot, VOCAB), F32)
    in_specs = ([_batch_spec(patches.shape), _batch_spec(text_emb.shape),
                 _batch_spec(add_mask.shape)]
                + [_fixed_spec(a.shape) for a in flat])

    # TODO(synk): labels -> shifted cross-entropy loss (HF LM internals); with
    # labels=None the reference forward returns logits only.
    return pl.pallas_call(
        _vlm_kernel,
        out_shape=out_shape,
        grid=(Bi,),
        in_specs=in_specs,
        out_specs=_batch_spec(out_shape.shape),
        compiler_params=pltpu.CompilerParams(
            dimension_semantics=("parallel",),      # 2 batch steps -> both v7x TCs
            vmem_limit_bytes=32 * 1024 * 1024,      # explicit, safe on v5e/v6e/v7x
        ),
    )(patches, text_emb, add_mask, *flat)


# ----------------------------- deterministic params --------------------------
def _pad_row(v, width):
    v = v.astype(F32).reshape(-1)
    return jnp.pad(v, (0, width - v.shape[0]))


def init_params(key):
    keys = iter(jax.random.split(key, 64))

    def nrm(shape, scale=0.02, dtype=BF16):
        return (scale * jax.random.normal(next(keys), shape, F32)).astype(dtype)

    def xavier(shape, dtype=BF16):
        bound = math.sqrt(6.0 / (shape[0] + shape[1]))
        return jax.random.uniform(next(keys), shape, F32, -bound, bound).astype(dtype)

    # ---- vision tower (SigLIP-style, with biases) ----
    patch_w = nrm((PATCH_DIM, V_HID))
    patch_posb = nrm((N_PATCH, V_HID), dtype=F32)   # pos-emb (+ zero conv bias folded)

    ones_v, zeros_v = jnp.ones((V_HID,), F32), jnp.zeros((V_HID,), F32)
    v_vec_layer = jnp.stack([
        _pad_row(ones_v, 3 * V_HID),                       # 0: ln1 gamma
        _pad_row(zeros_v, 3 * V_HID),                      # 1: ln1 beta
        _pad_row(jnp.zeros((3 * V_HID,), F32), 3 * V_HID), # 2: fused qkv bias
        _pad_row(zeros_v, 3 * V_HID),                      # 3: out-proj bias
        _pad_row(ones_v, 3 * V_HID),                       # 4: ln2 gamma
        _pad_row(zeros_v, 3 * V_HID),                      # 5: ln2 beta
        _pad_row(jnp.zeros((V_MLP,), F32), 3 * V_HID),     # 6: fc1 bias
        _pad_row(zeros_v, 3 * V_HID),                      # 7: fc2 bias
    ])
    v_vec = jnp.stack([v_vec_layer] * V_LAYERS)                          # (L, 8, 192)
    v_wqkv = jnp.stack([nrm((V_HID, 3 * V_HID)) for _ in range(V_LAYERS)])
    v_wo = jnp.stack([nrm((V_HID, V_HID)) for _ in range(V_LAYERS)])
    v_fc1_w = jnp.stack([nrm((V_HID, V_MLP)) for _ in range(V_LAYERS)])
    v_fc2_w = jnp.stack([nrm((V_MLP, V_HID)) for _ in range(V_LAYERS)])

    # ---- post-LN + projector (Linear -> GELU -> Linear, zero-init biases) ----
    head_vec = jnp.stack([
        _pad_row(ones_v, T_HID),                           # 0: post_layernorm gamma
        _pad_row(zeros_v, T_HID),                          # 1: post_layernorm beta
        jnp.zeros((T_HID,), F32),                          # 2: projector fc1 bias
        jnp.zeros((T_HID,), F32),                          # 3: projector fc2 bias
    ])
    p_w1 = xavier((V_HID, T_HID))
    p_w2 = xavier((T_HID, T_HID))

    # ---- SmolLM2 / Llama-style LM (bias-free, RMSNorm, SwiGLU, tied head) ----
    t_gam = jnp.ones((2 * T_LAYERS + 1, T_HID), F32)       # [ln1_l, ln2_l]*L, final
    t_wqkv = jnp.stack([nrm((T_HID, 3 * T_HID)) for _ in range(T_LAYERS)])
    t_wo = jnp.stack([nrm((T_HID, T_HID)) for _ in range(T_LAYERS)])
    t_wgu = jnp.stack([nrm((T_HID, 2 * T_MLP)) for _ in range(T_LAYERS)])
    t_wd = jnp.stack([nrm((T_MLP, T_HID)) for _ in range(T_LAYERS)])
    embed = nrm((VOCAB, T_HID), dtype=F32)
    lm_head_w = embed.T.astype(BF16)                       # tied embeddings, no bias

    return dict(
        patch_w=patch_w, patch_posb=patch_posb,
        v_vec=v_vec, v_wqkv=v_wqkv, v_wo=v_wo, v_fc1_w=v_fc1_w, v_fc2_w=v_fc2_w,
        head_vec=head_vec, p_w1=p_w1, p_w2=p_w2,
        t_gam=t_gam, t_wqkv=t_wqkv, t_wo=t_wo, t_wgu=t_wgu, t_wd=t_wd,
        lm_head_w=lm_head_w, embed=embed,
    )


# ----------------------------- main ------------------------------------------
if __name__ == "__main__":
    key = jax.random.PRNGKey(0)
    pk, ik, xk = jax.random.split(key, 3)

    params = init_params(pk)
    pixel_values = jax.random.normal(xk, (B, IMG_C, IMG_HW, IMG_HW), F32)
    input_ids = jax.random.randint(ik, (B, S_TEXT), 0, VOCAB, dtype=jnp.int32)
    attention_mask = jnp.ones((B, S_TEXT), dtype=jnp.int32)

    logits = smollm2_vision_forward(params, input_ids, attention_mask, pixel_values)
    jax.block_until_ready(logits)
    assert logits.shape == (B, N_PATCH + S_TEXT, VOCAB)
    assert bool(jnp.all(jnp.isfinite(logits)))
    print("KERNEL_OK")
</pallas_src>

<mosaic_0001>
module attributes {stable_mosaic.version = 11 : i64} {
  func.func @_vlm_kernel(%arg0: i32, %arg1: memref<1x4x192xf32, #tpu.memory_space<vmem>>, %arg2: memref<1x8x128xf32, #tpu.memory_space<vmem>>, %arg3: memref<1x12x12xf32, #tpu.memory_space<vmem>>, %arg4: memref<192x64xbf16, #tpu.memory_space<vmem>>, %arg5: memref<4x64xf32, #tpu.memory_space<vmem>>, %arg6: memref<2x8x192xf32, #tpu.memory_space<vmem>>, %arg7: memref<2x64x192xbf16, #tpu.memory_space<vmem>>, %arg8: memref<2x64x64xbf16, #tpu.memory_space<vmem>>, %arg9: memref<2x64x128xbf16, #tpu.memory_space<vmem>>, %arg10: memref<2x128x64xbf16, #tpu.memory_space<vmem>>, %arg11: memref<4x128xf32, #tpu.memory_space<vmem>>, %arg12: memref<64x128xbf16, #tpu.memory_space<vmem>>, %arg13: memref<128x128xbf16, #tpu.memory_space<vmem>>, %arg14: memref<12x32xf32, #tpu.memory_space<vmem>>, %arg15: memref<12x32xf32, #tpu.memory_space<vmem>>, %arg16: memref<5x128xf32, #tpu.memory_space<vmem>>, %arg17: memref<2x128x384xbf16, #tpu.memory_space<vmem>>, %arg18: memref<2x128x128xbf16, #tpu.memory_space<vmem>>, %arg19: memref<2x128x512xbf16, #tpu.memory_space<vmem>>, %arg20: memref<2x256x128xbf16, #tpu.memory_space<vmem>>, %arg21: memref<128x512xbf16, #tpu.memory_space<vmem>>, %arg22: memref<1x12x512xf32, #tpu.memory_space<vmem>>) attributes {dimension_semantics = [#tpu.dimension_semantics<parallel>], iteration_bounds = array<i64: 2>, scalar_prefetch = 0 : i64, scratch_operands = 0 : i64, tpu.core_type = #tpu.core_type<tc>, window_params = [{transform_indices = @transform_0, window_bounds = array<i64: 1, 4, 192>}, {transform_indices = @transform_1, window_bounds = array<i64: 1, 8, 128>}, {transform_indices = @transform_2, window_bounds = array<i64: 1, 12, 12>}, {pipeline_mode = #tpu.pipeline_mode<synchronous>, transform_indices = @transform_3, window_bounds = array<i64: 192, 64>}, {pipeline_mode = #tpu.pipeline_mode<synchronous>, transform_indices = @transform_4, window_bounds = array<i64: 4, 64>}, {pipeline_mode = #tpu.pipeline_mode<synchronous>, transform_indices = @transform_5, window_bounds = array<i64: 2, 8, 192>}, {pipeline_mode = #tpu.pipeline_mode<synchronous>, transform_indices = @transform_6, window_bounds = array<i64: 2, 64, 192>}, {pipeline_mode = #tpu.pipeline_mode<synchronous>, transform_indices = @transform_7, window_bounds = array<i64: 2, 64, 64>}, {pipeline_mode = #tpu.pipeline_mode<synchronous>, transform_indices = @transform_8, window_bounds = array<i64: 2, 64, 128>}, {pipeline_mode = #tpu.pipeline_mode<synchronous>, transform_indices = @transform_9, window_bounds = array<i64: 2, 128, 64>}, {pipeline_mode = #tpu.pipeline_mode<synchronous>, transform_indices = @transform_10, window_bounds = array<i64: 4, 128>}, {pipeline_mode = #tpu.pipeline_mode<synchronous>, transform_indices = @transform_11, window_bounds = array<i64: 64, 128>}, {pipeline_mode = #tpu.pipeline_mode<synchronous>, transform_indices = @transform_12, window_bounds = array<i64: 128, 128>}, {pipeline_mode = #tpu.pipeline_mode<synchronous>, transform_indices = @transform_13, window_bounds = array<i64: 12, 32>}, {pipeline_mode = #tpu.pipeline_mode<synchronous>, transform_indices = @transform_14, window_bounds = array<i64: 12, 32>}, {pipeline_mode = #tpu.pipeline_mode<synchronous>, transform_indices = @transform_15, window_bounds = array<i64: 5, 128>}, {pipeline_mode = #tpu.pipeline_mode<synchronous>, transform_indices = @transform_16, window_bounds = array<i64: 2, 128, 384>}, {pipeline_mode = #tpu.pipeline_mode<synchronous>, transform_indices = @transform_17, window_bounds = array<i64: 2, 128, 128>}, {pipeline_mode = #tpu.pipeline_mode<synchronous>, transform_indices = @transform_18, window_bounds = array<i64: 2, 128, 512>}, {pipeline_mode = #tpu.pipeline_mode<synchronous>, transform_indices = @transform_19, window_bounds = array<i64: 2, 256, 128>}, {pipeline_mode = #tpu.pipeline_mode<synchronous>, transform_indices = @transform_20, window_bounds = array<i64: 128, 512>}, {transform_indices = @transform_21, window_bounds = array<i64: 1, 12, 512>}]} {
    %c0 = arith.constant 0 : index
    %c0_0 = arith.constant 0 : index
    %c0_1 = arith.constant 0 : index
    %0 = vector.load %arg1[%c0, %c0_0, %c0_1] : memref<1x4x192xf32, #tpu.memory_space<vmem>>, vector<1x4x192xf32>
    %1 = vector.shape_cast %0 : vector<1x4x192xf32> to vector<4x192xf32>
    %c0_2 = arith.constant 0 : index
    %c0_3 = arith.constant 0 : index
    %2 = vector.load %arg4[%c0_2, %c0_3] : memref<192x64xbf16, #tpu.memory_space<vmem>>, vector<192x64xbf16>
    %3 = arith.truncf %1 : vector<4x192xf32> to vector<4x192xbf16>
    %cst = arith.constant dense<0.000000e+00> : vector<4x64xf32>
    %4 = tpu.matmul %3, %2, %cst {dimension_numbers = #tpu.dot_dimension_numbers<[1], [0], [0], [1], [0, 0, 1, 1], [], []>} : vector<4x192xbf16>, vector<192x64xbf16>, vector<4x64xf32> -> vector<4x64xf32>
    %c0_4 = arith.constant 0 : index
    %c0_5 = arith.constant 0 : index
    %5 = vector.load %arg5[%c0_4, %c0_5] : memref<4x64xf32, #tpu.memory_space<vmem>>, vector<4x64xf32>
    %6 = arith.addf %4, %5 : vector<4x64xf32>
    %c0_6 = arith.constant 0 : index
    %c0_7 = arith.constant 0 : index
    %c0_8 = arith.constant 0 : index
    %7 = vector.load %arg6[%c0_6, %c0_7, %c0_8] : memref<2x8x192xf32, #tpu.memory_space<vmem>>, vector<1x8x192xf32>
    %8 = vector.shape_cast %7 : vector<1x8x192xf32> to vector<8x192xf32>
    %9 = vector.extract_strided_slice %8 {offsets = [0, 0], sizes = [1, 64], strides = [1, 1]} : vector<8x192xf32> to vector<1x64xf32>
    %10 = vector.extract_strided_slice %8 {offsets = [1, 0], sizes = [1, 64], strides = [1, 1]} : vector<8x192xf32> to vector<1x64xf32>
    %11 = vector.extract_strided_slice %8 {offsets = [2, 0], sizes = [1, 192], strides = [1, 1]} : vector<8x192xf32> to vector<1x192xf32>
    %12 = vector.extract_strided_slice %8 {offsets = [3, 0], sizes = [1, 64], strides = [1, 1]} : vector<8x192xf32> to vector<1x64xf32>
    %13 = vector.extract_strided_slice %8 {offsets = [4, 0], sizes = [1, 64], strides = [1, 1]} : vector<8x192xf32> to vector<1x64xf32>
    %14 = vector.extract_strided_slice %8 {offsets = [5, 0], sizes = [1, 64], strides = [1, 1]} : vector<8x192xf32> to vector<1x64xf32>
    %15 = vector.extract_strided_slice %8 {offsets = [6, 0], sizes = [1, 128], strides = [1, 1]} : vector<8x192xf32> to vector<1x128xf32>
    %16 = vector.extract_strided_slice %8 {offsets = [7, 0], sizes = [1, 64], strides = [1, 1]} : vector<8x192xf32> to vector<1x64xf32>
    %cst_9 = arith.constant dense<0.000000e+00> : vector<4xf32>
    %17 = vector.multi_reduction <add>, %6, %cst_9 [1] : vector<4x64xf32> to vector<4xf32>
    %18 = vector.shape_cast %17 : vector<4xf32> to vector<4x1xf32>
    %cst_10 = arith.constant 6.400000e+01 : f32
    %19 = vector.broadcast %cst_10 : f32 to vector<4x1xf32>
    %20 = arith.divf %18, %19 : vector<4x1xf32>
    %21 = vector.broadcast %20 : vector<4x1xf32> to vector<4x64xf32>
    %22 = arith.subf %6, %21 : vector<4x64xf32>
    %23 = arith.mulf %22, %22 : vector<4x64xf32>
    %cst_11 = arith.constant dense<0.000000e+00> : vector<4xf32>
    %24 = vector.multi_reduction <add>, %23, %cst_11 [1] : vector<4x64xf32> to vector<4xf32>
    %25 = vector.shape_cast %24 : vector<4xf32> to vector<4x1xf32>
    %cst_12 = arith.constant 6.400000e+01 : f32
    %26 = vector.broadcast %cst_12 : f32 to vector<4x1xf32>
    %27 = arith.divf %25, %26 : vector<4x1xf32>
    %cst_13 = arith.constant 9.99999997E-7 : f32
    %28 = vector.broadcast %cst_13 : f32 to vector<4x1xf32>
    %29 = arith.addf %27, %28 : vector<4x1xf32>
    %30 = math.rsqrt %29 : vector<4x1xf32>
    %31 = vector.broadcast %30 : vector<4x1xf32> to vector<4x64xf32>
    %32 = arith.mulf %22, %31 : vector<4x64xf32>
    %33 = vector.broadcast %9 : vector<1x64xf32> to vector<4x64xf32>
    %34 = arith.mulf %32, %33 : vector<4x64xf32>
    %35 = vector.broadcast %10 : vector<1x64xf32> to vector<4x64xf32>
    %36 = arith.addf %34, %35 : vector<4x64xf32>
    %c0_14 = arith.constant 0 : index
    %c0_15 = arith.constant 0 : index
    %c0_16 = arith.constant 0 : index
    %37 = vector.load %arg7[%c0_14, %c0_15, %c0_16] : memref<2x64x192xbf16, #tpu.memory_space<vmem>>, vector<1x64x192xbf16>
    %38 = vector.shape_cast %37 : vector<1x64x192xbf16> to vector<64x192xbf16>
    %39 = arith.truncf %36 : vector<4x64xf32> to vector<4x64xbf16>
    %cst_17 = arith.constant dense<0.000000e+00> : vector<4x192xf32>
    %40 = tpu.matmul %39, %38, %cst_17 {dimension_numbers = #tpu.dot_dimension_numbers<[1], [0], [0], [1], [0, 0, 1, 1], [], []>} : vector<4x64xbf16>, vector<64x192xbf16>, vector<4x192xf32> -> vector<4x192xf32>
    %41 = vector.broadcast %11 : vector<1x192xf32> to vector<4x192xf32>
    %42 = arith.addf %40, %41 : vector<4x192xf32>
    %43 = vector.extract_strided_slice %42 {offsets = [0, 0], sizes = [4, 16], strides = [1, 1]} : vector<4x192xf32> to vector<4x16xf32>
    %44 = vector.extract_strided_slice %42 {offsets = [0, 64], sizes = [4, 16], strides = [1, 1]} : vector<4x192xf32> to vector<4x16xf32>
    %45 = vector.extract_strided_slice %42 {offsets = [0, 128], sizes = [4, 16], strides = [1, 1]} : vector<4x192xf32> to vector<4x16xf32>
    %46 = arith.truncf %43 : vector<4x16xf32> to vector<4x16xbf16>
    %47 = arith.truncf %44 : vector<4x16xf32> to vector<4x16xbf16>
    %cst_18 = arith.constant dense<0.000000e+00> : vector<4x4xf32>
    %48 = tpu.matmul %46, %47, %cst_18 {dimension_numbers = #tpu.dot_dimension_numbers<[1], [1], [0], [0], [0, 0, 1, 0], [], []>} : vector<4x16xbf16>, vector<4x16xbf16>, vector<4x4xf32> -> vector<4x4xf32>
    %cst_19 = arith.constant 2.500000e-01 : f32
    %49 = vector.broadcast %cst_19 : f32 to vector<4x4xf32>
    %50 = arith.mulf %48, %49 : vector<4x4xf32>
    %cst_20 = arith.constant dense<0xFF800000> : vector<4xf32>
    %51 = vector.multi_reduction <maximumf>, %50, %cst_20 [1] : vector<4x4xf32> to vector<4xf32>
    %52 = vector.shape_cast %51 : vector<4xf32> to vector<4x1xf32>
    %53 = vector.broadcast %52 : vector<4x1xf32> to vector<4x4xf32>
    %54 = arith.subf %50, %53 : vector<4x4xf32>
    %55 = math.exp %54 : vector<4x4xf32>
    %cst_21 = arith.constant dense<0.000000e+00> : vector<4xf32>
    %56 = vector.multi_reduction <add>, %55, %cst_21 [1] : vector<4x4xf32> to vector<4xf32>
    %57 = vector.shape_cast %56 : vector<4xf32> to vector<4x1xf32>
    %58 = tpu.reciprocal %57 {approx = true} : vector<4x1xf32> -> vector<4x1xf32>
    %59 = vector.broadcast %58 : vector<4x1xf32> to vector<4x4xf32>
    %60 = arith.mulf %55, %59 : vector<4x4xf32>
    %61 = arith.truncf %60 : vector<4x4xf32> to vector<4x4xbf16>
    %62 = arith.truncf %45 : vector<4x16xf32> to vector<4x16xbf16>
    %cst_22 = arith.constant dense<0.000000e+00> : vector<4x16xf32>
    %63 = tpu.matmul %61, %62, %cst_22 {dimension_numbers = #tpu.dot_dimension_numbers<[1], [0], [0], [1], [0, 0, 1, 1], [], []>} : vector<4x4xbf16>, vector<4x16xbf16>, vector<4x16xf32> -> vector<4x16xf32>
    %64 = vector.extract_strided_slice %42 {offsets = [0, 16], sizes = [4, 16], strides = [1, 1]} : vector<4x192xf32> to vector<4x16xf32>
    %65 = vector.extract_strided_slice %42 {offsets = [0, 80], sizes = [4, 16], strides = [1, 1]} : vector<4x192xf32> to vector<4x16xf32>
    %66 = vector.extract_strided_slice %42 {offsets = [0, 144], sizes = [4, 16], strides = [1, 1]} : vector<4x192xf32> to vector<4x16xf32>
    %67 = arith.truncf %64 : vector<4x16xf32> to vector<4x16xbf16>
    %68 = arith.truncf %65 : vector<4x16xf32> to vector<4x16xbf16>
    %cst_23 = arith.constant dense<0.000000e+00> : vector<4x4xf32>
    %69 = tpu.matmul %67, %68, %cst_23 {dimension_numbers = #tpu.dot_dimension_numbers<[1], [1], [0], [0], [0, 0, 1, 0], [], []>} : vector<4x16xbf16>, vector<4x16xbf16>, vector<4x4xf32> -> vector<4x4xf32>
    %cst_24 = arith.constant 2.500000e-01 : f32
    %70 = vector.broadcast %cst_24 : f32 to vector<4x4xf32>
    %71 = arith.mulf %69, %70 : vector<4x4xf32>
    %cst_25 = arith.constant dense<0xFF800000> : vector<4xf32>
    %72 = vector.multi_reduction <maximumf>, %71, %cst_25 [1] : vector<4x4xf32> to vector<4xf32>
    %73 = vector.shape_cast %72 : vector<4xf32> to vector<4x1xf32>
    %74 = vector.broadcast %73 : vector<4x1xf32> to vector<4x4xf32>
    %75 = arith.subf %71, %74 : vector<4x4xf32>
    %76 = math.exp %75 : vector<4x4xf32>
    %cst_26 = arith.constant dense<0.000000e+00> : vector<4xf32>
    %77 = vector.multi_reduction <add>, %76, %cst_26 [1] : vector<4x4xf32> to vector<4xf32>
    %78 = vector.shape_cast %77 : vector<4xf32> to vector<4x1xf32>
    %79 = tpu.reciprocal %78 {approx = true} : vector<4x1xf32> -> vector<4x1xf32>
    %80 = vector.broadcast %79 : vector<4x1xf32> to vector<4x4xf32>
    %81 = arith.mulf %76, %80 : vector<4x4xf32>
    %82 = arith.truncf %81 : vector<4x4xf32> to vector<4x4xbf16>
    %83 = arith.truncf %66 : vector<4x16xf32> to vector<4x16xbf16>
    %cst_27 = arith.constant dense<0.000000e+00> : vector<4x16xf32>
    %84 = tpu.matmul %82, %83, %cst_27 {dimension_numbers = #tpu.dot_dimension_numbers<[1], [0], [0], [1], [0, 0, 1, 1], [], []>} : vector<4x4xbf16>, vector<4x16xbf16>, vector<4x16xf32> -> vector<4x16xf32>
    %85 = vector.extract_strided_slice %42 {offsets = [0, 32], sizes = [4, 16], strides = [1, 1]} : vector<4x192xf32> to vector<4x16xf32>
    %86 = vector.extract_strided_slice %42 {offsets = [0, 96], sizes = [4, 16], strides = [1, 1]} : vector<4x192xf32> to vector<4x16xf32>
    %87 = vector.extract_strided_slice %42 {offsets = [0, 160], sizes = [4, 16], strides = [1, 1]} : vector<4x192xf32> to vector<4x16xf32>
    %88 = arith.truncf %85 : vector<4x16xf32> to vector<4x16xbf16>
    %89 = arith.truncf %86 : vector<4x16xf32> to vector<4x16xbf16>
    %cst_28 = arith.constant dense<0.000000e+00> : vector<4x4xf32>
    %90 = tpu.matmul %88, %89, %cst_28 {dimension_numbers = #tpu.dot_dimension_numbers<[1], [1], [0], [0], [0, 0, 1, 0], [], []>} : vector<4x16xbf16>, vector<4x16xbf16>, vector<4x4xf32> -> vector<4x4xf32>
    %cst_29 = arith.constant 2.500000e-01 : f32
    %91 = vector.broadcast %cst_29 : f32 to vector<4x4xf32>
    %92 = arith.mulf %90, %91 : vector<4x4xf32>
    %cst_30 = arith.constant dense<0xFF800000> : vector<4xf32>
    %93 = vector.multi_reduction <maximumf>, %92, %cst_30 [1] : vector<4x4xf32> to vector<4xf32>
    %94 = vector.shape_cast %93 : vector<4xf32> to vector<4x1xf32>
    %95 = vector.broadcast %94 : vector<4x1xf32> to vector<4x4xf32>
    %96 = arith.subf %92, %95 : vector<4x4xf32>
    %97 = math.exp %96 : vector<4x4xf32>
    %cst_31 = arith.constant dense<0.000000e+00> : vector<4xf32>
    %98 = vector.multi_reduction <add>, %97, %cst_31 [1] : vector<4x4xf32> to vector<4xf32>
    %99 = vector.shape_cast %98 : vector<4xf32> to vector<4x1xf32>
    %100 = tpu.reciprocal %99 {approx = true} : vector<4x1xf32> -> vector<4x1xf32>
    %101 = vector.broadcast %100 : vector<4x1xf32> to vector<4x4xf32>
    %102 = arith.mulf %97, %101 : vector<4x4xf32>
    %103 = arith.truncf %102 : vector<4x4xf32> to vector<4x4xbf16>
    %104 = arith.truncf %87 : vector<4x16xf32> to vector<4x16xbf16>
    %cst_32 = arith.constant dense<0.000000e+00> : vector<4x16xf32>
    %105 = tpu.matmul %103, %104, %cst_32 {dimension_numbers = #tpu.dot_dimension_numbers<[1], [0], [0], [1], [0, 0, 1, 1], [], []>} : vector<4x4xbf16>, vector<4x16xbf16>, vector<4x16xf32> -> vector<4x16xf32>
    %106 = vector.extract_strided_slice %42 {offsets = [0, 48], sizes = [4, 16], strides = [1, 1]} : vector<4x192xf32> to vector<4x16xf32>
    %107 = vector.extract_strided_slice %42 {offsets = [0, 112], sizes = [4, 16], strides = [1, 1]} : vector<4x192xf32> to vector<4x16xf32>
    %108 = vector.extract_strided_slice %42 {offsets = [0, 176], sizes = [4, 16], strides = [1, 1]} : vector<4x192xf32> to vector<4x16xf32>
    %109 = arith.truncf %106 : vector<4x16xf32> to vector<4x16xbf16>
    %110 = arith.truncf %107 : vector<4x16xf32> to vector<4x16xbf16>
    %cst_33 = arith.constant dense<0.000000e+00> : vector<4x4xf32>
    %111 = tpu.matmul %109, %110, %cst_33 {dimension_numbers = #tpu.dot_dimension_numbers<[1], [1], [0], [0], [0, 0, 1, 0], [], []>} : vector<4x16xbf16>, vector<4x16xbf16>, vector<4x4xf32> -> vector<4x4xf32>
    %cst_34 = arith.constant 2.500000e-01 : f32
    %112 = vector.broadcast %cst_34 : f32 to vector<4x4xf32>
    %113 = arith.mulf %111, %112 : vector<4x4xf32>
    %cst_35 = arith.constant dense<0xFF800000> : vector<4xf32>
    %114 = vector.multi_reduction <maximumf>, %113, %cst_35 [1] : vector<4x4xf32> to vector<4xf32>
    %115 = vector.shape_cast %114 : vector<4xf32> to vector<4x1xf32>
    %116 = vector.broadcast %115 : vector<4x1xf32> to vector<4x4xf32>
    %117 = arith.subf %113, %116 : vector<4x4xf32>
    %118 = math.exp %117 : vector<4x4xf32>
    %cst_36 = arith.constant dense<0.000000e+00> : vector<4xf32>
    %119 = vector.multi_reduction <add>, %118, %cst_36 [1] : vector<4x4xf32> to vector<4xf32>
    %120 = vector.shape_cast %119 : vector<4xf32> to vector<4x1xf32>
    %121 = tpu.reciprocal %120 {approx = true} : vector<4x1xf32> -> vector<4x1xf32>
    %122 = vector.broadcast %121 : vector<4x1xf32> to vector<4x4xf32>
    %123 = arith.mulf %118, %122 : vector<4x4xf32>
    %124 = arith.truncf %123 : vector<4x4xf32> to vector<4x4xbf16>
    %125 = arith.truncf %108 : vector<4x16xf32> to vector<4x16xbf16>
    %cst_37 = arith.constant dense<0.000000e+00> : vector<4x16xf32>
    %126 = tpu.matmul %124, %125, %cst_37 {dimension_numbers = #tpu.dot_dimension_numbers<[1], [0], [0], [1], [0, 0, 1, 1], [], []>} : vector<4x4xbf16>, vector<4x16xbf16>, vector<4x16xf32> -> vector<4x16xf32>
    %127 = tpu.concatenate %63, %84, %105, %126 in 1 : vector<4x16xf32>, vector<4x16xf32>, vector<4x16xf32>, vector<4x16xf32> -> vector<4x64xf32>
    %c0_38 = arith.constant 0 : index
    %c0_39 = arith.constant 0 : index
    %c0_40 = arith.constant 0 : index
    %128 = vector.load %arg8[%c0_38, %c0_39, %c0_40] : memref<2x64x64xbf16, #tpu.memory_space<vmem>>, vector<1x64x64xbf16>
    %129 = vector.shape_cast %128 : vector<1x64x64xbf16> to vector<64x64xbf16>
    %130 = arith.truncf %127 : vector<4x64xf32> to vector<4x64xbf16>
    %cst_41 = arith.constant dense<0.000000e+00> : vector<4x64xf32>
    %131 = tpu.matmul %130, %129, %cst_41 {dimension_numbers = #tpu.dot_dimension_numbers<[1], [0], [0], [1], [0, 0, 1, 1], [], []>} : vector<4x64xbf16>, vector<64x64xbf16>, vector<4x64xf32> -> vector<4x64xf32>
    %132 = arith.addf %6, %131 : vector<4x64xf32>
    %133 = vector.broadcast %12 : vector<1x64xf32> to vector<4x64xf32>
    %134 = arith.addf %132, %133 : vector<4x64xf32>
    %cst_42 = arith.constant dense<0.000000e+00> : vector<4xf32>
    %135 = vector.multi_reduction <add>, %134, %cst_42 [1] : vector<4x64xf32> to vector<4xf32>
    %136 = vector.shape_cast %135 : vector<4xf32> to vector<4x1xf32>
    %cst_43 = arith.constant 6.400000e+01 : f32
    %137 = vector.broadcast %cst_43 : f32 to vector<4x1xf32>
    %138 = arith.divf %136, %137 : vector<4x1xf32>
    %139 = vector.broadcast %138 : vector<4x1xf32> to vector<4x64xf32>
    %140 = arith.subf %134, %139 : vector<4x64xf32>
    %141 = arith.mulf %140, %140 : vector<4x64xf32>
    %cst_44 = arith.constant dense<0.000000e+00> : vector<4xf32>
    %142 = vector.multi_reduction <add>, %141, %cst_44 [1] : vector<4x64xf32> to vector<4xf32>
    %143 = vector.shape_cast %142 : vector<4xf32> to vector<4x1xf32>
    %cst_45 = arith.constant 6.400000e+01 : f32
    %144 = vector.broadcast %cst_45 : f32 to vector<4x1xf32>
    %145 = arith.divf %143, %144 : vector<4x1xf32>
    %cst_46 = arith.constant 9.99999997E-7 : f32
    %146 = vector.broadcast %cst_46 : f32 to vector<4x1xf32>
    %147 = arith.addf %145, %146 : vector<4x1xf32>
    %148 = math.rsqrt %147 : vector<4x1xf32>
    %149 = vector.broadcast %148 : vector<4x1xf32> to vector<4x64xf32>
    %150 = arith.mulf %140, %149 : vector<4x64xf32>
    %151 = vector.broadcast %13 : vector<1x64xf32> to vector<4x64xf32>
    %152 = arith.mulf %150, %151 : vector<4x64xf32>
    %153 = vector.broadcast %14 : vector<1x64xf32> to vector<4x64xf32>
    %154 = arith.addf %152, %153 : vector<4x64xf32>
    %c0_47 = arith.constant 0 : index
    %c0_48 = arith.constant 0 : index
    %c0_49 = arith.constant 0 : index
    %155 = vector.load %arg9[%c0_47, %c0_48, %c0_49] : memref<2x64x128xbf16, #tpu.memory_space<vmem>>, vector<1x64x128xbf16>
    %156 = vector.shape_cast %155 : vector<1x64x128xbf16> to vector<64x128xbf16>
    %157 = arith.truncf %154 : vector<4x64xf32> to vector<4x64xbf16>
    %cst_50 = arith.constant dense<0.000000e+00> : vector<4x128xf32>
    %158 = tpu.matmul %157, %156, %cst_50 {dimension_numbers = #tpu.dot_dimension_numbers<[1], [0], [0], [1], [0, 0, 1, 1], [], []>} : vector<4x64xbf16>, vector<64x128xbf16>, vector<4x128xf32> -> vector<4x128xf32>
    %159 = vector.broadcast %15 : vector<1x128xf32> to vector<4x128xf32>
    %160 = arith.addf %158, %159 : vector<4x128xf32>
    %cst_51 = arith.constant 5.000000e-01 : f32
    %161 = vector.broadcast %cst_51 : f32 to vector<4x128xf32>
    %162 = arith.mulf %161, %160 : vector<4x128xf32>
    %cst_52 = arith.constant 4.471500e-02 : f32
    %163 = vector.broadcast %cst_52 : f32 to vector<4x128xf32>
    %164 = arith.mulf %163, %160 : vector<4x128xf32>
    %165 = arith.mulf %164, %160 : vector<4x128xf32>
    %166 = arith.mulf %165, %160 : vector<4x128xf32>
    %167 = arith.addf %160, %166 : vector<4x128xf32>
    %cst_53 = arith.constant 0.797884583 : f32
    %168 = vector.broadcast %cst_53 : f32 to vector<4x128xf32>
    %169 = arith.mulf %168, %167 : vector<4x128xf32>
    %170 = math.tanh %169 : vector<4x128xf32>
    %cst_54 = arith.constant 1.000000e+00 : f32
    %171 = vector.broadcast %cst_54 : f32 to vector<4x128xf32>
    %172 = arith.addf %171, %170 : vector<4x128xf32>
    %173 = arith.mulf %162, %172 : vector<4x128xf32>
    %c0_55 = arith.constant 0 : index
    %c0_56 = arith.constant 0 : index
    %c0_57 = arith.constant 0 : index
    %174 = vector.load %arg10[%c0_55, %c0_56, %c0_57] : memref<2x128x64xbf16, #tpu.memory_space<vmem>>, vector<1x128x64xbf16>
    %175 = vector.shape_cast %174 : vector<1x128x64xbf16> to vector<128x64xbf16>
    %176 = arith.truncf %173 : vector<4x128xf32> to vector<4x128xbf16>
    %cst_58 = arith.constant dense<0.000000e+00> : vector<4x64xf32>
    %177 = tpu.matmul %176, %175, %cst_58 {dimension_numbers = #tpu.dot_dimension_numbers<[1], [0], [0], [1], [0, 0, 1, 1], [], []>} : vector<4x128xbf16>, vector<128x64xbf16>, vector<4x64xf32> -> vector<4x64xf32>
    %178 = arith.addf %134, %177 : vector<4x64xf32>
    %179 = vector.broadcast %16 : vector<1x64xf32> to vector<4x64xf32>
    %180 = arith.addf %178, %179 : vector<4x64xf32>
    %c1 = arith.constant 1 : index
    %c0_59 = arith.constant 0 : index
    %c0_60 = arith.constant 0 : index
    %181 = vector.load %arg6[%c1, %c0_59, %c0_60] : memref<2x8x192xf32, #tpu.memory_space<vmem>>, vector<1x8x192xf32>
    %182 = vector.shape_cast %181 : vector<1x8x192xf32> to vector<8x192xf32>
    %183 = vector.extract_strided_slice %182 {offsets = [0, 0], sizes = [1, 64], strides = [1, 1]} : vector<8x192xf32> to vector<1x64xf32>
    %184 = vector.extract_strided_slice %182 {offsets = [1, 0], sizes = [1, 64], strides = [1, 1]} : vector<8x192xf32> to vector<1x64xf32>
    %185 = vector.extract_strided_slice %182 {offsets = [2, 0], sizes = [1, 192], strides = [1, 1]} : vector<8x192xf32> to vector<1x192xf32>
    %186 = vector.extract_strided_slice %182 {offsets = [3, 0], sizes = [1, 64], strides = [1, 1]} : vector<8x192xf32> to vector<1x64xf32>
    %187 = vector.extract_strided_slice %182 {offsets = [4, 0], sizes = [1, 64], strides = [1, 1]} : vector<8x192xf32> to vector<1x64xf32>
    %188 = vector.extract_strided_slice %182 {offsets = [5, 0], sizes = [1, 64], strides = [1, 1]} : vector<8x192xf32> to vector<1x64xf32>
    %189 = vector.extract_strided_slice %182 {offsets = [6, 0], sizes = [1, 128], strides = [1, 1]} : vector<8x192xf32> to vector<1x128xf32>
    %190 = vector.extract_strided_slice %182 {offsets = [7, 0], sizes = [1, 64], strides = [1, 1]} : vector<8x192xf32> to vector<1x64xf32>
    %cst_61 = arith.constant dense<0.000000e+00> : vector<4xf32>
    %191 = vector.multi_reduction <add>, %180, %cst_61 [1] : vector<4x64xf32> to vector<4xf32>
    %192 = vector.shape_cast %191 : vector<4xf32> to vector<4x1xf32>
    %cst_62 = arith.constant 6.400000e+01 : f32
    %193 = vector.broadcast %cst_62 : f32 to vector<4x1xf32>
    %194 = arith.divf %192, %193 : vector<4x1xf32>
    %195 = vector.broadcast %194 : vector<4x1xf32> to vector<4x64xf32>
    %196 = arith.subf %180, %195 : vector<4x64xf32>
    %197 = arith.mulf %196, %196 : vector<4x64xf32>
    %cst_63 = arith.constant dense<0.000000e+00> : vector<4xf32>
    %198 = vector.multi_reduction <add>, %197, %cst_63 [1] : vector<4x64xf32> to vector<4xf32>
    %199 = vector.shape_cast %198 : vector<4xf32> to vector<4x1xf32>
    %cst_64 = arith.constant 6.400000e+01 : f32
    %200 = vector.broadcast %cst_64 : f32 to vector<4x1xf32>
    %201 = arith.divf %199, %200 : vector<4x1xf32>
    %cst_65 = arith.constant 9.99999997E-7 : f32
    %202 = vector.broadcast %cst_65 : f32 to vector<4x1xf32>
    %203 = arith.addf %201, %202 : vector<4x1xf32>
    %204 = math.rsqrt %203 : vector<4x1xf32>
    %205 = vector.broadcast %204 : vector<4x1xf32> to vector<4x64xf32>
    %206 = arith.mulf %196, %205 : vector<4x64xf32>
    %207 = vector.broadcast %183 : vector<1x64xf32> to vector<4x64xf32>
    %208 = arith.mulf %206, %207 : vector<4x64xf32>
    %209 = vector.broadcast %184 : vector<1x64xf32> to vector<4x64xf32>
    %210 = arith.addf %208, %209 : vector<4x64xf32>
    %c1_66 = arith.constant 1 : index
    %c0_67 = arith.constant 0 : index
    %c0_68 = arith.constant 0 : index
    %211 = vector.load %arg7[%c1_66, %c0_67, %c0_68] : memref<2x64x192xbf16, #tpu.memory_space<vmem>>, vector<1x64x192xbf16>
    %212 = vector.shape_cast %211 : vector<1x64x192xbf16> to vector<64x192xbf16>
    %213 = arith.truncf %210 : vector<4x64xf32> to vector<4x64xbf16>
    %cst_69 = arith.constant dense<0.000000e+00> : vector<4x192xf32>
    %214 = tpu.matmul %213, %212, %cst_69 {dimension_numbers = #tpu.dot_dimension_numbers<[1], [0], [0], [1], [0, 0, 1, 1], [], []>} : vector<4x64xbf16>, vector<64x192xbf16>, vector<4x192xf32> -> vector<4x192xf32>
    %215 = vector.broadcast %185 : vector<1x192xf32> to vector<4x192xf32>
    %216 = arith.addf %214, %215 : vector<4x192xf32>
    %217 = vector.extract_strided_slice %216 {offsets = [0, 0], sizes = [4, 16], strides = [1, 1]} : vector<4x192xf32> to vector<4x16xf32>
    %218 = vector.extract_strided_slice %216 {offsets = [0, 64], sizes = [4, 16], strides = [1, 1]} : vector<4x192xf32> to vector<4x16xf32>
    %219 = vector.extract_strided_slice %216 {offsets = [0, 128], sizes = [4, 16], strides = [1, 1]} : vector<4x192xf32> to vector<4x16xf32>
    %220 = arith.truncf %217 : vector<4x16xf32> to vector<4x16xbf16>
    %221 = arith.truncf %218 : vector<4x16xf32> to vector<4x16xbf16>
    %cst_70 = arith.constant dense<0.000000e+00> : vector<4x4xf32>
    %222 = tpu.matmul %220, %221, %cst_70 {dimension_numbers = #tpu.dot_dimension_numbers<[1], [1], [0], [0], [0, 0, 1, 0], [], []>} : vector<4x16xbf16>, vector<4x16xbf16>, vector<4x4xf32> -> vector<4x4xf32>
    %cst_71 = arith.constant 2.500000e-01 : f32
    %223 = vector.broadcast %cst_71 : f32 to vector<4x4xf32>
    %224 = arith.mulf %222, %223 : vector<4x4xf32>
    %cst_72 = arith.constant dense<0xFF800000> : vector<4xf32>
    %225 = vector.multi_reduction <maximumf>, %224, %cst_72 [1] : vector<4x4xf32> to vector<4xf32>
    %226 = vector.shape_cast %225 : vector<4xf32> to vector<4x1xf32>
    %227 = vector.broadcast %226 : vector<4x1xf32> to vector<4x4xf32>
    %228 = arith.subf %224, %227 : vector<4x4xf32>
    %229 = math.exp %228 : vector<4x4xf32>
    %cst_73 = arith.constant dense<0.000000e+00> : vector<4xf32>
    %230 = vector.multi_reduction <add>, %229, %cst_73 [1] : vector<4x4xf32> to vector<4xf32>
    %231 = vector.shape_cast %230 : vector<4xf32> to vector<4x1xf32>
    %232 = tpu.reciprocal %231 {approx = true} : vector<4x1xf32> -> vector<4x1xf32>
    %233 = vector.broadcast %232 : vector<4x1xf32> to vector<4x4xf32>
    %234 = arith.mulf %229, %233 : vector<4x4xf32>
    %235 = arith.truncf %234 : vector<4x4xf32> to vector<4x4xbf16>
    %236 = arith.truncf %219 : vector<4x16xf32> to vector<4x16xbf16>
    %cst_74 = arith.constant dense<0.000000e+00> : vector<4x16xf32>
    %237 = tpu.matmul %235, %236, %cst_74 {dimension_numbers = #tpu.dot_dimension_numbers<[1], [0], [0], [1], [0, 0, 1, 1], [], []>} : vector<4x4xbf16>, vector<4x16xbf16>, vector<4x16xf32> -> vector<4x16xf32>
    %238 = vector.extract_strided_slice %216 {offsets = [0, 16], sizes = [4, 16], strides = [1, 1]} : vector<4x192xf32> to vector<4x16xf32>
    %239 = vector.extract_strided_slice %216 {offsets = [0, 80], sizes = [4, 16], strides = [1, 1]} : vector<4x192xf32> to vector<4x16xf32>
    %240 = vector.extract_strided_slice %216 {offsets = [0, 144], sizes = [4, 16], strides = [1, 1]} : vector<4x192xf32> to vector<4x16xf32>
    %241 = arith.truncf %238 : vector<4x16xf32> to vector<4x16xbf16>
    %242 = arith.truncf %239 : vector<4x16xf32> to vector<4x16xbf16>
    %cst_75 = arith.constant dense<0.000000e+00> : vector<4x4xf32>
    %243 = tpu.matmul %241, %242, %cst_75 {dimension_numbers = #tpu.dot_dimension_numbers<[1], [1], [0], [0], [0, 0, 1, 0], [], []>} : vector<4x16xbf16>, vector<4x16xbf16>, vector<4x4xf32> -> vector<4x4xf32>
    %cst_76 = arith.constant 2.500000e-01 : f32
    %244 = vector.broadcast %cst_76 : f32 to vector<4x4xf32>
    %245 = arith.mulf %243, %244 : vector<4x4xf32>
    %cst_77 = arith.constant dense<0xFF800000> : vector<4xf32>
    %246 = vector.multi_reduction <maximumf>, %245, %cst_77 [1] : vector<4x4xf32> to vector<4xf32>
    %247 = vector.shape_cast %246 : vector<4xf32> to vector<4x1xf32>
    %248 = vector.broadcast %247 : vector<4x1xf32> to vector<4x4xf32>
    %249 = arith.subf %245, %248 : vector<4x4xf32>
    %250 = math.exp %249 : vector<4x4xf32>
    %cst_78 = arith.constant dense<0.000000e+00> : vector<4xf32>
    %251 = vector.multi_reduction <add>, %250, %cst_78 [1] : vector<4x4xf32> to vector<4xf32>
    %252 = vector.shape_cast %251 : vector<4xf32> to vector<4x1xf32>
    %253 = tpu.reciprocal %252 {approx = true} : vector<4x1xf32> -> vector<4x1xf32>
    %254 = vector.broadcast %253 : vector<4x1xf32> to vector<4x4xf32>
    %255 = arith.mulf %250, %254 : vector<4x4xf32>
    %256 = arith.truncf %255 : vector<4x4xf32> to vector<4x4xbf16>
    %257 = arith.truncf %240 : vector<4x16xf32> to vector<4x16xbf16>
    %cst_79 = arith.constant dense<0.000000e+00> : vector<4x16xf32>
    %258 = tpu.matmul %256, %257, %cst_79 {dimension_numbers = #tpu.dot_dimension_numbers<[1], [0], [0], [1], [0, 0, 1, 1], [], []>} : vector<4x4xbf16>, vector<4x16xbf16>, vector<4x16xf32> -> vector<4x16xf32>
    %259 = vector.extract_strided_slice %216 {offsets = [0, 32], sizes = [4, 16], strides = [1, 1]} : vector<4x192xf32> to vector<4x16xf32>
    %260 = vector.extract_strided_slice %216 {offsets = [0, 96], sizes = [4, 16], strides = [1, 1]} : vector<4x192xf32> to vector<4x16xf32>
    %261 = vector.extract_strided_slice %216 {offsets = [0, 160], sizes = [4, 16], strides = [1, 1]} : vector<4x192xf32> to vector<4x16xf32>
    %262 = arith.truncf %259 : vector<4x16xf32> to vector<4x16xbf16>
    %263 = arith.truncf %260 : vector<4x16xf32> to vector<4x16xbf16>
    %cst_80 = arith.constant dense<0.000000e+00> : vector<4x4xf32>
    %264 = tpu.matmul %262, %263, %cst_80 {dimension_numbers = #tpu.dot_dimension_numbers<[1], [1], [0], [0], [0, 0, 1, 0], [], []>} : vector<4x16xbf16>, vector<4x16xbf16>, vector<4x4xf32> -> vector<4x4xf32>
    %cst_81 = arith.constant 2.500000e-01 : f32
    %265 = vector.broadcast %cst_81 : f32 to vector<4x4xf32>
    %266 = arith.mulf %264, %265 : vector<4x4xf32>
    %cst_82 = arith.constant dense<0xFF800000> : vector<4xf32>
    %267 = vector.multi_reduction <maximumf>, %266, %cst_82 [1] : vector<4x4xf32> to vector<4xf32>
    %268 = vector.shape_cast %267 : vector<4xf32> to vector<4x1xf32>
    %269 = vector.broadcast %268 : vector<4x1xf32> to vector<4x4xf32>
    %270 = arith.subf %266, %269 : vector<4x4xf32>
    %271 = math.exp %270 : vector<4x4xf32>
    %cst_83 = arith.constant dense<0.000000e+00> : vector<4xf32>
    %272 = vector.multi_reduction <add>, %271, %cst_83 [1] : vector<4x4xf32> to vector<4xf32>
    %273 = vector.shape_cast %272 : vector<4xf32> to vector<4x1xf32>
    %274 = tpu.reciprocal %273 {approx = true} : vector<4x1xf32> -> vector<4x1xf32>
    %275 = vector.broadcast %274 : vector<4x1xf32> to vector<4x4xf32>
    %276 = arith.mulf %271, %275 : vector<4x4xf32>
    %277 = arith.truncf %276 : vector<4x4xf32> to vector<4x4xbf16>
    %278 = arith.truncf %261 : vector<4x16xf32> to vector<4x16xbf16>
    %cst_84 = arith.constant dense<0.000000e+00> : vector<4x16xf32>
    %279 = tpu.matmul %277, %278, %cst_84 {dimension_numbers = #tpu.dot_dimension_numbers<[1], [0], [0], [1], [0, 0, 1, 1], [], []>} : vector<4x4xbf16>, vector<4x16xbf16>, vector<4x16xf32> -> vector<4x16xf32>
    %280 = vector.extract_strided_slice %216 {offsets = [0, 48], sizes = [4, 16], strides = [1, 1]} : vector<4x192xf32> to vector<4x16xf32>
    %281 = vector.extract_strided_slice %216 {offsets = [0, 112], sizes = [4, 16], strides = [1, 1]} : vector<4x192xf32> to vector<4x16xf32>
    %282 = vector.extract_strided_slice %216 {offsets = [0, 176], sizes = [4, 16], strides = [1, 1]} : vector<4x192xf32> to vector<4x16xf32>
    %283 = arith.truncf %280 : vector<4x16xf32> to vector<4x16xbf16>
    %284 = arith.truncf %281 : vector<4x16xf32> to vector<4x16xbf16>
    %cst_85 = arith.constant dense<0.000000e+00> : vector<4x4xf32>
    %285 = tpu.matmul %283, %284, %cst_85 {dimension_numbers = #tpu.dot_dimension_numbers<[1], [1], [0], [0], [0, 0, 1, 0], [], []>} : vector<4x16xbf16>, vector<4x16xbf16>, vector<4x4xf32> -> vector<4x4xf32>
    %cst_86 = arith.constant 2.500000e-01 : f32
    %286 = vector.broadcast %cst_86 : f32 to vector<4x4xf32>
    %287 = arith.mulf %285, %286 : vector<4x4xf32>
    %cst_87 = arith.constant dense<0xFF800000> : vector<4xf32>
    %288 = vector.multi_reduction <maximumf>, %287, %cst_87 [1] : vector<4x4xf32> to vector<4xf32>
    %289 = vector.shape_cast %288 : vector<4xf32> to vector<4x1xf32>
    %290 = vector.broadcast %289 : vector<4x1xf32> to vector<4x4xf32>
    %291 = arith.subf %287, %290 : vector<4x4xf32>
    %292 = math.exp %291 : vector<4x4xf32>
    %cst_88 = arith.constant dense<0.000000e+00> : vector<4xf32>
    %293 = vector.multi_reduction <add>, %292, %cst_88 [1] : vector<4x4xf32> to vector<4xf32>
    %294 = vector.shape_cast %293 : vector<4xf32> to vector<4x1xf32>
    %295 = tpu.reciprocal %294 {approx = true} : vector<4x1xf32> -> vector<4x1xf32>
    %296 = vector.broadcast %295 : vector<4x1xf32> to vector<4x4xf32>
    %297 = arith.mulf %292, %296 : vector<4x4xf32>
    %298 = arith.truncf %297 : vector<4x4xf32> to vector<4x4xbf16>
    %299 = arith.truncf %282 : vector<4x16xf32> to vector<4x16xbf16>
    %cst_89 = arith.constant dense<0.000000e+00> : vector<4x16xf32>
    %300 = tpu.matmul %298, %299, %cst_89 {dimension_numbers = #tpu.dot_dimension_numbers<[1], [0], [0], [1], [0, 0, 1, 1], [], []>} : vector<4x4xbf16>, vector<4x16xbf16>, vector<4x16xf32> -> vector<4x16xf32>
    %301 = tpu.concatenate %237, %258, %279, %300 in 1 : vector<4x16xf32>, vector<4x16xf32>, vector<4x16xf32>, vector<4x16xf32> -> vector<4x64xf32>
    %c1_90 = arith.constant 1 : index
    %c0_91 = arith.constant 0 : index
    %c0_92 = arith.constant 0 : index
    %302 = vector.load %arg8[%c1_90, %c0_91, %c0_92] : memref<2x64x64xbf16, #tpu.memory_space<vmem>>, vector<1x64x64xbf16>
    %303 = vector.shape_cast %302 : vector<1x64x64xbf16> to vector<64x64xbf16>
    %304 = arith.truncf %301 : vector<4x64xf32> to vector<4x64xbf16>
    %cst_93 = arith.constant dense<0.000000e+00> : vector<4x64xf32>
    %305 = tpu.matmul %304, %303, %cst_93 {dimension_numbers = #tpu.dot_dimension_numbers<[1], [0], [0], [1], [0, 0, 1, 1], [], []>} : vector<4x64xbf16>, vector<64x64xbf16>, vector<4x64xf32> -> vector<4x64xf32>
    %306 = arith.addf %180, %305 : vector<4x64xf32>
    %307 = vector.broadcast %186 : vector<1x64xf32> to vector<4x64xf32>
    %308 = arith.addf %306, %307 : vector<4x64xf32>
    %cst_94 = arith.constant dense<0.000000e+00> : vector<4xf32>
    %309 = vector.multi_reduction <add>, %308, %cst_94 [1] : vector<4x64xf32> to vector<4xf32>
    %310 = vector.shape_cast %309 : vector<4xf32> to vector<4x1xf32>
    %cst_95 = arith.constant 6.400000e+01 : f32
    %311 = vector.broadcast %cst_95 : f32 to vector<4x1xf32>
    %312 = arith.divf %310, %311 : vector<4x1xf32>
    %313 = vector.broadcast %312 : vector<4x1xf32> to vector<4x64xf32>
    %314 = arith.subf %308, %313 : vector<4x64xf32>
    %315 = arith.mulf %314, %314 : vector<4x64xf32>
    %cst_96 = arith.constant dense<0.000000e+00> : vector<4xf32>
    %316 = vector.multi_reduction <add>, %315, %cst_96 [1] : vector<4x64xf32> to vector<4xf32>
    %317 = vector.shape_cast %316 : vector<4xf32> to vector<4x1xf32>
    %cst_97 = arith.constant 6.400000e+01 : f32
    %318 = vector.broadcast %cst_97 : f32 to vector<4x1xf32>
    %319 = arith.divf %317, %318 : vector<4x1xf32>
    %cst_98 = arith.constant 9.99999997E-7 : f32
    %320 = vector.broadcast %cst_98 : f32 to vector<4x1xf32>
    %321 = arith.addf %319, %320 : vector<4x1xf32>
    %322 = math.rsqrt %321 : vector<4x1xf32>
    %323 = vector.broadcast %322 : vector<4x1xf32> to vector<4x64xf32>
    %324 = arith.mulf %314, %323 : vector<4x64xf32>
    %325 = vector.broadcast %187 : vector<1x64xf32> to vector<4x64xf32>
    %326 = arith.mulf %324, %325 : vector<4x64xf32>
    %327 = vector.broadcast %188 : vector<1x64xf32> to vector<4x64xf32>
    %328 = arith.addf %326, %327 : vector<4x64xf32>
    %c1_99 = arith.constant 1 : index
    %c0_100 = arith.constant 0 : index
    %c0_101 = arith.constant 0 : index
    %329 = vector.load %arg9[%c1_99, %c0_100, %c0_101] : memref<2x64x128xbf16, #tpu.memory_space<vmem>>, vector<1x64x128xbf16>
    %330 = vector.shape_cast %329 : vector<1x64x128xbf16> to vector<64x128xbf16>
    %331 = arith.truncf %328 : vector<4x64xf32> to vector<4x64xbf16>
    %cst_102 = arith.constant dense<0.000000e+00> : vector<4x128xf32>
    %332 = tpu.matmul %331, %330, %cst_102 {dimension_numbers = #tpu.dot_dimension_numbers<[1], [0], [0], [1], [0, 0, 1, 1], [], []>} : vector<4x64xbf16>, vector<64x128xbf16>, vector<4x128xf32> -> vector<4x128xf32>
    %333 = vector.broadcast %189 : vector<1x128xf32> to vector<4x128xf32>
    %334 = arith.addf %332, %333 : vector<4x128xf32>
    %cst_103 = arith.constant 5.000000e-01 : f32
    %335 = vector.broadcast %cst_103 : f32 to vector<4x128xf32>
    %336 = arith.mulf %335, %334 : vector<4x128xf32>
    %cst_104 = arith.constant 4.471500e-02 : f32
    %337 = vector.broadcast %cst_104 : f32 to vector<4x128xf32>
    %338 = arith.mulf %337, %334 : vector<4x128xf32>
    %339 = arith.mulf %338, %334 : vector<4x128xf32>
    %340 = arith.mulf %339, %334 : vector<4x128xf32>
    %341 = arith.addf %334, %340 : vector<4x128xf32>
    %cst_105 = arith.constant 0.797884583 : f32
    %342 = vector.broadcast %cst_105 : f32 to vector<4x128xf32>
    %343 = arith.mulf %342, %341 : vector<4x128xf32>
    %344 = math.tanh %343 : vector<4x128xf32>
    %cst_106 = arith.constant 1.000000e+00 : f32
    %345 = vector.broadcast %cst_106 : f32 to vector<4x128xf32>
    %346 = arith.addf %345, %344 : vector<4x128xf32>
    %347 = arith.mulf %336, %346 : vector<4x128xf32>
    %c1_107 = arith.constant 1 : index
    %c0_108 = arith.constant 0 : index
    %c0_109 = arith.constant 0 : index
    %348 = vector.load %arg10[%c1_107, %c0_108, %c0_109] : memref<2x128x64xbf16, #tpu.memory_space<vmem>>, vector<1x128x64xbf16>
    %349 = vector.shape_cast %348 : vector<1x128x64xbf16> to vector<128x64xbf16>
    %350 = arith.truncf %347 : vector<4x128xf32> to vector<4x128xbf16>
    %cst_110 = arith.constant dense<0.000000e+00> : vector<4x64xf32>
    %351 = tpu.matmul %350, %349, %cst_110 {dimension_numbers = #tpu.dot_dimension_numbers<[1], [0], [0], [1], [0, 0, 1, 1], [], []>} : vector<4x128xbf16>, vector<128x64xbf16>, vector<4x64xf32> -> vector<4x64xf32>
    %352 = arith.addf %308, %351 : vector<4x64xf32>
    %353 = vector.broadcast %190 : vector<1x64xf32> to vector<4x64xf32>
    %354 = arith.addf %352, %353 : vector<4x64xf32>
    %c0_111 = arith.constant 0 : index
    %c0_112 = arith.constant 0 : index
    %355 = vector.load %arg11[%c0_111, %c0_112] : memref<4x128xf32, #tpu.memory_space<vmem>>, vector<4x128xf32>
    %356 = vector.extract_strided_slice %355 {offsets = [0, 0], sizes = [1, 64], strides = [1, 1]} : vector<4x128xf32> to vector<1x64xf32>
    %357 = vector.extract_strided_slice %355 {offsets = [1, 0], sizes = [1, 64], strides = [1, 1]} : vector<4x128xf32> to vector<1x64xf32>
    %cst_113 = arith.constant dense<0.000000e+00> : vector<4xf32>
    %358 = vector.multi_reduction <add>, %354, %cst_113 [1] : vector<4x64xf32> to vector<4xf32>
    %359 = vector.shape_cast %358 : vector<4xf32> to vector<4x1xf32>
    %cst_114 = arith.constant 6.400000e+01 : f32
    %360 = vector.broadcast %cst_114 : f32 to vector<4x1xf32>
    %361 = arith.divf %359, %360 : vector<4x1xf32>
    %362 = vector.broadcast %361 : vector<4x1xf32> to vector<4x64xf32>
    %363 = arith.subf %354, %362 : vector<4x64xf32>
    %364 = arith.mulf %363, %363 : vector<4x64xf32>
    %cst_115 = arith.constant dense<0.000000e+00> : vector<4xf32>
    %365 = vector.multi_reduction <add>, %364, %cst_115 [1] : vector<4x64xf32> to vector<4xf32>
    %366 = vector.shape_cast %365 : vector<4xf32> to vector<4x1xf32>
    %cst_116 = arith.constant 6.400000e+01 : f32
    %367 = vector.broadcast %cst_116 : f32 to vector<4x1xf32>
    %368 = arith.divf %366, %367 : vector<4x1xf32>
    %cst_117 = arith.constant 9.99999997E-7 : f32
    %369 = vector.broadcast %cst_117 : f32 to vector<4x1xf32>
    %370 = arith.addf %368, %369 : vector<4x1xf32>
    %371 = math.rsqrt %370 : vector<4x1xf32>
    %372 = vector.broadcast %371 : vector<4x1xf32> to vector<4x64xf32>
    %373 = arith.mulf %363, %372 : vector<4x64xf32>
    %374 = vector.broadcast %356 : vector<1x64xf32> to vector<4x64xf32>
    %375 = arith.mulf %373, %374 : vector<4x64xf32>
    %376 = vector.broadcast %357 : vector<1x64xf32> to vector<4x64xf32>
    %377 = arith.addf %375, %376 : vector<4x64xf32>
    %c0_118 = arith.constant 0 : index
    %c0_119 = arith.constant 0 : index
    %378 = vector.load %arg12[%c0_118, %c0_119] : memref<64x128xbf16, #tpu.memory_space<vmem>>, vector<64x128xbf16>
    %379 = arith.truncf %377 : vector<4x64xf32> to vector<4x64xbf16>
    %cst_120 = arith.constant dense<0.000000e+00> : vector<4x128xf32>
    %380 = tpu.matmul %379, %378, %cst_120 {dimension_numbers = #tpu.dot_dimension_numbers<[1], [0], [0], [1], [0, 0, 1, 1], [], []>} : vector<4x64xbf16>, vector<64x128xbf16>, vector<4x128xf32> -> vector<4x128xf32>
    %381 = vector.extract_strided_slice %355 {offsets = [2, 0], sizes = [1, 128], strides = [1, 1]} : vector<4x128xf32> to vector<1x128xf32>
    %382 = vector.broadcast %381 : vector<1x128xf32> to vector<4x128xf32>
    %383 = arith.addf %380, %382 : vector<4x128xf32>
    %cst_121 = arith.constant 5.000000e-01 : f32
    %384 = vector.broadcast %cst_121 : f32 to vector<4x128xf32>
    %385 = arith.mulf %384, %383 : vector<4x128xf32>
    %cst_122 = arith.constant 4.471500e-02 : f32
    %386 = vector.broadcast %cst_122 : f32 to vector<4x128xf32>
    %387 = arith.mulf %386, %383 : vector<4x128xf32>
    %388 = arith.mulf %387, %383 : vector<4x128xf32>
    %389 = arith.mulf %388, %383 : vector<4x128xf32>
    %390 = arith.addf %383, %389 : vector<4x128xf32>
    %cst_123 = arith.constant 0.797884583 : f32
    %391 = vector.broadcast %cst_123 : f32 to vector<4x128xf32>
    %392 = arith.mulf %391, %390 : vector<4x128xf32>
    %393 = math.tanh %392 : vector<4x128xf32>
    %cst_124 = arith.constant 1.000000e+00 : f32
    %394 = vector.broadcast %cst_124 : f32 to vector<4x128xf32>
    %395 = arith.addf %394, %393 : vector<4x128xf32>
    %396 = arith.mulf %385, %395 : vector<4x128xf32>
    %c0_125 = arith.constant 0 : index
    %c0_126 = arith.constant 0 : index
    %397 = vector.load %arg13[%c0_125, %c0_126] : memref<128x128xbf16, #tpu.memory_space<vmem>>, vector<128x128xbf16>
    %398 = arith.truncf %396 : vector<4x128xf32> to vector<4x128xbf16>
    %cst_127 = arith.constant dense<0.000000e+00> : vector<4x128xf32>
    %399 = tpu.matmul %398, %397, %cst_127 {dimension_numbers = #tpu.dot_dimension_numbers<[1], [0], [0], [1], [0, 0, 1, 1], [], []>} : vector<4x128xbf16>, vector<128x128xbf16>, vector<4x128xf32> -> vector<4x128xf32>
    %400 = vector.extract_strided_slice %355 {offsets = [3, 0], sizes = [1, 128], strides = [1, 1]} : vector<4x128xf32> to vector<1x128xf32>
    %401 = vector.broadcast %400 : vector<1x128xf32> to vector<4x128xf32>
    %402 = arith.addf %399, %401 : vector<4x128xf32>
    %c0_128 = arith.constant 0 : index
    %c0_129 = arith.constant 0 : index
    %c0_130 = arith.constant 0 : index
    %403 = vector.load %arg2[%c0_128, %c0_129, %c0_130] : memref<1x8x128xf32, #tpu.memory_space<vmem>>, vector<1x8x128xf32>
    %404 = vector.shape_cast %403 : vector<1x8x128xf32> to vector<8x128xf32>
    %405 = tpu.concatenate %402, %404 in 0 : vector<4x128xf32>, vector<8x128xf32> -> vector<12x128xf32>
    %c0_131 = arith.constant 0 : index
    %c0_132 = arith.constant 0 : index
    %c0_133 = arith.constant 0 : index
    %406 = vector.load %arg3[%c0_131, %c0_132, %c0_133] : memref<1x12x12xf32, #tpu.memory_space<vmem>>, vector<1x12x12xf32>
    %407 = vector.shape_cast %406 : vector<1x12x12xf32> to vector<12x12xf32>
    %c0_134 = arith.constant 0 : index
    %c0_135 = arith.constant 0 : index
    %408 = vector.load %arg14[%c0_134, %c0_135] : memref<12x32xf32, #tpu.memory_space<vmem>>, vector<12x32xf32>
    %c0_136 = arith.constant 0 : index
    %c0_137 = arith.constant 0 : index
    %409 = vector.load %arg15[%c0_136, %c0_137] : memref<12x32xf32, #tpu.memory_space<vmem>>, vector<12x32xf32>
    %c0_138 = arith.constant 0 : index
    %c0_139 = arith.constant 0 : index
    %410 = vector.load %arg16[%c0_138, %c0_139] : memref<5x128xf32, #tpu.memory_space<vmem>>, vector<5x128xf32>
    %411 = vector.extract_strided_slice %410 {offsets = [0, 0], sizes = [1, 128], strides = [1, 1]} : vector<5x128xf32> to vector<1x128xf32>
    %412 = arith.mulf %405, %405 : vector<12x128xf32>
    %cst_140 = arith.constant dense<0.000000e+00> : vector<12xf32>
    %413 = vector.multi_reduction <add>, %412, %cst_140 [1] : vector<12x128xf32> to vector<12xf32>
    %414 = vector.shape_cast %413 : vector<12xf32> to vector<12x1xf32>
    %cst_141 = arith.constant 1.280000e+02 : f32
    %415 = vector.broadcast %cst_141 : f32 to vector<12x1xf32>
    %416 = arith.divf %414, %415 : vector<12x1xf32>
    %cst_142 = arith.constant 9.99999974E-6 : f32
    %417 = vector.broadcast %cst_142 : f32 to vector<12x1xf32>
    %418 = arith.addf %416, %417 : vector<12x1xf32>
    %419 = math.rsqrt %418 : vector<12x1xf32>
    %420 = vector.broadcast %419 : vector<12x1xf32> to vector<12x128xf32>
    %421 = arith.mulf %405, %420 : vector<12x128xf32>
    %422 = vector.broadcast %411 : vector<1x128xf32> to vector<12x128xf32>
    %423 = arith.mulf %421, %422 : vector<12x128xf32>
    %c0_143 = arith.constant 0 : index
    %c0_144 = arith.constant 0 : index
    %c0_145 = arith.constant 0 : index
    %424 = vector.load %arg17[%c0_143, %c0_144, %c0_145] : memref<2x128x384xbf16, #tpu.memory_space<vmem>>, vector<1x128x384xbf16>
    %425 = vector.shape_cast %424 : vector<1x128x384xbf16> to vector<128x384xbf16>
    %426 = arith.truncf %423 : vector<12x128xf32> to vector<12x128xbf16>
    %cst_146 = arith.constant dense<0.000000e+00> : vector<12x384xf32>
    %427 = tpu.matmul %426, %425, %cst_146 {dimension_numbers = #tpu.dot_dimension_numbers<[1], [0], [0], [1], [0, 0, 1, 1], [], []>} : vector<12x128xbf16>, vector<128x384xbf16>, vector<12x384xf32> -> vector<12x384xf32>
    %428 = vector.extract_strided_slice %427 {offsets = [0, 0], sizes = [12, 32], strides = [1, 1]} : vector<12x384xf32> to vector<12x32xf32>
    %429 = vector.extract_strided_slice %427 {offsets = [0, 128], sizes = [12, 32], strides = [1, 1]} : vector<12x384xf32> to vector<12x32xf32>
    %430 = vector.extract_strided_slice %427 {offsets = [0, 256], sizes = [12, 32], strides = [1, 1]} : vector<12x384xf32> to vector<12x32xf32>
    %431 = vector.extract_strided_slice %428 {offsets = [0, 16], sizes = [12, 16], strides = [1, 1]} : vector<12x32xf32> to vector<12x16xf32>
    %cst_147 = arith.constant 0.000000e+00 : f32
    %432 = vector.broadcast %cst_147 : f32 to vector<12x16xf32>
    %433 = arith.subf %432, %431 : vector<12x16xf32>
    %434 = vector.extract_strided_slice %428 {offsets = [0, 0], sizes = [12, 16], strides = [1, 1]} : vector<12x32xf32> to vector<12x16xf32>
    %435 = tpu.concatenate %433, %434 in 1 : vector<12x16xf32>, vector<12x16xf32> -> vector<12x32xf32>
    %436 = arith.mulf %428, %408 : vector<12x32xf32>
    %437 = arith.mulf %435, %409 : vector<12x32xf32>
    %438 = arith.addf %436, %437 : vector<12x32xf32>
    %439 = vector.extract_strided_slice %429 {offsets = [0, 16], sizes = [12, 16], strides = [1, 1]} : vector<12x32xf32> to vector<12x16xf32>
    %cst_148 = arith.constant 0.000000e+00 : f32
    %440 = vector.broadcast %cst_148 : f32 to vector<12x16xf32>
    %441 = arith.subf %440, %439 : vector<12x16xf32>
    %442 = vector.extract_strided_slice %429 {offsets = [0, 0], sizes = [12, 16], strides = [1, 1]} : vector<12x32xf32> to vector<12x16xf32>
    %443 = tpu.concatenate %441, %442 in 1 : vector<12x16xf32>, vector<12x16xf32> -> vector<12x32xf32>
    %444 = arith.mulf %429, %408 : vector<12x32xf32>
    %445 = arith.mulf %443, %409 : vector<12x32xf32>
    %446 = arith.addf %444, %445 : vector<12x32xf32>
    %447 = arith.truncf %438 : vector<12x32xf32> to vector<12x32xbf16>
    %448 = arith.truncf %446 : vector<12x32xf32> to vector<12x32xbf16>
    %cst_149 = arith.constant dense<0.000000e+00> : vector<12x12xf32>
    %449 = tpu.matmul %447, %448, %cst_149 {dimension_numbers = #tpu.dot_dimension_numbers<[1], [1], [0], [0], [0, 0, 1, 0], [], []>} : vector<12x32xbf16>, vector<12x32xbf16>, vector<12x12xf32> -> vector<12x12xf32>
    %cst_150 = arith.constant 0.176776692 : f32
    %450 = vector.broadcast %cst_150 : f32 to vector<12x12xf32>
    %451 = arith.mulf %449, %450 : vector<12x12xf32>
    %452 = arith.addf %451, %407 : vector<12x12xf32>
    %cst_151 = arith.constant dense<0xFF800000> : vector<12xf32>
    %453 = vector.multi_reduction <maximumf>, %452, %cst_151 [1] : vector<12x12xf32> to vector<12xf32>
    %454 = vector.shape_cast %453 : vector<12xf32> to vector<12x1xf32>
    %455 = vector.broadcast %454 : vector<12x1xf32> to vector<12x12xf32>
    %456 = arith.subf %452, %455 : vector<12x12xf32>
    %457 = math.exp %456 : vector<12x12xf32>
    %cst_152 = arith.constant dense<0.000000e+00> : vector<12xf32>
    %458 = vector.multi_reduction <add>, %457, %cst_152 [1] : vector<12x12xf32> to vector<12xf32>
    %459 = vector.shape_cast %458 : vector<12xf32> to vector<12x1xf32>
    %460 = tpu.reciprocal %459 {approx = true} : vector<12x1xf32> -> vector<12x1xf32>
    %461 = vector.broadcast %460 : vector<12x1xf32> to vector<12x12xf32>
    %462 = arith.mulf %457, %461 : vector<12x12xf32>
    %463 = arith.truncf %462 : vector<12x12xf32> to vector<12x12xbf16>
    %464 = arith.truncf %430 : vector<12x32xf32> to vector<12x32xbf16>
    %cst_153 = arith.constant dense<0.000000e+00> : vector<12x32xf32>
    %465 = tpu.matmul %463, %464, %cst_153 {dimension_numbers = #tpu.dot_dimension_numbers<[1], [0], [0], [1], [0, 0, 1, 1], [], []>} : vector<12x12xbf16>, vector<12x32xbf16>, vector<12x32xf32> -> vector<12x32xf32>
    %466 = vector.extract_strided_slice %427 {offsets = [0, 32], sizes = [12, 32], strides = [1, 1]} : vector<12x384xf32> to vector<12x32xf32>
    %467 = vector.extract_strided_slice %427 {offsets = [0, 160], sizes = [12, 32], strides = [1, 1]} : vector<12x384xf32> to vector<12x32xf32>
    %468 = vector.extract_strided_slice %427 {offsets = [0, 288], sizes = [12, 32], strides = [1, 1]} : vector<12x384xf32> to vector<12x32xf32>
    %469 = vector.extract_strided_slice %466 {offsets = [0, 16], sizes = [12, 16], strides = [1, 1]} : vector<12x32xf32> to vector<12x16xf32>
    %cst_154 = arith.constant 0.000000e+00 : f32
    %470 = vector.broadcast %cst_154 : f32 to vector<12x16xf32>
    %471 = arith.subf %470, %469 : vector<12x16xf32>
    %472 = vector.extract_strided_slice %466 {offsets = [0, 0], sizes = [12, 16], strides = [1, 1]} : vector<12x32xf32> to vector<12x16xf32>
    %473 = tpu.concatenate %471, %472 in 1 : vector<12x16xf32>, vector<12x16xf32> -> vector<12x32xf32>
    %474 = arith.mulf %466, %408 : vector<12x32xf32>
    %475 = arith.mulf %473, %409 : vector<12x32xf32>
    %476 = arith.addf %474, %475 : vector<12x32xf32>
    %477 = vector.extract_strided_slice %467 {offsets = [0, 16], sizes = [12, 16], strides = [1, 1]} : vector<12x32xf32> to vector<12x16xf32>
    %cst_155 = arith.constant 0.000000e+00 : f32
    %478 = vector.broadcast %cst_155 : f32 to vector<12x16xf32>
    %479 = arith.subf %478, %477 : vector<12x16xf32>
    %480 = vector.extract_strided_slice %467 {offsets = [0, 0], sizes = [12, 16], strides = [1, 1]} : vector<12x32xf32> to vector<12x16xf32>
    %481 = tpu.concatenate %479, %480 in 1 : vector<12x16xf32>, vector<12x16xf32> -> vector<12x32xf32>
    %482 = arith.mulf %467, %408 : vector<12x32xf32>
    %483 = arith.mulf %481, %409 : vector<12x32xf32>
    %484 = arith.addf %482, %483 : vector<12x32xf32>
    %485 = arith.truncf %476 : vector<12x32xf32> to vector<12x32xbf16>
    %486 = arith.truncf %484 : vector<12x32xf32> to vector<12x32xbf16>
    %cst_156 = arith.constant dense<0.000000e+00> : vector<12x12xf32>
    %487 = tpu.matmul %485, %486, %cst_156 {dimension_numbers = #tpu.dot_dimension_numbers<[1], [1], [0], [0], [0, 0, 1, 0], [], []>} : vector<12x32xbf16>, vector<12x32xbf16>, vector<12x12xf32> -> vector<12x12xf32>
    %cst_157 = arith.constant 0.176776692 : f32
    %488 = vector.broadcast %cst_157 : f32 to vector<12x12xf32>
    %489 = arith.mulf %487, %488 : vector<12x12xf32>
    %490 = arith.addf %489, %407 : vector<12x12xf32>
    %cst_158 = arith.constant dense<0xFF800000> : vector<12xf32>
    %491 = vector.multi_reduction <maximumf>, %490, %cst_158 [1] : vector<12x12xf32> to vector<12xf32>
    %492 = vector.shape_cast %491 : vector<12xf32> to vector<12x1xf32>
    %493 = vector.broadcast %492 : vector<12x1xf32> to vector<12x12xf32>
    %494 = arith.subf %490, %493 : vector<12x12xf32>
    %495 = math.exp %494 : vector<12x12xf32>
    %cst_159 = arith.constant dense<0.000000e+00> : vector<12xf32>
    %496 = vector.multi_reduction <add>, %495, %cst_159 [1] : vector<12x12xf32> to vector<12xf32>
    %497 = vector.shape_cast %496 : vector<12xf32> to vector<12x1xf32>
    %498 = tpu.reciprocal %497 {approx = true} : vector<12x1xf32> -> vector<12x1xf32>
    %499 = vector.broadcast %498 : vector<12x1xf32> to vector<12x12xf32>
    %500 = arith.mulf %495, %499 : vector<12x12xf32>
    %501 = arith.truncf %500 : vector<12x12xf32> to vector<12x12xbf16>
    %502 = arith.truncf %468 : vector<12x32xf32> to vector<12x32xbf16>
    %cst_160 = arith.constant dense<0.000000e+00> : vector<12x32xf32>
    %503 = tpu.matmul %501, %502, %cst_160 {dimension_numbers = #tpu.dot_dimension_numbers<[1], [0], [0], [1], [0, 0, 1, 1], [], []>} : vector<12x12xbf16>, vector<12x32xbf16>, vector<12x32xf32> -> vector<12x32xf32>
    %504 = vector.extract_strided_slice %427 {offsets = [0, 64], sizes = [12, 32], strides = [1, 1]} : vector<12x384xf32> to vector<12x32xf32>
    %505 = vector.extract_strided_slice %427 {offsets = [0, 192], sizes = [12, 32], strides = [1, 1]} : vector<12x384xf32> to vector<12x32xf32>
    %506 = vector.extract_strided_slice %427 {offsets = [0, 320], sizes = [12, 32], strides = [1, 1]} : vector<12x384xf32> to vector<12x32xf32>
    %507 = vector.extract_strided_slice %504 {offsets = [0, 16], sizes = [12, 16], strides = [1, 1]} : vector<12x32xf32> to vector<12x16xf32>
    %cst_161 = arith.constant 0.000000e+00 : f32
    %508 = vector.broadcast %cst_161 : f32 to vector<12x16xf32>
    %509 = arith.subf %508, %507 : vector<12x16xf32>
    %510 = vector.extract_strided_slice %504 {offsets = [0, 0], sizes = [12, 16], strides = [1, 1]} : vector<12x32xf32> to vector<12x16xf32>
    %511 = tpu.concatenate %509, %510 in 1 : vector<12x16xf32>, vector<12x16xf32> -> vector<12x32xf32>
    %512 = arith.mulf %504, %408 : vector<12x32xf32>
    %513 = arith.mulf %511, %409 : vector<12x32xf32>
    %514 = arith.addf %512, %513 : vector<12x32xf32>
    %515 = vector.extract_strided_slice %505 {offsets = [0, 16], sizes = [12, 16], strides = [1, 1]} : vector<12x32xf32> to vector<12x16xf32>
    %cst_162 = arith.constant 0.000000e+00 : f32
    %516 = vector.broadcast %cst_162 : f32 to vector<12x16xf32>
    %517 = arith.subf %516, %515 : vector<12x16xf32>
    %518 = vector.extract_strided_slice %505 {offsets = [0, 0], sizes = [12, 16], strides = [1, 1]} : vector<12x32xf32> to vector<12x16xf32>
    %519 = tpu.concatenate %517, %518 in 1 : vector<12x16xf32>, vector<12x16xf32> -> vector<12x32xf32>
    %520 = arith.mulf %505, %408 : vector<12x32xf32>
    %521 = arith.mulf %519, %409 : vector<12x32xf32>
    %522 = arith.addf %520, %521 : vector<12x32xf32>
    %523 = arith.truncf %514 : vector<12x32xf32> to vector<12x32xbf16>
    %524 = arith.truncf %522 : vector<12x32xf32> to vector<12x32xbf16>
    %cst_163 = arith.constant dense<0.000000e+00> : vector<12x12xf32>
    %525 = tpu.matmul %523, %524, %cst_163 {dimension_numbers = #tpu.dot_dimension_numbers<[1], [1], [0], [0], [0, 0, 1, 0], [], []>} : vector<12x32xbf16>, vector<12x32xbf16>, vector<12x12xf32> -> vector<12x12xf32>
    %cst_164 = arith.constant 0.176776692 : f32
    %526 = vector.broadcast %cst_164 : f32 to vector<12x12xf32>
    %527 = arith.mulf %525, %526 : vector<12x12xf32>
    %528 = arith.addf %527, %407 : vector<12x12xf32>
    %cst_165 = arith.constant dense<0xFF800000> : vector<12xf32>
    %529 = vector.multi_reduction <maximumf>, %528, %cst_165 [1] : vector<12x12xf32> to vector<12xf32>
    %530 = vector.shape_cast %529 : vector<12xf32> to vector<12x1xf32>
    %531 = vector.broadcast %530 : vector<12x1xf32> to vector<12x12xf32>
    %532 = arith.subf %528, %531 : vector<12x12xf32>
    %533 = math.exp %532 : vector<12x12xf32>
    %cst_166 = arith.constant dense<0.000000e+00> : vector<12xf32>
    %534 = vector.multi_reduction <add>, %533, %cst_166 [1] : vector<12x12xf32> to vector<12xf32>
    %535 = vector.shape_cast %534 : vector<12xf32> to vector<12x1xf32>
    %536 = tpu.reciprocal %535 {approx = true} : vector<12x1xf32> -> vector<12x1xf32>
    %537 = vector.broadcast %536 : vector<12x1xf32> to vector<12x12xf32>
    %538 = arith.mulf %533, %537 : vector<12x12xf32>
    %539 = arith.truncf %538 : vector<12x12xf32> to vector<12x12xbf16>
    %540 = arith.truncf %506 : vector<12x32xf32> to vector<12x32xbf16>
    %cst_167 = arith.constant dense<0.000000e+00> : vector<12x32xf32>
    %541 = tpu.matmul %539, %540, %cst_167 {dimension_numbers = #tpu.dot_dimension_numbers<[1], [0], [0], [1], [0, 0, 1, 1], [], []>} : vector<12x12xbf16>, vector<12x32xbf16>, vector<12x32xf32> -> vector<12x32xf32>
    %542 = vector.extract_strided_slice %427 {offsets = [0, 96], sizes = [12, 32], strides = [1, 1]} : vector<12x384xf32> to vector<12x32xf32>
    %543 = vector.extract_strided_slice %427 {offsets = [0, 224], sizes = [12, 32], strides = [1, 1]} : vector<12x384xf32> to vector<12x32xf32>
    %544 = vector.extract_strided_slice %427 {offsets = [0, 352], sizes = [12, 32], strides = [1, 1]} : vector<12x384xf32> to vector<12x32xf32>
    %545 = vector.extract_strided_slice %542 {offsets = [0, 16], sizes = [12, 16], strides = [1, 1]} : vector<12x32xf32> to vector<12x16xf32>
    %cst_168 = arith.constant 0.000000e+00 : f32
    %546 = vector.broadcast %cst_168 : f32 to vector<12x16xf32>
    %547 = arith.subf %546, %545 : vector<12x16xf32>
    %548 = vector.extract_strided_slice %542 {offsets = [0, 0], sizes = [12, 16], strides = [1, 1]} : vector<12x32xf32> to vector<12x16xf32>
    %549 = tpu.concatenate %547, %548 in 1 : vector<12x16xf32>, vector<12x16xf32> -> vector<12x32xf32>
    %550 = arith.mulf %542, %408 : vector<12x32xf32>
    %551 = arith.mulf %549, %409 : vector<12x32xf32>
    %552 = arith.addf %550, %551 : vector<12x32xf32>
    %553 = vector.extract_strided_slice %543 {offsets = [0, 16], sizes = [12, 16], strides = [1, 1]} : vector<12x32xf32> to vector<12x16xf32>
    %cst_169 = arith.constant 0.000000e+00 : f32
    %554 = vector.broadcast %cst_169 : f32 to vector<12x16xf32>
    %555 = arith.subf %554, %553 : vector<12x16xf32>
    %556 = vector.extract_strided_slice %543 {offsets = [0, 0], sizes = [12, 16], strides = [1, 1]} : vector<12x32xf32> to vector<12x16xf32>
    %557 = tpu.concatenate %555, %556 in 1 : vector<12x16xf32>, vector<12x16xf32> -> vector<12x32xf32>
    %558 = arith.mulf %543, %408 : vector<12x32xf32>
    %559 = arith.mulf %557, %409 : vector<12x32xf32>
    %560 = arith.addf %558, %559 : vector<12x32xf32>
    %561 = arith.truncf %552 : vector<12x32xf32> to vector<12x32xbf16>
    %562 = arith.truncf %560 : vector<12x32xf32> to vector<12x32xbf16>
    %cst_170 = arith.constant dense<0.000000e+00> : vector<12x12xf32>
    %563 = tpu.matmul %561, %562, %cst_170 {dimension_numbers = #tpu.dot_dimension_numbers<[1], [1], [0], [0], [0, 0, 1, 0], [], []>} : vector<12x32xbf16>, vector<12x32xbf16>, vector<12x12xf32> -> vector<12x12xf32>
    %cst_171 = arith.constant 0.176776692 : f32
    %564 = vector.broadcast %cst_171 : f32 to vector<12x12xf32>
    %565 = arith.mulf %563, %564 : vector<12x12xf32>
    %566 = arith.addf %565, %407 : vector<12x12xf32>
    %cst_172 = arith.constant dense<0xFF800000> : vector<12xf32>
    %567 = vector.multi_reduction <maximumf>, %566, %cst_172 [1] : vector<12x12xf32> to vector<12xf32>
    %568 = vector.shape_cast %567 : vector<12xf32> to vector<12x1xf32>
    %569 = vector.broadcast %568 : vector<12x1xf32> to vector<12x12xf32>
    %570 = arith.subf %566, %569 : vector<12x12xf32>
    %571 = math.exp %570 : vector<12x12xf32>
    %cst_173 = arith.constant dense<0.000000e+00> : vector<12xf32>
    %572 = vector.multi_reduction <add>, %571, %cst_173 [1] : vector<12x12xf32> to vector<12xf32>
    %573 = vector.shape_cast %572 : vector<12xf32> to vector<12x1xf32>
    %574 = tpu.reciprocal %573 {approx = true} : vector<12x1xf32> -> vector<12x1xf32>
    %575 = vector.broadcast %574 : vector<12x1xf32> to vector<12x12xf32>
    %576 = arith.mulf %571, %575 : vector<12x12xf32>
    %577 = arith.truncf %576 : vector<12x12xf32> to vector<12x12xbf16>
    %578 = arith.truncf %544 : vector<12x32xf32> to vector<12x32xbf16>
    %cst_174 = arith.constant dense<0.000000e+00> : vector<12x32xf32>
    %579 = tpu.matmul %577, %578, %cst_174 {dimension_numbers = #tpu.dot_dimension_numbers<[1], [0], [0], [1], [0, 0, 1, 1], [], []>} : vector<12x12xbf16>, vector<12x32xbf16>, vector<12x32xf32> -> vector<12x32xf32>
    %580 = tpu.concatenate %465, %503, %541, %579 in 1 : vector<12x32xf32>, vector<12x32xf32>, vector<12x32xf32>, vector<12x32xf32> -> vector<12x128xf32>
    %c0_175 = arith.constant 0 : index
    %c0_176 = arith.constant 0 : index
    %c0_177 = arith.constant 0 : index
    %581 = vector.load %arg18[%c0_175, %c0_176, %c0_177] : memref<2x128x128xbf16, #tpu.memory_space<vmem>>, vector<1x128x128xbf16>
    %582 = vector.shape_cast %581 : vector<1x128x128xbf16> to vector<128x128xbf16>
    %583 = arith.truncf %580 : vector<12x128xf32> to vector<12x128xbf16>
    %cst_178 = arith.constant dense<0.000000e+00> : vector<12x128xf32>
    %584 = tpu.matmul %583, %582, %cst_178 {dimension_numbers = #tpu.dot_dimension_numbers<[1], [0], [0], [1], [0, 0, 1, 1], [], []>} : vector<12x128xbf16>, vector<128x128xbf16>, vector<12x128xf32> -> vector<12x128xf32>
    %585 = arith.addf %405, %584 : vector<12x128xf32>
    %586 = vector.extract_strided_slice %410 {offsets = [1, 0], sizes = [1, 128], strides = [1, 1]} : vector<5x128xf32> to vector<1x128xf32>
    %587 = arith.mulf %585, %585 : vector<12x128xf32>
    %cst_179 = arith.constant dense<0.000000e+00> : vector<12xf32>
    %588 = vector.multi_reduction <add>, %587, %cst_179 [1] : vector<12x128xf32> to vector<12xf32>
    %589 = vector.shape_cast %588 : vector<12xf32> to vector<12x1xf32>
    %cst_180 = arith.constant 1.280000e+02 : f32
    %590 = vector.broadcast %cst_180 : f32 to vector<12x1xf32>
    %591 = arith.divf %589, %590 : vector<12x1xf32>
    %cst_181 = arith.constant 9.99999974E-6 : f32
    %592 = vector.broadcast %cst_181 : f32 to vector<12x1xf32>
    %593 = arith.addf %591, %592 : vector<12x1xf32>
    %594 = math.rsqrt %593 : vector<12x1xf32>
    %595 = vector.broadcast %594 : vector<12x1xf32> to vector<12x128xf32>
    %596 = arith.mulf %585, %595 : vector<12x128xf32>
    %597 = vector.broadcast %586 : vector<1x128xf32> to vector<12x128xf32>
    %598 = arith.mulf %596, %597 : vector<12x128xf32>
    %c0_182 = arith.constant 0 : index
    %c0_183 = arith.constant 0 : index
    %c0_184 = arith.constant 0 : index
    %599 = vector.load %arg19[%c0_182, %c0_183, %c0_184] : memref<2x128x512xbf16, #tpu.memory_space<vmem>>, vector<1x128x512xbf16>
    %600 = vector.shape_cast %599 : vector<1x128x512xbf16> to vector<128x512xbf16>
    %601 = arith.truncf %598 : vector<12x128xf32> to vector<12x128xbf16>
    %cst_185 = arith.constant dense<0.000000e+00> : vector<12x512xf32>
    %602 = tpu.matmul %601, %600, %cst_185 {dimension_numbers = #tpu.dot_dimension_numbers<[1], [0], [0], [1], [0, 0, 1, 1], [], []>} : vector<12x128xbf16>, vector<128x512xbf16>, vector<12x512xf32> -> vector<12x512xf32>
    %603 = vector.extract_strided_slice %602 {offsets = [0, 0], sizes = [12, 256], strides = [1, 1]} : vector<12x512xf32> to vector<12x256xf32>
    %cst_186 = arith.constant 0.000000e+00 : f32
    %604 = vector.broadcast %cst_186 : f32 to vector<12x256xf32>
    %605 = arith.subf %604, %603 : vector<12x256xf32>
    %606 = math.exp %605 : vector<12x256xf32>
    %cst_187 = arith.constant 1.000000e+00 : f32
    %607 = vector.broadcast %cst_187 : f32 to vector<12x256xf32>
    %608 = arith.addf %607, %606 : vector<12x256xf32>
    %cst_188 = arith.constant 1.000000e+00 : f32
    %609 = vector.broadcast %cst_188 : f32 to vector<12x256xf32>
    %610 = arith.divf %609, %608 : vector<12x256xf32>
    %611 = arith.mulf %603, %610 : vector<12x256xf32>
    %612 = vector.extract_strided_slice %602 {offsets = [0, 256], sizes = [12, 256], strides = [1, 1]} : vector<12x512xf32> to vector<12x256xf32>
    %613 = arith.mulf %611, %612 : vector<12x256xf32>
    %c0_189 = arith.constant 0 : index
    %c0_190 = arith.constant 0 : index
    %c0_191 = arith.constant 0 : index
    %614 = vector.load %arg20[%c0_189, %c0_190, %c0_191] : memref<2x256x128xbf16, #tpu.memory_space<vmem>>, vector<1x256x128xbf16>
    %615 = vector.shape_cast %614 : vector<1x256x128xbf16> to vector<256x128xbf16>
    %616 = arith.truncf %613 : vector<12x256xf32> to vector<12x256xbf16>
    %cst_192 = arith.constant dense<0.000000e+00> : vector<12x128xf32>
    %617 = tpu.matmul %616, %615, %cst_192 {dimension_numbers = #tpu.dot_dimension_numbers<[1], [0], [0], [1], [0, 0, 1, 1], [], []>} : vector<12x256xbf16>, vector<256x128xbf16>, vector<12x128xf32> -> vector<12x128xf32>
    %618 = arith.addf %585, %617 : vector<12x128xf32>
    %619 = vector.extract_strided_slice %410 {offsets = [2, 0], sizes = [1, 128], strides = [1, 1]} : vector<5x128xf32> to vector<1x128xf32>
    %620 = arith.mulf %618, %618 : vector<12x128xf32>
    %cst_193 = arith.constant dense<0.000000e+00> : vector<12xf32>
    %621 = vector.multi_reduction <add>, %620, %cst_193 [1] : vector<12x128xf32> to vector<12xf32>
    %622 = vector.shape_cast %621 : vector<12xf32> to vector<12x1xf32>
    %cst_194 = arith.constant 1.280000e+02 : f32
    %623 = vector.broadcast %cst_194 : f32 to vector<12x1xf32>
    %624 = arith.divf %622, %623 : vector<12x1xf32>
    %cst_195 = arith.constant 9.99999974E-6 : f32
    %625 = vector.broadcast %cst_195 : f32 to vector<12x1xf32>
    %626 = arith.addf %624, %625 : vector<12x1xf32>
    %627 = math.rsqrt %626 : vector<12x1xf32>
    %628 = vector.broadcast %627 : vector<12x1xf32> to vector<12x128xf32>
    %629 = arith.mulf %618, %628 : vector<12x128xf32>
    %630 = vector.broadcast %619 : vector<1x128xf32> to vector<12x128xf32>
    %631 = arith.mulf %629, %630 : vector<12x128xf32>
    %c1_196 = arith.constant 1 : index
    %c0_197 = arith.constant 0 : index
    %c0_198 = arith.constant 0 : index
    %632 = vector.load %arg17[%c1_196, %c0_197, %c0_198] : memref<2x128x384xbf16, #tpu.memory_space<vmem>>, vector<1x128x384xbf16>
    %633 = vector.shape_cast %632 : vector<1x128x384xbf16> to vector<128x384xbf16>
    %634 = arith.truncf %631 : vector<12x128xf32> to vector<12x128xbf16>
    %cst_199 = arith.constant dense<0.000000e+00> : vector<12x384xf32>
    %635 = tpu.matmul %634, %633, %cst_199 {dimension_numbers = #tpu.dot_dimension_numbers<[1], [0], [0], [1], [0, 0, 1, 1], [], []>} : vector<12x128xbf16>, vector<128x384xbf16>, vector<12x384xf32> -> vector<12x384xf32>
    %636 = vector.extract_strided_slice %635 {offsets = [0, 0], sizes = [12, 32], strides = [1, 1]} : vector<12x384xf32> to vector<12x32xf32>
    %637 = vector.extract_strided_slice %635 {offsets = [0, 128], sizes = [12, 32], strides = [1, 1]} : vector<12x384xf32> to vector<12x32xf32>
    %638 = vector.extract_strided_slice %635 {offsets = [0, 256], sizes = [12, 32], strides = [1, 1]} : vector<12x384xf32> to vector<12x32xf32>
    %639 = vector.extract_strided_slice %636 {offsets = [0, 16], sizes = [12, 16], strides = [1, 1]} : vector<12x32xf32> to vector<12x16xf32>
    %cst_200 = arith.constant 0.000000e+00 : f32
    %640 = vector.broadcast %cst_200 : f32 to vector<12x16xf32>
    %641 = arith.subf %640, %639 : vector<12x16xf32>
    %642 = vector.extract_strided_slice %636 {offsets = [0, 0], sizes = [12, 16], strides = [1, 1]} : vector<12x32xf32> to vector<12x16xf32>
    %643 = tpu.concatenate %641, %642 in 1 : vector<12x16xf32>, vector<12x16xf32> -> vector<12x32xf32>
    %644 = arith.mulf %636, %408 : vector<12x32xf32>
    %645 = arith.mulf %643, %409 : vector<12x32xf32>
    %646 = arith.addf %644, %645 : vector<12x32xf32>
    %647 = vector.extract_strided_slice %637 {offsets = [0, 16], sizes = [12, 16], strides = [1, 1]} : vector<12x32xf32> to vector<12x16xf32>
    %cst_201 = arith.constant 0.000000e+00 : f32
    %648 = vector.broadcast %cst_201 : f32 to vector<12x16xf32>
    %649 = arith.subf %648, %647 : vector<12x16xf32>
    %650 = vector.extract_strided_slice %637 {offsets = [0, 0], sizes = [12, 16], strides = [1, 1]} : vector<12x32xf32> to vector<12x16xf32>
    %651 = tpu.concatenate %649, %650 in 1 : vector<12x16xf32>, vector<12x16xf32> -> vector<12x32xf32>
    %652 = arith.mulf %637, %408 : vector<12x32xf32>
    %653 = arith.mulf %651, %409 : vector<12x32xf32>
    %654 = arith.addf %652, %653 : vector<12x32xf32>
    %655 = arith.truncf %646 : vector<12x32xf32> to vector<12x32xbf16>
    %656 = arith.truncf %654 : vector<12x32xf32> to vector<12x32xbf16>
    %cst_202 = arith.constant dense<0.000000e+00> : vector<12x12xf32>
    %657 = tpu.matmul %655, %656, %cst_202 {dimension_numbers = #tpu.dot_dimension_numbers<[1], [1], [0], [0], [0, 0, 1, 0], [], []>} : vector<12x32xbf16>, vector<12x32xbf16>, vector<12x12xf32> -> vector<12x12xf32>
    %cst_203 = arith.constant 0.176776692 : f32
    %658 = vector.broadcast %cst_203 : f32 to vector<12x12xf32>
    %659 = arith.mulf %657, %658 : vector<12x12xf32>
    %660 = arith.addf %659, %407 : vector<12x12xf32>
    %cst_204 = arith.constant dense<0xFF800000> : vector<12xf32>
    %661 = vector.multi_reduction <maximumf>, %660, %cst_204 [1] : vector<12x12xf32> to vector<12xf32>
    %662 = vector.shape_cast %661 : vector<12xf32> to vector<12x1xf32>
    %663 = vector.broadcast %662 : vector<12x1xf32> to vector<12x12xf32>
    %664 = arith.subf %660, %663 : vector<12x12xf32>
    %665 = math.exp %664 : vector<12x12xf32>
    %cst_205 = arith.constant dense<0.000000e+00> : vector<12xf32>
    %666 = vector.multi_reduction <add>, %665, %cst_205 [1] : vector<12x12xf32> to vector<12xf32>
    %667 = vector.shape_cast %666 : vector<12xf32> to vector<12x1xf32>
    %668 = tpu.reciprocal %667 {approx = true} : vector<12x1xf32> -> vector<12x1xf32>
    %669 = vector.broadcast %668 : vector<12x1xf32> to vector<12x12xf32>
    %670 = arith.mulf %665, %669 : vector<12x12xf32>
    %671 = arith.truncf %670 : vector<12x12xf32> to vector<12x12xbf16>
    %672 = arith.truncf %638 : vector<12x32xf32> to vector<12x32xbf16>
    %cst_206 = arith.constant dense<0.000000e+00> : vector<12x32xf32>
    %673 = tpu.matmul %671, %672, %cst_206 {dimension_numbers = #tpu.dot_dimension_numbers<[1], [0], [0], [1], [0, 0, 1, 1], [], []>} : vector<12x12xbf16>, vector<12x32xbf16>, vector<12x32xf32> -> vector<12x32xf32>
    %674 = vector.extract_strided_slice %635 {offsets = [0, 32], sizes = [12, 32], strides = [1, 1]} : vector<12x384xf32> to vector<12x32xf32>
    %675 = vector.extract_strided_slice %635 {offsets = [0, 160], sizes = [12, 32], strides = [1, 1]} : vector<12x384xf32> to vector<12x32xf32>
    %676 = vector.extract_strided_slice %635 {offsets = [0, 288], sizes = [12, 32], strides = [1, 1]} : vector<12x384xf32> to vector<12x32xf32>
    %677 = vector.extract_strided_slice %674 {offsets = [0, 16], sizes = [12, 16], strides = [1, 1]} : vector<12x32xf32> to vector<12x16xf32>
    %cst_207 = arith.constant 0.000000e+00 : f32
    %678 = vector.broadcast %cst_207 : f32 to vector<12x16xf32>
    %679 = arith.subf %678, %677 : vector<12x16xf32>
    %680 = vector.extract_strided_slice %674 {offsets = [0, 0], sizes = [12, 16], strides = [1, 1]} : vector<12x32xf32> to vector<12x16xf32>
    %681 = tpu.concatenate %679, %680 in 1 : vector<12x16xf32>, vector<12x16xf32> -> vector<12x32xf32>
    %682 = arith.mulf %674, %408 : vector<12x32xf32>
    %683 = arith.mulf %681, %409 : vector<12x32xf32>
    %684 = arith.addf %682, %683 : vector<12x32xf32>
    %685 = vector.extract_strided_slice %675 {offsets = [0, 16], sizes = [12, 16], strides = [1, 1]} : vector<12x32xf32> to vector<12x16xf32>
    %cst_208 = arith.constant 0.000000e+00 : f32
    %686 = vector.broadcast %cst_208 : f32 to vector<12x16xf32>
    %687 = arith.subf %686, %685 : vector<12x16xf32>
    %688 = vector.extract_strided_slice %675 {offsets = [0, 0], sizes = [12, 16], strides = [1, 1]} : vector<12x32xf32> to vector<12x16xf32>
    %689 = tpu.concatenate %687, %688 in 1 : vector<12x16xf32>, vector<12x16xf32> -> vector<12x32xf32>
    %690 = arith.mulf %675, %408 : vector<12x32xf32>
    %691 = arith.mulf %689, %409 : vector<12x32xf32>
    %692 = arith.addf %690, %691 : vector<12x32xf32>
    %693 = arith.truncf %684 : vector<12x32xf32> to vector<12x32xbf16>
    %694 = arith.truncf %692 : vector<12x32xf32> to vector<12x32xbf16>
    %cst_209 = arith.constant dense<0.000000e+00> : vector<12x12xf32>
    %695 = tpu.matmul %693, %694, %cst_209 {dimension_numbers = #tpu.dot_dimension_numbers<[1], [1], [0], [0], [0, 0, 1, 0], [], []>} : vector<12x32xbf16>, vector<12x32xbf16>, vector<12x12xf32> -> vector<12x12xf32>
    %cst_210 = arith.constant 0.176776692 : f32
    %696 = vector.broadcast %cst_210 : f32 to vector<12x12xf32>
    %697 = arith.mulf %695, %696 : vector<12x12xf32>
    %698 = arith.addf %697, %407 : vector<12x12xf32>
    %cst_211 = arith.constant dense<0xFF800000> : vector<12xf32>
    %699 = vector.multi_reduction <maximumf>, %698, %cst_211 [1] : vector<12x12xf32> to vector<12xf32>
    %700 = vector.shape_cast %699 : vector<12xf32> to vector<12x1xf32>
    %701 = vector.broadcast %700 : vector<12x1xf32> to vector<12x12xf32>
    %702 = arith.subf %698, %701 : vector<12x12xf32>
    %703 = math.exp %702 : vector<12x12xf32>
    %cst_212 = arith.constant dense<0.000000e+00> : vector<12xf32>
    %704 = vector.multi_reduction <add>, %703, %cst_212 [1] : vector<12x12xf32> to vector<12xf32>
    %705 = vector.shape_cast %704 : vector<12xf32> to vector<12x1xf32>
    %706 = tpu.reciprocal %705 {approx = true} : vector<12x1xf32> -> vector<12x1xf32>
    %707 = vector.broadcast %706 : vector<12x1xf32> to vector<12x12xf32>
    %708 = arith.mulf %703, %707 : vector<12x12xf32>
    %709 = arith.truncf %708 : vector<12x12xf32> to vector<12x12xbf16>
    %710 = arith.truncf %676 : vector<12x32xf32> to vector<12x32xbf16>
    %cst_213 = arith.constant dense<0.000000e+00> : vector<12x32xf32>
    %711 = tpu.matmul %709, %710, %cst_213 {dimension_numbers = #tpu.dot_dimension_numbers<[1], [0], [0], [1], [0, 0, 1, 1], [], []>} : vector<12x12xbf16>, vector<12x32xbf16>, vector<12x32xf32> -> vector<12x32xf32>
    %712 = vector.extract_strided_slice %635 {offsets = [0, 64], sizes = [12, 32], strides = [1, 1]} : vector<12x384xf32> to vector<12x32xf32>
    %713 = vector.extract_strided_slice %635 {offsets = [0, 192], sizes = [12, 32], strides = [1, 1]} : vector<12x384xf32> to vector<12x32xf32>
    %714 = vector.extract_strided_slice %635 {offsets = [0, 320], sizes = [12, 32], strides = [1, 1]} : vector<12x384xf32> to vector<12x32xf32>
    %715 = vector.extract_strided_slice %712 {offsets = [0, 16], sizes = [12, 16], strides = [1, 1]} : vector<12x32xf32> to vector<12x16xf32>
    %cst_214 = arith.constant 0.000000e+00 : f32
    %716 = vector.broadcast %cst_214 : f32 to vector<12x16xf32>
    %717 = arith.subf %716, %715 : vector<12x16xf32>
    %718 = vector.extract_strided_slice %712 {offsets = [0, 0], sizes = [12, 16], strides = [1, 1]} : vector<12x32xf32> to vector<12x16xf32>
    %719 = tpu.concatenate %717, %718 in 1 : vector<12x16xf32>, vector<12x16xf32> -> vector<12x32xf32>
    %720 = arith.mulf %712, %408 : vector<12x32xf32>
    %721 = arith.mulf %719, %409 : vector<12x32xf32>
    %722 = arith.addf %720, %721 : vector<12x32xf32>
    %723 = vector.extract_strided_slice %713 {offsets = [0, 16], sizes = [12, 16], strides = [1, 1]} : vector<12x32xf32> to vector<12x16xf32>
    %cst_215 = arith.constant 0.000000e+00 : f32
    %724 = vector.broadcast %cst_215 : f32 to vector<12x16xf32>
    %725 = arith.subf %724, %723 : vector<12x16xf32>
    %726 = vector.extract_strided_slice %713 {offsets = [0, 0], sizes = [12, 16], strides = [1, 1]} : vector<12x32xf32> to vector<12x16xf32>
    %727 = tpu.concatenate %725, %726 in 1 : vector<12x16xf32>, vector<12x16xf32> -> vector<12x32xf32>
    %728 = arith.mulf %713, %408 : vector<12x32xf32>
    %729 = arith.mulf %727, %409 : vector<12x32xf32>
    %730 = arith.addf %728, %729 : vector<12x32xf32>
    %731 = arith.truncf %722 : vector<12x32xf32> to vector<12x32xbf16>
    %732 = arith.truncf %730 : vector<12x32xf32> to vector<12x32xbf16>
    %cst_216 = arith.constant dense<0.000000e+00> : vector<12x12xf32>
    %733 = tpu.matmul %731, %732, %cst_216 {dimension_numbers = #tpu.dot_dimension_numbers<[1], [1], [0], [0], [0, 0, 1, 0], [], []>} : vector<12x32xbf16>, vector<12x32xbf16>, vector<12x12xf32> -> vector<12x12xf32>
    %cst_217 = arith.constant 0.176776692 : f32
    %734 = vector.broadcast %cst_217 : f32 to vector<12x12xf32>
    %735 = arith.mulf %733, %734 : vector<12x12xf32>
    %736 = arith.addf %735, %407 : vector<12x12xf32>
    %cst_218 = arith.constant dense<0xFF800000> : vector<12xf32>
    %737 = vector.multi_reduction <maximumf>, %736, %cst_218 [1] : vector<12x12xf32> to vector<12xf32>
    %738 = vector.shape_cast %737 : vector<12xf32> to vector<12x1xf32>
    %739 = vector.broadcast %738 : vector<12x1xf32> to vector<12x12xf32>
    %740 = arith.subf %736, %739 : vector<12x12xf32>
    %741 = math.exp %740 : vector<12x12xf32>
    %cst_219 = arith.constant dense<0.000000e+00> : vector<12xf32>
    %742 = vector.multi_reduction <add>, %741, %cst_219 [1] : vector<12x12xf32> to vector<12xf32>
    %743 = vector.shape_cast %742 : vector<12xf32> to vector<12x1xf32>
    %744 = tpu.reciprocal %743 {approx = true} : vector<12x1xf32> -> vector<12x1xf32>
    %745 = vector.broadcast %744 : vector<12x1xf32> to vector<12x12xf32>
    %746 = arith.mulf %741, %745 : vector<12x12xf32>
    %747 = arith.truncf %746 : vector<12x12xf32> to vector<12x12xbf16>
    %748 = arith.truncf %714 : vector<12x32xf32> to vector<12x32xbf16>
    %cst_220 = arith.constant dense<0.000000e+00> : vector<12x32xf32>
    %749 = tpu.matmul %747, %748, %cst_220 {dimension_numbers = #tpu.dot_dimension_numbers<[1], [0], [0], [1], [0, 0, 1, 1], [], []>} : vector<12x12xbf16>, vector<12x32xbf16>, vector<12x32xf32> -> vector<12x32xf32>
    %750 = vector.extract_strided_slice %635 {offsets = [0, 96], sizes = [12, 32], strides = [1, 1]} : vector<12x384xf32> to vector<12x32xf32>
    %751 = vector.extract_strided_slice %635 {offsets = [0, 224], sizes = [12, 32], strides = [1, 1]} : vector<12x384xf32> to vector<12x32xf32>
    %752 = vector.extract_strided_slice %635 {offsets = [0, 352], sizes = [12, 32], strides = [1, 1]} : vector<12x384xf32> to vector<12x32xf32>
    %753 = vector.extract_strided_slice %750 {offsets = [0, 16], sizes = [12, 16], strides = [1, 1]} : vector<12x32xf32> to vector<12x16xf32>
    %cst_221 = arith.constant 0.000000e+00 : f32
    %754 = vector.broadcast %cst_221 : f32 to vector<12x16xf32>
    %755 = arith.subf %754, %753 : vector<12x16xf32>
    %756 = vector.extract_strided_slice %750 {offsets = [0, 0], sizes = [12, 16], strides = [1, 1]} : vector<12x32xf32> to vector<12x16xf32>
    %757 = tpu.concatenate %755, %756 in 1 : vector<12x16xf32>, vector<12x16xf32> -> vector<12x32xf32>
    %758 = arith.mulf %750, %408 : vector<12x32xf32>
    %759 = arith.mulf %757, %409 : vector<12x32xf32>
    %760 = arith.addf %758, %759 : vector<12x32xf32>
    %761 = vector.extract_strided_slice %751 {offsets = [0, 16], sizes = [12, 16], strides = [1, 1]} : vector<12x32xf32> to vector<12x16xf32>
    %cst_222 = arith.constant 0.000000e+00 : f32
    %762 = vector.broadcast %cst_222 : f32 to vector<12x16xf32>
    %763 = arith.subf %762, %761 : vector<12x16xf32>
    %764 = vector.extract_strided_slice %751 {offsets = [0, 0], sizes = [12, 16], strides = [1, 1]} : vector<12x32xf32> to vector<12x16xf32>
    %765 = tpu.concatenate %763, %764 in 1 : vector<12x16xf32>, vector<12x16xf32> -> vector<12x32xf32>
    %766 = arith.mulf %751, %408 : vector<12x32xf32>
    %767 = arith.mulf %765, %409 : vector<12x32xf32>
    %768 = arith.addf %766, %767 : vector<12x32xf32>
    %769 = arith.truncf %760 : vector<12x32xf32> to vector<12x32xbf16>
    %770 = arith.truncf %768 : vector<12x32xf32> to vector<12x32xbf16>
    %cst_223 = arith.constant dense<0.000000e+00> : vector<12x12xf32>
    %771 = tpu.matmul %769, %770, %cst_223 {dimension_numbers = #tpu.dot_dimension_numbers<[1], [1], [0], [0], [0, 0, 1, 0], [], []>} : vector<12x32xbf16>, vector<12x32xbf16>, vector<12x12xf32> -> vector<12x12xf32>
    %cst_224 = arith.constant 0.176776692 : f32
    %772 = vector.broadcast %cst_224 : f32 to vector<12x12xf32>
    %773 = arith.mulf %771, %772 : vector<12x12xf32>
    %774 = arith.addf %773, %407 : vector<12x12xf32>
    %cst_225 = arith.constant dense<0xFF800000> : vector<12xf32>
    %775 = vector.multi_reduction <maximumf>, %774, %cst_225 [1] : vector<12x12xf32> to vector<12xf32>
    %776 = vector.shape_cast %775 : vector<12xf32> to vector<12x1xf32>
    %777 = vector.broadcast %776 : vector<12x1xf32> to vector<12x12xf32>
    %778 = arith.subf %774, %777 : vector<12x12xf32>
    %779 = math.exp %778 : vector<12x12xf32>
    %cst_226 = arith.constant dense<0.000000e+00> : vector<12xf32>
    %780 = vector.multi_reduction <add>, %779, %cst_226 [1] : vector<12x12xf32> to vector<12xf32>
    %781 = vector.shape_cast %780 : vector<12xf32> to vector<12x1xf32>
    %782 = tpu.reciprocal %781 {approx = true} : vector<12x1xf32> -> vector<12x1xf32>
    %783 = vector.broadcast %782 : vector<12x1xf32> to vector<12x12xf32>
    %784 = arith.mulf %779, %783 : vector<12x12xf32>
    %785 = arith.truncf %784 : vector<12x12xf32> to vector<12x12xbf16>
    %786 = arith.truncf %752 : vector<12x32xf32> to vector<12x32xbf16>
    %cst_227 = arith.constant dense<0.000000e+00> : vector<12x32xf32>
    %787 = tpu.matmul %785, %786, %cst_227 {dimension_numbers = #tpu.dot_dimension_numbers<[1], [0], [0], [1], [0, 0, 1, 1], [], []>} : vector<12x12xbf16>, vector<12x32xbf16>, vector<12x32xf32> -> vector<12x32xf32>
    %788 = tpu.concatenate %673, %711, %749, %787 in 1 : vector<12x32xf32>, vector<12x32xf32>, vector<12x32xf32>, vector<12x32xf32> -> vector<12x128xf32>
    %c1_228 = arith.constant 1 : index
    %c0_229 = arith.constant 0 : index
    %c0_230 = arith.constant 0 : index
    %789 = vector.load %arg18[%c1_228, %c0_229, %c0_230] : memref<2x128x128xbf16, #tpu.memory_space<vmem>>, vector<1x128x128xbf16>
    %790 = vector.shape_cast %789 : vector<1x128x128xbf16> to vector<128x128xbf16>
    %791 = arith.truncf %788 : vector<12x128xf32> to vector<12x128xbf16>
    %cst_231 = arith.constant dense<0.000000e+00> : vector<12x128xf32>
    %792 = tpu.matmul %791, %790, %cst_231 {dimension_numbers = #tpu.dot_dimension_numbers<[1], [0], [0], [1], [0, 0, 1, 1], [], []>} : vector<12x128xbf16>, vector<128x128xbf16>, vector<12x128xf32> -> vector<12x128xf32>
    %793 = arith.addf %618, %792 : vector<12x128xf32>
    %794 = vector.extract_strided_slice %410 {offsets = [3, 0], sizes = [1, 128], strides = [1, 1]} : vector<5x128xf32> to vector<1x128xf32>
    %795 = arith.mulf %793, %793 : vector<12x128xf32>
    %cst_232 = arith.constant dense<0.000000e+00> : vector<12xf32>
    %796 = vector.multi_reduction <add>, %795, %cst_232 [1] : vector<12x128xf32> to vector<12xf32>
    %797 = vector.shape_cast %796 : vector<12xf32> to vector<12x1xf32>
    %cst_233 = arith.constant 1.280000e+02 : f32
    %798 = vector.broadcast %cst_233 : f32 to vector<12x1xf32>
    %799 = arith.divf %797, %798 : vector<12x1xf32>
    %cst_234 = arith.constant 9.99999974E-6 : f32
    %800 = vector.broadcast %cst_234 : f32 to vector<12x1xf32>
    %801 = arith.addf %799, %800 : vector<12x1xf32>
    %802 = math.rsqrt %801 : vector<12x1xf32>
    %803 = vector.broadcast %802 : vector<12x1xf32> to vector<12x128xf32>
    %804 = arith.mulf %793, %803 : vector<12x128xf32>
    %805 = vector.broadcast %794 : vector<1x128xf32> to vector<12x128xf32>
    %806 = arith.mulf %804, %805 : vector<12x128xf32>
    %c1_235 = arith.constant 1 : index
    %c0_236 = arith.constant 0 : index
    %c0_237 = arith.constant 0 : index
    %807 = vector.load %arg19[%c1_235, %c0_236, %c0_237] : memref<2x128x512xbf16, #tpu.memory_space<vmem>>, vector<1x128x512xbf16>
    %808 = vector.shape_cast %807 : vector<1x128x512xbf16> to vector<128x512xbf16>
    %809 = arith.truncf %806 : vector<12x128xf32> to vector<12x128xbf16>
    %cst_238 = arith.constant dense<0.000000e+00> : vector<12x512xf32>
    %810 = tpu.matmul %809, %808, %cst_238 {dimension_numbers = #tpu.dot_dimension_numbers<[1], [0], [0], [1], [0, 0, 1, 1], [], []>} : vector<12x128xbf16>, vector<128x512xbf16>, vector<12x512xf32> -> vector<12x512xf32>
    %811 = vector.extract_strided_slice %810 {offsets = [0, 0], sizes = [12, 256], strides = [1, 1]} : vector<12x512xf32> to vector<12x256xf32>
    %cst_239 = arith.constant 0.000000e+00 : f32
    %812 = vector.broadcast %cst_239 : f32 to vector<12x256xf32>
    %813 = arith.subf %812, %811 : vector<12x256xf32>
    %814 = math.exp %813 : vector<12x256xf32>
    %cst_240 = arith.constant 1.000000e+00 : f32
    %815 = vector.broadcast %cst_240 : f32 to vector<12x256xf32>
    %816 = arith.addf %815, %814 : vector<12x256xf32>
    %cst_241 = arith.constant 1.000000e+00 : f32
    %817 = vector.broadcast %cst_241 : f32 to vector<12x256xf32>
    %818 = arith.divf %817, %816 : vector<12x256xf32>
    %819 = arith.mulf %811, %818 : vector<12x256xf32>
    %820 = vector.extract_strided_slice %810 {offsets = [0, 256], sizes = [12, 256], strides = [1, 1]} : vector<12x512xf32> to vector<12x256xf32>
    %821 = arith.mulf %819, %820 : vector<12x256xf32>
    %c1_242 = arith.constant 1 : index
    %c0_243 = arith.constant 0 : index
    %c0_244 = arith.constant 0 : index
    %822 = vector.load %arg20[%c1_242, %c0_243, %c0_244] : memref<2x256x128xbf16, #tpu.memory_space<vmem>>, vector<1x256x128xbf16>
    %823 = vector.shape_cast %822 : vector<1x256x128xbf16> to vector<256x128xbf16>
    %824 = arith.truncf %821 : vector<12x256xf32> to vector<12x256xbf16>
    %cst_245 = arith.constant dense<0.000000e+00> : vector<12x128xf32>
    %825 = tpu.matmul %824, %823, %cst_245 {dimension_numbers = #tpu.dot_dimension_numbers<[1], [0], [0], [1], [0, 0, 1, 1], [], []>} : vector<12x256xbf16>, vector<256x128xbf16>, vector<12x128xf32> -> vector<12x128xf32>
    %826 = arith.addf %793, %825 : vector<12x128xf32>
    %827 = vector.extract_strided_slice %410 {offsets = [4, 0], sizes = [1, 128], strides = [1, 1]} : vector<5x128xf32> to vector<1x128xf32>
    %828 = arith.mulf %826, %826 : vector<12x128xf32>
    %cst_246 = arith.constant dense<0.000000e+00> : vector<12xf32>
    %829 = vector.multi_reduction <add>, %828, %cst_246 [1] : vector<12x128xf32> to vector<12xf32>
    %830 = vector.shape_cast %829 : vector<12xf32> to vector<12x1xf32>
    %cst_247 = arith.constant 1.280000e+02 : f32
    %831 = vector.broadcast %cst_247 : f32 to vector<12x1xf32>
    %832 = arith.divf %830, %831 : vector<12x1xf32>
    %cst_248 = arith.constant 9.99999974E-6 : f32
    %833 = vector.broadcast %cst_248 : f32 to vector<12x1xf32>
    %834 = arith.addf %832, %833 : vector<12x1xf32>
    %835 = math.rsqrt %834 : vector<12x1xf32>
    %836 = vector.broadcast %835 : vector<12x1xf32> to vector<12x128xf32>
    %837 = arith.mulf %826, %836 : vector<12x128xf32>
    %838 = vector.broadcast %827 : vector<1x128xf32> to vector<12x128xf32>
    %839 = arith.mulf %837, %838 : vector<12x128xf32>
    %c0_249 = arith.constant 0 : index
    %c0_250 = arith.constant 0 : index
    %840 = vector.load %arg21[%c0_249, %c0_250] : memref<128x512xbf16, #tpu.memory_space<vmem>>, vector<128x512xbf16>
    %841 = arith.truncf %839 : vector<12x128xf32> to vector<12x128xbf16>
    %cst_251 = arith.constant dense<0.000000e+00> : vector<12x512xf32>
    %842 = tpu.matmul %841, %840, %cst_251 {dimension_numbers = #tpu.dot_dimension_numbers<[1], [0], [0], [1], [0, 0, 1, 1], [], []>} : vector<12x128xbf16>, vector<128x512xbf16>, vector<12x512xf32> -> vector<12x512xf32>
    %c0_252 = arith.constant 0 : index
    %c0_253 = arith.constant 0 : index
    %c0_254 = arith.constant 0 : index
    %843 = vector.load %arg22[%c0_252, %c0_253, %c0_254] : memref<1x12x512xf32, #tpu.memory_space<vmem>>, vector<1x12x512xf32>
    %844 = vector.shape_cast %843 : vector<1x12x512xf32> to vector<12x512xf32>
    %845 = vector.shape_cast %842 : vector<12x512xf32> to vector<1x12x512xf32>
    tpu.vector_store %arg22[%c0_252, %c0_253, %c0_254], %845 {strides = array<i32>} : memref<1x12x512xf32, #tpu.memory_space<vmem>>, vector<1x12x512xf32>,
    return
  }
  func.func @transform_0(%arg0: i32) -> (i32, i32, i32) {
    %c0_i32 = arith.constant 0 : i32
    %c0_i32_0 = arith.constant 0 : i32
    %c0_i32_1 = arith.constant 0 : i32
    return %arg0, %c0_i32, %c0_i32_0 : i32, i32, i32
  }
  func.func @transform_1(%arg0: i32) -> (i32, i32, i32) {
    %c0_i32 = arith.constant 0 : i32
    %c0_i32_0 = arith.constant 0 : i32
    %c0_i32_1 = arith.constant 0 : i32
    return %arg0, %c0_i32, %c0_i32_0 : i32, i32, i32
  }
  func.func @transform_2(%arg0: i32) -> (i32, i32, i32) {
    %c0_i32 = arith.constant 0 : i32
    %c0_i32_0 = arith.constant 0 : i32
    %c0_i32_1 = arith.constant 0 : i32
    return %arg0, %c0_i32, %c0_i32_0 : i32, i32, i32
  }
  func.func @transform_3(%arg0: i32) -> (i32, i32) {
    %c0_i32 = arith.constant 0 : i32
    %c0_i32_0 = arith.constant 0 : i32
    %c0_i32_1 = arith.constant 0 : i32
    return %c0_i32, %c0_i32_0 : i32, i32
  }
  func.func @transform_4(%arg0: i32) -> (i32, i32) {
    %c0_i32 = arith.constant 0 : i32
    %c0_i32_0 = arith.constant 0 : i32
    %c0_i32_1 = arith.constant 0 : i32
    return %c0_i32, %c0_i32_0 : i32, i32
  }
  func.func @transform_5(%arg0: i32) -> (i32, i32, i32) {
    %c0_i32 = arith.constant 0 : i32
    %c0_i32_0 = arith.constant 0 : i32
    %c0_i32_1 = arith.constant 0 : i32
    %c0_i32_2 = arith.constant 0 : i32
    return %c0_i32, %c0_i32_0, %c0_i32_1 : i32, i32, i32
  }
  func.func @transform_6(%arg0: i32) -> (i32, i32, i32) {
    %c0_i32 = arith.constant 0 : i32
    %c0_i32_0 = arith.constant 0 : i32
    %c0_i32_1 = arith.constant 0 : i32
    %c0_i32_2 = arith.constant 0 : i32
    return %c0_i32, %c0_i32_0, %c0_i32_1 : i32, i32, i32
  }
  func.func @transform_7(%arg0: i32) -> (i32, i32, i32) {
    %c0_i32 = arith.constant 0 : i32
    %c0_i32_0 = arith.constant 0 : i32
    %c0_i32_1 = arith.constant 0 : i32
    %c0_i32_2 = arith.constant 0 : i32
    return %c0_i32, %c0_i32_0, %c0_i32_1 : i32, i32, i32
  }
  func.func @transform_8(%arg0: i32) -> (i32, i32, i32) {
    %c0_i32 = arith.constant 0 : i32
    %c0_i32_0 = arith.constant 0 : i32
    %c0_i32_1 = arith.constant 0 : i32
    %c0_i32_2 = arith.constant 0 : i32
    return %c0_i32, %c0_i32_0, %c0_i32_1 : i32, i32, i32
  }
  func.func @transform_9(%arg0: i32) -> (i32, i32, i32) {
    %c0_i32 = arith.constant 0 : i32
    %c0_i32_0 = arith.constant 0 : i32
    %c0_i32_1 = arith.constant 0 : i32
    %c0_i32_2 = arith.constant 0 : i32
    return %c0_i32, %c0_i32_0, %c0_i32_1 : i32, i32, i32
  }
  func.func @transform_10(%arg0: i32) -> (i32, i32) {
    %c0_i32 = arith.constant 0 : i32
    %c0_i32_0 = arith.constant 0 : i32
    %c0_i32_1 = arith.constant 0 : i32
    return %c0_i32, %c0_i32_0 : i32, i32
  }
  func.func @transform_11(%arg0: i32) -> (i32, i32) {
    %c0_i32 = arith.constant 0 : i32
    %c0_i32_0 = arith.constant 0 : i32
    %c0_i32_1 = arith.constant 0 : i32
    return %c0_i32, %c0_i32_0 : i32, i32
  }
  func.func @transform_12(%arg0: i32) -> (i32, i32) {
    %c0_i32 = arith.constant 0 : i32
    %c0_i32_0 = arith.constant 0 : i32
    %c0_i32_1 = arith.constant 0 : i32
    return %c0_i32, %c0_i32_0 : i32, i32
  }
  func.func @transform_13(%arg0: i32) -> (i32, i32) {
    %c0_i32 = arith.constant 0 : i32
    %c0_i32_0 = arith.constant 0 : i32
    %c0_i32_1 = arith.constant 0 : i32
    return %c0_i32, %c0_i32_0 : i32, i32
  }
  func.func @transform_14(%arg0: i32) -> (i32, i32) {
    %c0_i32 = arith.constant 0 : i32
    %c0_i32_0 = arith.constant 0 : i32
    %c0_i32_1 = arith.constant 0 : i32
    return %c0_i32, %c0_i32_0 : i32, i32
  }
  func.func @transform_15(%arg0: i32) -> (i32, i32) {
    %c0_i32 = arith.constant 0 : i32
    %c0_i32_0 = arith.constant 0 : i32
    %c0_i32_1 = arith.constant 0 : i32
    return %c0_i32, %c0_i32_0 : i32, i32
  }
  func.func @transform_16(%arg0: i32) -> (i32, i32, i32) {
    %c0_i32 = arith.constant 0 : i32
    %c0_i32_0 = arith.constant 0 : i32
    %c0_i32_1 = arith.constant 0 : i32
    %c0_i32_2 = arith.constant 0 : i32
    return %c0_i32, %c0_i32_0, %c0_i32_1 : i32, i32, i32
  }
  func.func @transform_17(%arg0: i32) -> (i32, i32, i32) {
    %c0_i32 = arith.constant 0 : i32
    %c0_i32_0 = arith.constant 0 : i32
    %c0_i32_1 = arith.constant 0 : i32
    %c0_i32_2 = arith.constant 0 : i32
    return %c0_i32, %c0_i32_0, %c0_i32_1 : i32, i32, i32
  }
  func.func @transform_18(%arg0: i32) -> (i32, i32, i32) {
    %c0_i32 = arith.constant 0 : i32
    %c0_i32_0 = arith.constant 0 : i32
    %c0_i32_1 = arith.constant 0 : i32
    %c0_i32_2 = arith.constant 0 : i32
    return %c0_i32, %c0_i32_0, %c0_i32_1 : i32, i32, i32
  }
  func.func @transform_19(%arg0: i32) -> (i32, i32, i32) {
    %c0_i32 = arith.constant 0 : i32
    %c0_i32_0 = arith.constant 0 : i32
    %c0_i32_1 = arith.constant 0 : i32
    %c0_i32_2 = arith.constant 0 : i32
    return %c0_i32, %c0_i32_0, %c0_i32_1 : i32, i32, i32
  }
  func.func @transform_20(%arg0: i32) -> (i32, i32) {
    %c0_i32 = arith.constant 0 : i32
    %c0_i32_0 = arith.constant 0 : i32
    %c0_i32_1 = arith.constant 0 : i32
    return %c0_i32, %c0_i32_0 : i32, i32
  }
  func.func @transform_21(%arg0: i32) -> (i32, i32, i32) {
    %c0_i32 = arith.constant 0 : i32
    %c0_i32_0 = arith.constant 0 : i32
    %c0_i32_1 = arith.constant 0 : i32
    return %arg0, %c0_i32, %c0_i32_0 : i32, i32, i32
  }
}

</mosaic_0001>

<bundles_post_ra>
// kernel: smollm2_vision_forward.1
= control target key start
LH: loop header
LB: loop body
LE: loop exit
PB: predicated region body
PF: predicated region fallthrough
CT: control target
= control target key end

     0   :  { %s10774_s0 = inlined_call_operand.vmem [shape: f32[2,4,192], index: 0, kind: input, shape index: {}]   ;;  %s10775_s1 = inlined_call_operand.vmem [shape: f32[2,8,128], index: 1, kind: input, shape index: {}]   ;;  %s10776_s2 = inlined_call_operand.vmem [shape: f32[2,12,12], index: 2, kind: input, shape index: {}]   ;;  %s10777_s3 = inlined_call_operand.vmem [shape: bf16[192,64], index: 3, kind: input, shape index: {}]   ;;  %s10778_s4 = inlined_call_operand.hbm [shape: f32[4,64], index: 4, kind: input, shape index: {}]   ;;  %s10779_s5 = inlined_call_operand.vmem [shape: f32[2,8,192], index: 5, kind: input, shape index: {}]   ;;  %s10780_s6 = inlined_call_operand.vmem [shape: bf16[2,64,192], index: 6, kind: input, shape index: {}]   ;;  %s10781_s7 = inlined_call_operand.hbm [shape: bf16[2,64,64], index: 7, kind: input, shape index: {}]   ;;  %s10782_s8 = inlined_call_operand.hbm [shape: bf16[2,64,128], index: 8, kind: input, shape index: {}]   ;;  %s10783_s9 = inlined_call_operand.vmem [shape: bf16[2,128,64], index: 9, kind: input, shape index: {}]   ;;  %s10784_s10 = inlined_call_operand.hbm [shape: f32[4,128], index: 10, kind: input, shape index: {}]   ;;  %s10785_s11 = inlined_call_operand.hbm [shape: bf16[64,128], index: 11, kind: input, shape index: {}]   ;;  %s10786_s12 = inlined_call_operand.hbm [shape: bf16[128,128], index: 12, kind: input, shape index: {}]   ;;  %s10787_s13 = inlined_call_operand.vmem [shape: f32[12,32], index: 13, kind: input, shape index: {}]   ;;  %s10788_s14 = inlined_call_operand.vmem [shape: f32[12,32], index: 14, kind: input, shape index: {}]   ;;  %s10789_s15 = inlined_call_operand.hbm [shape: f32[5,128], index: 15, kind: input, shape index: {}]   ;;  %s10790_s16 = inlined_call_operand.vmem [shape: bf16[2,128,384], index: 16, kind: input, shape index: {}]   ;;  %s10791_s17 = inlined_call_operand.hbm [shape: bf16[2,128,128], index: 17, kind: input, shape index: {}]   ;;  %s10792_s18 = inlined_call_operand.vmem [shape: bf16[2,128,512], index: 18, kind: input, shape index: {}]   ;;  %s10793_s19 = inlined_call_operand.vmem [shape: bf16[2,256,128], index: 19, kind: input, shape index: {}]   ;;  %s10794_s20 = inlined_call_operand.vmem [shape: bf16[128,512], index: 20, kind: input, shape index: {}]   ;;  %s10795_s21 = inlined_call_operand.vmem [shape: f32[2,12,512], index: 21, kind: output, shape index: {}]  }
   0x1   :  { %10820 = sst [smem:[#allocation21_spill]] %s10774_s0 }
   0x2   :  { %10821 = sst [smem:[#allocation22_spill]] %s10775_s1 }
   0x3   :  { %10822 = sst [smem:[#allocation23_spill]] %s10776_s2 }
   0x4   :  { %10823 = sst [smem:[#allocation24_spill]] %s10777_s3 }
   0x5   :  { %10824 = sst [smem:[#allocation25_spill]] %s10778_s4 }
   0x6   :  { %10825 = sst [smem:[#allocation26_spill]] %s10779_s5 }
   0x7   :  { %10826 = sst [smem:[#allocation27_spill]] %s10781_s7 }
   0x8   :  { %10827 = sst [smem:[#allocation28_spill]] %s10792_s18 }
   0x9   :  { %10828 = sst [smem:[#allocation29_spill]] %s10793_s19 }
   0xa   :  { %10829 = sst [smem:[#allocation30_spill]] %s10794_s20 }
   0xb   :  { %10830 = sst [smem:[#allocation31_spill]] %s10795_s21 }
   0xc   :  { %26 = vsyncpa [#allocation3], 0 }
   0xd   :  { %27 = vsyncpa [#allocation5], 0 }
   0xe   :  { %28 = vsyncpa [#allocation8], 0 }
   0xf   :  { %29 = vsyncpa [#allocation11], 0 }
  0x10   :  { %30 = vsyncpa [#allocation14], 0  ;;  %s8839_s2 = smov 0  }
  0x11 LB: > { %10831 = sst [smem:[#allocation20_spill]] %s8707_s2  ;;  %s8709_s25 = smov [#allocation4]   ;;  %s8707_s2 = sphi %s8839_s2, %s36_s2  }
  0x12   : > { %s555_s26 = sshll.u32 %s8709_s25, 4  ;;  %s8845_s27 = sadd.s32 4294967295, %s8707_s2   ;;  %s8850_s26 = int_to_ptr.vmem [resolvable:$true] %s555_s26 }
  0x13   : > { %p6772_p0 = scmp.ge.s32.totalorder %s8707_s2, 1  ;;  %p523_p1 = scmp.lt.s32.totalorder %s8707_s2, 3 }
  0x14   : > { %p10803_p2 = scmp.eq.s32.totalorder %s8845_s27, 0  ;;  %s8710_s28 = smov [#allocation7]  }
  0x15   : > { %p8852_p3 = pnand %p6772_p0, %p523_p1  ;;  %s585_s29 = sshll.u32 %s8710_s28, 4  ;;  %s8858_s29 = int_to_ptr.vmem [resolvable:$true] %s585_s29 }
  0x16   : > { %s8711_s4 = smov [#allocation10]   ;;  %s8712_s5 = smov [#allocation2]  }
  0x17   : > { %s10832_s3 = scalar_select %p8852_p3, 1, 0 }
  0x18   : > { %p7849_p4 = pneg %p8852_p3  ;;  %s608_s30 = sshll.u32 %s8711_s4, 4  ;;  %s8866_s30 = int_to_ptr.vmem [resolvable:$true] %s608_s30 }
  0x19   : > { %s8868_s22 = sshll.u32 %s8712_s5, 4  ;;  %s10834_s7 = sld [smem:[#allocation27_spill]]  ;;  %s540_s22 = int_to_ptr.vmem [resolvable:$true] %s8868_s22 }
  0x1a   : > { %p8862_p5 = pnand %p10803_p2, %p7849_p4 }
  0x1c   : > { %p8878_p7 = pneg %p8862_p5 }
  0x1f   : > { %s8457_s24 = scalar_lea.hbm %s10834_s7, 1024 }
  0x20   : > { %p8458_p6 = scmp.ne.s32.totalorder %s10834_s7, %s8457_s24  ;;  %p8464_p10 = scmp.lt.u32.totalorder %s8457_s24, %s10834_s7 }
  0x22   : > { %p8460_p8 = pnand %p8878_p7, %p8458_p6 }
  0x24   : > { %p8461_p9 = pneg %p8460_p8 }
  0x26   : > { %p8466_p11 = pnand %p8464_p10, %p8461_p9 }
  0x28   : > { %8469 = shalt.err (!%p8466_p11)
}
  0x29   : > { %s8470_s23 = scalar_lea.vmem %s8850_s26, 1024  ;;  %p8478_p1 = scmp.lt.s32.totalorder %s8850_s26, %s8850_s26 }
  0x2a   : > { %p8471_p12 = scmp.ne.s32.totalorder %s8850_s26, %s8470_s23  ;;  %p8479_p4 = scmp.lt.s32.totalorder %s8470_s23, %s8470_s23 }
  0x2c   : > { %p8473_p13 = pnand %p8471_p12, %p8878_p7  ;;  %p8480_p6 = por %p8479_p4, %p8478_p1 }
  0x2e   : > { %p8474_p0 = pneg %p8473_p13 }
  0x30   : > { %p8481_p8 = pnand %p8480_p6, %p8474_p0 }
  0x32   : > { %8484 = shalt.err (!%p8481_p8)
}
  0x33   : > { %s10805_s1 = smov 64   ;;  %s8714_s24 = smov 4  }
  0x34   : > { %7855 = dma.hbm_to_vmem [thread:$0]  (!%p8862_p5), %s10834_s7, 1024, %s8850_s26, [#allocation5], %s10805_s1, %s10805_s1, %s8714_s24  }
  0x35   : > { %s8485_s23 = scalar_lea.hbm %s10784_s10, 64 }
  0x36   : > { %p8486_p9 = scmp.ne.s32.totalorder %s10784_s10, %s8485_s23  ;;  %p8492_p12 = scmp.lt.u32.totalorder %s8485_s23, %s10784_s10 }
  0x38   : > { %p8488_p10 = pnand %p8486_p9, %p8878_p7 }
  0x3a   : > { %p8489_p11 = pneg %p8488_p10 }
  0x3c   : > { %p8494_p13 = pnand %p8492_p12, %p8489_p11 }
  0x3e   : > { %8497 = shalt.err (!%p8494_p13)
}
  0x3f   : > { %s8498_s26 = scalar_lea.vmem %s8858_s29, 64  ;;  %p8506_p6 = scmp.lt.s32.totalorder %s8858_s29, %s8858_s29 }
  0x40   : > { %p8499_p0 = scmp.ne.s32.totalorder %s8858_s29, %s8498_s26  ;;  %p8507_p8 = scmp.lt.s32.totalorder %s8498_s26, %s8498_s26 }
  0x42   : > { %p8501_p1 = pnand %p8499_p0, %p8878_p7  ;;  %p8508_p9 = por %p8507_p8, %p8506_p6 }
  0x44   : > { %p8502_p4 = pneg %p8501_p1 }
  0x46   : > { %p8509_p10 = pnand %p8508_p9, %p8502_p4 }
  0x48   : > { %8512 = shalt.err (!%p8509_p10)
}
  0x49   : > { %7861 = dma.hbm_to_vmem [thread:$0]  (!%p8862_p5), %s10784_s10, 64, %s8858_s29, [#allocation8]  }
  0x4a   : > { %s8513_s25 = scalar_lea.hbm %s10786_s12, 1024 }
  0x4b   : > { %p8514_p11 = scmp.ne.s32.totalorder %s10786_s12, %s8513_s25  ;;  %p8520_p0 = scmp.lt.u32.totalorder %s8513_s25, %s10786_s12 }
  0x4d   : > { %p8516_p12 = pnand %p8514_p11, %p8878_p7 }
  0x4f   : > { %p8517_p13 = pneg %p8516_p12 }
  0x51   : > { %p8522_p1 = pnand %p8520_p0, %p8517_p13 }
  0x53   : > { %8525 = shalt.err (!%p8522_p1)
}
  0x54   : > { %s8526_s29 = scalar_lea.vmem %s8866_s30, 1024  ;;  %p8534_p9 = scmp.lt.s32.totalorder %s8866_s30, %s8866_s30 }
  0x55   : > { %p8527_p4 = scmp.ne.s32.totalorder %s8866_s30, %s8526_s29  ;;  %p8535_p10 = scmp.lt.s32.totalorder %s8526_s29, %s8526_s29 }
  0x57   : > { %p8529_p6 = pnand %p8527_p4, %p8878_p7  ;;  %p8536_p11 = por %p8535_p10, %p8534_p9 }
  0x59   : > { %p8530_p8 = pneg %p8529_p6 }
  0x5b   : > { %p8537_p12 = pnand %p8536_p11, %p8530_p8 }
  0x5d   : > { %8540 = shalt.err (!%p8537_p12)
}
  0x5e   : > { %7867 = dma.hbm_to_vmem [thread:$0]  (!%p8862_p5), %s10786_s12, 1024, %s8866_s30, [#allocation11], %s10805_s1, %s10805_s1, %s8714_s24  }
  0x5f   : > { %s10836_s21 = sld [smem:[#allocation25_spill]] }
  0x65   : > { %s8541_s25 = scalar_lea.hbm %s10836_s21, 64 }
  0x66   : > { %p8542_p13 = scmp.ne.s32.totalorder %s10836_s21, %s8541_s25  ;;  %p8548_p4 = scmp.lt.u32.totalorder %s8541_s25, %s10836_s21 }
  0x68   : > { %p8544_p0 = pnand %p8542_p13, %p8878_p7 }
  0x6a   : > { %p8545_p1 = pneg %p8544_p0 }
  0x6c   : > { %p8550_p6 = pnand %p8548_p4, %p8545_p1 }
  0x6e   : > { %8553 = shalt.err (!%p8550_p6)
}
  0x6f   : > { %s8554_s29 = scalar_lea.vmem %s540_s22, 64  ;;  %p8562_p11 = scmp.lt.s32.totalorder %s540_s22, %s540_s22 }
  0x70   : > { %p8555_p8 = scmp.ne.s32.totalorder %s540_s22, %s8554_s29  ;;  %p8563_p12 = scmp.lt.s32.totalorder %s8554_s29, %s8554_s29 }
  0x72   : > { %p8557_p9 = pnand %p8555_p8, %p8878_p7  ;;  %p8564_p2 = por %p8563_p12, %p8562_p11 }
  0x74   : > { %p8558_p10 = pneg %p8557_p9 }
  0x76   : > { %p8565_p3 = pnand %p8564_p2, %p8558_p10 }
  0x78   : > { %8568 = shalt.err (!%p8565_p3)
}
  0x79   : > { %7852 = dma.hbm_to_vmem [thread:$0]  (!%p8862_p5), %s10836_s21, 64, %s540_s22, [#allocation3]  }
  0x7a   : > { %s8715_s18 = smov [#allocation6]   ;;  %s8716_s20 = smov [#allocation9]  }
  0x7b   : > { %s568_s19 = sshll.u32 %s8715_s18, 4  ;;  %s595_s25 = sshll.u32 %s8716_s20, 4  ;;  %s569_s19 = int_to_ptr.vmem [resolvable:$true] %s568_s19  ;;  %s596_s25 = int_to_ptr.vmem [resolvable:$true] %s595_s25 }
  0x7c   : > { %s8569_s5 = scalar_lea.hbm %s10782_s8, 1024 }
  0x7d   : > { %p8570_p2 = scmp.ne.s32.totalorder %s10782_s8, %s8569_s5  ;;  %p8576_p0 = scmp.lt.u32.totalorder %s8569_s5, %s10782_s8 }
  0x7f   : > { %p8572_p3 = pnand %p8570_p2, %p8878_p7 }
  0x81   : > { %p8573_p13 = pneg %p8572_p3 }
  0x83   : > { %p8578_p1 = pnand %p8576_p0, %p8573_p13 }
  0x85   : > { %8581 = shalt.err (!%p8578_p1)
}
  0x86   : > { %s8582_s22 = scalar_lea.vmem %s569_s19, 1024  ;;  %p8590_p9 = scmp.lt.s32.totalorder %s569_s19, %s569_s19 }
  0x87   : > { %p8583_p4 = scmp.ne.s32.totalorder %s569_s19, %s8582_s22  ;;  %p8591_p10 = scmp.lt.s32.totalorder %s8582_s22, %s8582_s22 }
  0x89   : > { %p8585_p6 = pnand %p8583_p4, %p8878_p7  ;;  %p8592_p11 = por %p8591_p10, %p8590_p9 }
  0x8b   : > { %p8586_p8 = pneg %p8585_p6 }
  0x8d   : > { %p8593_p12 = pnand %p8592_p11, %p8586_p8 }
  0x8f   : > { %8596 = shalt.err (!%p8593_p12)
}
  0x90   : > { %s10837_s26 = smov 64   ;;  %s8597_s4 = scalar_lea.hbm %s10785_s11, 512 }
  0x91   : > { %7858 = dma.hbm_to_vmem [thread:$0]  (!%p8862_p5), %s10782_s8, 1024, %s569_s19, [#allocation5], %s10837_s26, %s10837_s26, %s8714_s24  }
  0x92   : > { %p8598_p2 = scmp.ne.s32.totalorder %s10785_s11, %s8597_s4  ;;  %p8604_p0 = scmp.lt.u32.totalorder %s8597_s4, %s10785_s11 }
  0x94   : > { %p8600_p3 = pnand %p8598_p2, %p8878_p7 }
  0x96   : > { %p8601_p13 = pneg %p8600_p3 }
  0x98   : > { %p8606_p1 = pnand %p8604_p0, %p8601_p13 }
  0x9a   : > { %8609 = shalt.err (!%p8606_p1)
}
  0x9b   : > { %s8610_s22 = scalar_lea.vmem %s596_s25, 512  ;;  %p8618_p9 = scmp.lt.s32.totalorder %s596_s25, %s596_s25 }
  0x9c   : > { %p8611_p4 = scmp.ne.s32.totalorder %s596_s25, %s8610_s22  ;;  %p8619_p10 = scmp.lt.s32.totalorder %s8610_s22, %s8610_s22 }
  0x9e   : > { %p8613_p6 = pnand %p8611_p4, %p8878_p7  ;;  %p8620_p11 = por %p8619_p10, %p8618_p9 }
  0xa0   : > { %p8614_p8 = pneg %p8613_p6 }
  0xa2   : > { %p8621_p12 = pnand %p8620_p11, %p8614_p8 }
  0xa4   : > { %8624 = shalt.err (!%p8621_p12)
}
  0xa5   : > { %7864 = dma.hbm_to_vmem [thread:$0]  (!%p8862_p5), %s10785_s11, 512, %s596_s25, [#allocation8], %s10837_s26, %s10837_s26, %s8714_s24  }
  0xa6   : > { %s8717_s18 = smov [#allocation12]   ;;  %s8718_s28 = smov [#allocation13]  }
  0xa7   : > { %s628_s20 = sshll.u32 %s8717_s18, 4  ;;  %s641_s4 = sshll.u32 %s8718_s28, 4  ;;  %s629_s20 = int_to_ptr.vmem [resolvable:$true] %s628_s20  ;;  %s642_s4 = int_to_ptr.vmem [resolvable:$true] %s641_s4 }
  0xa8   : > { %s8625_s29 = scalar_lea.hbm %s10789_s15, 128 }
  0xa9   : > { %p8626_p2 = scmp.ne.s32.totalorder %s10789_s15, %s8625_s29  ;;  %p8632_p0 = scmp.lt.u32.totalorder %s8625_s29, %s10789_s15 }
  0xab   : > { %p8628_p3 = pnand %p8626_p2, %p8878_p7 }
  0xad   : > { %p8629_p13 = pneg %p8628_p3 }
  0xaf   : > { %p8634_p1 = pnand %p8632_p0, %p8629_p13 }
  0xb1   : > { %8637 = shalt.err (!%p8634_p1)
}
  0xb2   : > { %s8638_s25 = scalar_lea.vmem %s629_s20, 128  ;;  %p8646_p9 = scmp.lt.s32.totalorder %s629_s20, %s629_s20 }
  0xb3   : > { %p8639_p4 = scmp.ne.s32.totalorder %s629_s20, %s8638_s25  ;;  %p8647_p10 = scmp.lt.s32.totalorder %s8638_s25, %s8638_s25 }
  0xb5   : > { %p8641_p6 = pnand %p8639_p4, %p8878_p7  ;;  %p8648_p11 = por %p8647_p10, %p8646_p9 }
  0xb7   : > { %p8642_p8 = pneg %p8641_p6 }
  0xb9   : > { %p8649_p12 = pnand %p8648_p11, %p8642_p8 }
  0xbb   : > { %8652 = shalt.err (!%p8649_p12)
}
  0xbc   : > { %7870 = dma.hbm_to_vmem [thread:$0]  (!%p8862_p5), %s10789_s15, 128, %s629_s20, [#allocation11]  }
  0xbd   : > { %s8653_s5 = scalar_lea.hbm %s10791_s17, 2048 }
  0xbe   : > { %p8654_p2 = scmp.ne.s32.totalorder %s10791_s17, %s8653_s5  ;;  %p8660_p0 = scmp.lt.u32.totalorder %s8653_s5, %s10791_s17 }
  0xc0   : > { %p8656_p3 = pnand %p8654_p2, %p8878_p7 }
  0xc2   : > { %p8657_p13 = pneg %p8656_p3 }
  0xc4   : > { %p8662_p1 = pnand %p8660_p0, %p8657_p13 }
  0xc6   : > { %8665 = shalt.err (!%p8662_p1)
}
  0xc7   : > { %s8666_s19 = scalar_lea.vmem %s642_s4, 2048  ;;  %p8674_p9 = scmp.lt.s32.totalorder %s642_s4, %s642_s4 }
  0xc8   : > { %p8667_p4 = scmp.ne.s32.totalorder %s642_s4, %s8666_s19  ;;  %p8675_p10 = scmp.lt.s32.totalorder %s8666_s19, %s8666_s19 }
  0xca   : > { %p8669_p6 = pnand %p8667_p4, %p8878_p7  ;;  %p8676_p11 = por %p8675_p10, %p8674_p9 }
  0xcc   : > { %p8670_p8 = pneg %p8669_p6 }
  0xce   : > { %p8677_p12 = pnand %p8676_p11, %p8670_p8 }
  0xd0   : > { %8680 = shalt.err (!%p8677_p12)
}
  0xd1   : > { %7873 = dma.hbm_to_vmem [thread:$0]  (!%p8862_p5), %s10791_s17, 2048, %s642_s4, [#allocation14], %s10837_s26, %s10837_s26, %s8714_s24  }
  0xd2   : > { %p10838_p2 = scmp.ne.s32.totalorder %s10832_s3, 0 }
  0xd3   : > { %p10839_p7 = scmp.eq.s32.totalorder (!%p10838_p2), %s8845_s27, 0 }
  0xd4   : > { %689 = sbr.rel (%p10838_p2) target bundleno = 12683 (0x318b), region = 104 }
  0xdb   : > { %8686 = dma.done.wait (%p10839_p7), [#allocation3], 64   ;;  %p10840_p3 = pmov %p10839_p7 }
  0xdd   : > { %8688 = vsyncadd (%p10840_p3), [#allocation3], 4294967232  ;;  %p10841_p13 = pmov %p10840_p3 }
  0xde   : > { %p10842_p0 = pmov %p10840_p3 }
  0xdf   : > { %8690 = dma.done.wait (%p10841_p13), [#allocation5], 2048  }
  0xe0   : > { %8692 = vsyncadd (%p10842_p0), [#allocation5], 4294965248  ;;  %p10843_p1 = pmov %p10842_p0 }
  0xe1   : > { %p10844_p5 = pmov %p10842_p0 }
  0xe2   : > { %8694 = dma.done.wait (%p10843_p1), [#allocation8], 576  }
  0xe3   : > { %8696 = vsyncadd (%p10844_p5), [#allocation8], 4294966720  ;;  %p10845_p4 = pmov %p10842_p0 }
  0xe4   : > { %p10846_p6 = pmov %p10842_p0 }
  0xe5   : > { %8698 = dma.done.wait (%p10845_p4), [#allocation11], 1152  }
  0xe6   : > { %8700 = vsyncadd (%p10846_p6), [#allocation11], 4294966144  ;;  %p10847_p8 = pmov %p10842_p0 }
  0xe7   : > { %p10848_p9 = pmov %p10842_p0 }
  0xe8   : > { %8702 = dma.done.wait (%p10847_p8), [#allocation14], 2048  }
  0xe9   : > { %8704 = vsyncadd (%p10848_p9), [#allocation14], 4294965248  ;;  %v8719_v0 = vmov 0   ;;  %p786_p10 = scmp.lt.s32.totalorder %s8845_s27, 1  ;;  %s10849_s0 = sld [smem:[#allocation24_spill]]  ;;  %vm909_vm0 = vcmask 523264   ;;  %v970_v39 = vlaneseq }
  0xea   : > { %913 = vmatprep.subr.bf16.mxu0 %v8719_v0  ;;  %1072 = vmatprep.mubr.bf16.mxu1 %v8719_v0  ;;  %s10850_s5 = sld [smem:[#allocation21_spill]]  ;;  %v836_v17 = vld [vmem:[#allocation2] sm:$0xf]  ;;  %vm955_vm1 = vcmask 519168   ;;  %v7961_v29 = vld [vmem:[%s10780_s6 + $0x4] ss:$8 sps:$4 sm:$0xff]  }
  0xeb   : > { %s10867_s27 = smov (!%p786_p10, %s8845_s27), 1  ;;  %v7963_v30 = vld [vmem:[%s10780_s6] ss:$8 sps:$4 sm:$0xff]   ;;  %v7964_v31 = vld [vmem:[%s10780_s6 + $0x14] ss:$8 sps:$4 sm:$0xff]   ;;  %1040 = vmatprep.subr.bf16.mxu1 %v7961_v29  ;;  %v9163_v41 = vshrl.u32 %v970_v39, 7 }
  0xec   : > { %s10807_s18 = sshll.u32 %s10867_s27, 3  ;;  %1041 = vmatpush1.bf16.msra.mxu1 %v7963_v30  ;;  %v7966_v32 = vld [vmem:[%s10780_s6 + $0x10] ss:$8 sps:$4 sm:$0xff]   ;;  %v7967_v33 = vld [vmem:[%s10780_s6 + $0x24] ss:$8 sps:$4 sm:$0xff]   ;;  %s10851_s20 = sld [smem:[#allocation26_spill]] }
  0xed   : > { %1042 = vmatprep.subr.bf16.mxu1 %v7964_v31  ;;  %v7969_v34 = vld [vmem:[%s10780_s6 + $0x20] ss:$8 sps:$4 sm:$0xff]   ;;  %v7970_v35 = vld [vmem:[%s10780_s6 + $0x34] ss:$8 sps:$4 sm:$0xff]   ;;  %v7972_v36 = vld [vmem:[%s10780_s6 + $0x30] ss:$8 sps:$4 sm:$0xff]  }
  0xee   : > { %v9166_v42 = vsub.s32 0, %v9163_v41  ;;  %v9174_v44 = vsub.s32 1, %v9163_v41  ;;  %v8720_v52 = vmov 0.0   ;;  %v9184_v53 = vsub.s32 2, %v9163_v41  ;;  %s10812_s25 = smov 64   ;;  %s10810_s24 = smov 96  }
  0xef   : > { %v7948_v1 = vld [vmem:[%s10849_s0] sm:$0xff]   ;;  %v7949_v2 = vld [vmem:[%s10849_s0 + $0x8] sm:$0xff]   ;;  %v7950_v3 = vld [vmem:[%s10849_s0 + $0x10] sm:$0xff]   ;;  %vm8721_vm2 = vmmov 0   ;;  %vm1085_vm3 = vcmask 130048   ;;  %vm1151_vm4 = vcmask 1041408  }
  0xf0   : > { %914 = vmatpush1.bf16.msra.mxu0 %v7948_v1  ;;  %s790_s23 = scalar_lea.vmem %s10850_s5, %s10807_s18  ;;  %v7951_v4 = vld [vmem:[%s10849_s0 + $0x18] sm:$0xff]   ;;  %v7952_v6 = vld [vmem:[%s10849_s0 + $0x20] sm:$0xff]   ;;  %v7953_v9 = vld [vmem:[%s10849_s0 + $0x28] sm:$0xff]   ;;  %1043 = vmatpush1.bf16.msra.mxu1 %v7966_v32  ;;  %vm1133_vm5 = vcmask 27648   ;;  %s10818_s26 = smov 48   ;;  %vm1147_vm6 = vcmask 31744  }
  0xf1   : > { %915 = vmatprep.subr.bf16.mxu0 %v8719_v0  ;;  %v806_v5 = vld [vmem:[%s790_s23] sm:$0xff]  ;;  %v7954_v10 = vld [vmem:[%s10849_s0 + $0x30] sm:$0xff]   ;;  %v7955_v11 = vld [vmem:[%s10849_s0 + $0x38] sm:$0xff]   ;;  %1044 = vmatprep.subr.bf16.mxu1 %v7967_v33  ;;  %s8725_s4 = smov 112   ;;  %s10814_s1 = smov 32   ;;  %vm1542_vm7 = vcmask 261120  }
  0xf2   : > { %v832_v7 = vcombine.high %v806_v5, %v806_v5  ;;  %v7956_v12 = vld [vmem:[%s10849_s0 + $0x40] sm:$0xff]   ;;  %v7957_v13 = vld [vmem:[%s10849_s0 + $0x48] sm:$0xff]   ;;  %v7958_v14 = vld [vmem:[%s10849_s0 + $0x50] sm:$0xff]   ;;  %v834_v16 = vpack.c.bf16 %v806_v5, %v806_v5  ;;  %s10816_s7 = smov 16   ;;  %s10808_s28 = smov 80   ;;  %vm1544_vm8 = vcmask 392192  }
  0xf3   : > { %v7959_v15 = vld [vmem:[%s10849_s0 + $0x58] sm:$0xff]   ;;  %v9171_v43 = vld [vmem:[%s10851_s20] sm:$0xff]  ;;  %v954_v61 = vld [vmem:[%s10851_s20 + $0x8] sm:$0xff]  ;;  %s10852_s2 = smov 80   ;;  %s10853_s3 = sshll.u32 %s10867_s27, 3  ;;  %vm2972_vm9 = vcmask 1043456  }
  0xf4   : > { %916 = vmatpush1.bf16.msra.mxu0 %v7949_v2  ;;  %v835_v8 = vpack.c.bf16 %v832_v7, %v832_v7  ;;  %1045 = vmatpush1.bf16.msra.mxu1 %v7969_v34  ;;  %v973_v45 = vrot.slane %v9171_v43, %v9166_v42  ;;  %v978_v48 = vrot.slane %v9171_v43, %v9174_v44  ;;  %s10854_s29 = sld [smem:[#allocation22_spill]]  ;;  %vm3382_vm10 = vcmask 1045504   ;;  %s10856_s19 = smov 96  }
  0xf5   : > { %917 = vmatprep.subr.bf16.mxu0 %v8719_v0  ;;  %1046 = vmatprep.subr.bf16.mxu1 %v7970_v35  ;;  %v992_v54 = vrot.slane %v9171_v43, %v9184_v53  ;;  %v996_v62 = vrot.slane %v954_v61, %v9184_v53  ;;  %vm3353_vm11 = vcmask 97280   ;;  %vm3357_vm12 = vcmask 93184   ;;  %s10857_s5 = sld [smem:[#allocation28_spill]]  ;;  %s10858_s18 = sld [smem:[#allocation29_spill]] }
  0xf6   : > { %6810 = vmatprep.mubr.msk.bf16.mxu0 %vm909_vm0, %v835_v8  ;;  %vm4037_vm13 = vcmask 785408  }
  0xf8   : > { %918 = vmatpush1.bf16.msra.mxu0 %v7950_v3  ;;  %1047 = vmatpush1.bf16.msra.mxu1 %v7972_v36 }
  0xf9   : > { %919 = vmatprep.subr.bf16.mxu0 %v8719_v0  ;;  %7425 = vmatprep.subr.bf16.mxu1 %v8720_v52 }
  0xfa   : > { %s794_s30 = scalar_lea.vmem %s10854_s29, %s10853_s3  ;;  %s10859_s29 = smov 48  }
  0xfb   : > { %s10861_s3 = smov 32  }
  0xfc   : > { %920 = vmatpush1.bf16.msra.mxu0 %v7951_v4 }
  0xfd   : > { %921 = vmatprep.subr.bf16.mxu0 %v8719_v0 }
 0x100   : > { %922 = vmatpush1.bf16.msra.mxu0 %v7952_v6 }
 0x101   : > { %923 = vmatprep.subr.bf16.mxu0 %v8719_v0 }
 0x104   : > { %924 = vmatpush1.bf16.msra.mxu0 %v7953_v9 }
 0x105   : > { %925 = vmatprep.subr.bf16.mxu0 %v8719_v0 }
 0x108   : > { %926 = vmatpush1.bf16.msra.mxu0 %v7954_v10 }
 0x109   : > { %927 = vmatprep.subr.bf16.mxu0 %v8719_v0 }
 0x10c   : > { %928 = vmatpush1.bf16.msra.mxu0 %v7955_v11 }
 0x10d   : > { %929 = vmatprep.subr.bf16.mxu0 %v8719_v0 }
 0x110   : > { %930 = vmatpush1.bf16.msra.mxu0 %v7956_v12 }
 0x111   : > { %931 = vmatprep.subr.bf16.mxu0 %v8719_v0 }
 0x114   : > { %932 = vmatpush1.bf16.msra.mxu0 %v7957_v13 }
 0x115   : > { %933 = vmatprep.subr.bf16.mxu0 %v8719_v0 }
 0x118   : > { %934 = vmatpush1.bf16.msra.mxu0 %v7958_v14 }
 0x119   : > { %935 = vmatprep.subr.bf16.mxu0 %v8719_v0 }
 0x11c   : > { %936 = vmatpush1.bf16.msra.mxu0 %v7959_v15 }
 0x11d   : > { %7449 = vmatprep.subr.bf16.mxu0 %v8720_v52 }
 0x11f   : > { %946 = vmatmul.mubr.bf16.vlgmr.msra.gmra.mrb[0].mxu0 %v834_v16 }
 0x120   : > { %7451 = vmatprep.mubr.msk.bf16.mxu0 %vm8721_vm2, %v8720_v52 }
 0x1f2   : > { %v947_v18 = vpop.f32.mrb[0].mxu0 }
 0x1f3   : > { %v9133_v19 = vadd.f32 %v947_v18, %v836_v17  ;;  %v949_v20 = vpop.f32.mrb[1].mxu0 }
 0x1f4   : > { %v950_v21 = vpop.f32.mrb[2].mxu0 }
 0x1f5   : > { %v951_v22 = vpop.f32.mrb[3].mxu0  ;;  %v956_v23 = vsel %vm955_vm1, %v9133_v19, 0.0 }
 0x1f6   : > { %957 = vadd.xlane.f32.xlu0 %v956_v23 }
 0x283   : > { %v958_v24 = vpop.xlane.xlu0 %957 }
 0x284   : > { %v960_v25 = vmul.f32 0.015625, %v958_v24 }
 0x286   : > { %v961_v26 = vsub.f32 %v9133_v19, %v960_v25 }
 0x288   : > { %v962_v27 = vmul.f32 %v961_v26, %v961_v26 }
 0x28a   : > { %v963_v28 = vsel %vm955_vm1, %v962_v27, 0.0 }
 0x28b   : > { %964 = vadd.xlane.f32.xlu0 %v963_v28 }
 0x318   : > { %v965_v37 = vpop.xlane.xlu0 %964 }
 0x319   : > { %v966_v38 = vmul.f32 0.015625, %v965_v37 }
 0x31b   : > { %v967_v40 = vadd.f32 1e-06, %v966_v38 }
 0x31d   : > { %8285 = vrsqrt.f32 %v967_v40 }
 0x327   : > { %v8286_v46 = vpop.eup %8285 }
 0x328   : > { %v969_v47 = vmul.f32 %v8286_v46, %v961_v26 }
 0x32a   : > { %v974_v49 = vmul.f32 %v973_v45, %v969_v47 }
 0x32c   : > { %v979_v50 = vadd.f32 %v978_v48, %v974_v49 }
 0x32e   : > { %v988_v51 = vpack.c.bf16 %v979_v50, %v979_v50 }
 0x330   : > { %6819 = vmatmul.mubr.msk.bf16.vlgmr.msra.gmra.mrb[0].mxu1 %vm909_vm0, %v988_v51 }
 0x331   : > { %7427 = vmatprep.mubr.msk.bf16.mxu1 %vm8721_vm2, %v8720_v52 }
 0x403   : > { %v1074_v55 = vpop.f32.mrb[0].mxu1 }
 0x404   : > { %v1075_v56 = vadd.f32 %v1074_v55, %v992_v54  ;;  %v1076_v57 = vpop.f32.mrb[1].mxu1 }
 0x405   : > { %v1078_v58 = vpop.f32.mrb[2].mxu1  ;;  %v1077_v1 = vadd.f32 %v1076_v57, %v996_v62 }
 0x406   : > { %v1081_v59 = vpack.c.bf16 %v1075_v56, %v1075_v56  ;;  %v1079_v60 = vpop.f32.mrb[3].mxu1 }
 0x407   : > { %v9199_v3 = vpack.c.bf16 %v1077_v1, %v1077_v1 }
 0x408   : > { %1083 = vrot.lane.b32.xlu1 %v1081_v59, %s10812_s25 }
 0x409   : > { %v1153_v4 = vsel %vm1151_vm4, %v9199_v3, 0 }
 0x47a   : > { %v1084_v63 = vpop.permute.xlu1 %1083 }
 0x47b   : > { %v1090_v2 = vsel %vm1085_vm3, %v1084_v63, 0 }
 0x47c   : > { %7426 = vmatpush3.bf16.xpose.msra.mxu1 %v1090_v2 }
 0x47d   : > { %7431 = vmatprep.subr.bf16.mxu1 %v8720_v52 }
 0x483   : > { %7428 = vmatmul.mubr.msk.bf16.vlgmr.msra.gmra.mrb[4].mxu1 %vm1085_vm3, %v1081_v59 }
 0x484   : > { %7432 = vmatpush3.bf16.msra.mxu1 %v1153_v4  ;;  %7433 = vmatprep.mubr.msk.bf16.mxu1 %vm8721_vm2, %v8720_v52 }
 0x485   : > { %7437 = vmatprep.subr.bf16.mxu1 %v8720_v52 }
 0x556   : > { %v1126_v5 = vpop.f32.mrb[4].mxu1 }
 0x557   : > { %v1132_v6 = vmul.f32 0.25, %v1126_v5  ;;  %v7429_v7 = vpop.f32.mrb[5].mxu1 }
 0x558   : > { %v1129_v8 = vpop.f32.mrb[6].mxu1 }
 0x559   : > { %v7430_v9 = vpop.f32.mrb[7].mxu1  ;;  %v1134_v10 = vsel %vm1133_vm5, %v1132_v6, -inf }
 0x55a   : > { %1135 = vmax.xlane.f32.xlu1 %v1134_v10 }
 0x56b   : > { %1307 = vrot.lane.b32.xlu1 %v1081_v59, %s10810_s24 }
 0x5e7   : > { %v1136_v11 = vpop.xlane.xlu1 %1135 }
 0x5e8   : > { %v1137_v12 = vsub.f32 %v1132_v6, %v1136_v11 }
 0x5ea   : > { %v1138_v13 = vmul.f32 1.442695, %v1137_v12 }
 0x5eb   : > { %v1308_v27 = vpop.permute.xlu1 %1307 }
 0x5ec   : > { %8287 = vpow2.f32 %v1138_v13 }
 0x5f6   : > { %v8288_v14 = vpop.eup %8287 }
 0x5f7   : > { %v1140_v15 = vsel %vm1133_vm5, %v8288_v14, 0.0 }
 0x5f8   : > { %1141 = vadd.xlane.f32.xlu0 %v1140_v15 }
 0x60e   : > { %1197 = vrot.lane.b32.xlu0 %v1081_v59, %s10818_s26 }
 0x612   : > { %1195 = vrot.lane.b32.xlu0 %v1081_v59, %s8725_s4 }
 0x616   : > { %1309 = vrot.lane.b32.xlu0 %v1081_v59, %s10814_s1 }
 0x61a   : > { %1420 = vrot.lane.b32.xlu0 %v1081_v59, %s10816_s7 }
 0x61e   : > { %1418 = vrot.lane.b32.xlu0 %v1081_v59, %s10808_s28 }
 0x685   : > { %v1142_v16 = vpop.xlane.xlu0 %1141 }
 0x686   : > { %8289 = vrcp.f32 %v1142_v16 }
 0x689   : > { %v1198_v17 = vpop.permute.xlu0 %1197 }
 0x68a   : > { %v1203_v25 = vsel %vm1085_vm3, %v1198_v17, 0 }
 0x68d   : > { %v1196_v18 = vpop.permute.xlu0 %1195 }
 0x690   : > { %v8290_v20 = vpop.eup %8289 }
 0x691   : > { %v1310_v21 = vpop.permute.xlu0 %1309  ;;  %v1144_v22 = vmul.f32 %v8290_v20, %v8288_v14 }
 0x692   : > { %v1315_v23 = vsel %vm1085_vm3, %v1310_v21, 0 }
 0x693   : > { %7450 = vmatpush3.bf16.xpose.msra.mxu0 %v1315_v23  ;;  %v1145_v24 = vpack.c.bf16 %v1144_v22, %v1144_v22 }
 0x694   : > { %7461 = vmatprep.subr.bf16.mxu0 %v8720_v52 }
 0x695   : > { %7434 = vmatmul.mubr.msk.bf16.vlgmr.msra.gmra.mrb[8].mxu1 %vm1147_vm6, %v1145_v24  ;;  %v1421_v26 = vpop.permute.xlu0 %1420 }
 0x696   : > { %7438 = vmatpush3.bf16.xpose.msra.mxu1 %v1203_v25  ;;  %7439 = vmatprep.mubr.msk.bf16.mxu1 %vm8721_vm2, %v8720_v52  ;;  %v1426_v28 = vsel %vm1085_vm3, %v1421_v26, 0 }
 0x697   : > { %7443 = vmatprep.subr.bf16.mxu1 %v8720_v52 }
 0x699   : > { %v1419_v29 = vpop.permute.xlu0 %1418 }
 0x69a   : > { %7452 = vmatmul.mubr.msk.bf16.vlgmr.msra.gmra.mrb[4].mxu0 %vm1085_vm3, %v1308_v27 }
 0x69b   : > { %7462 = vmatpush3.bf16.xpose.msra.mxu0 %v1426_v28  ;;  %7463 = vmatprep.mubr.msk.bf16.mxu0 %vm8721_vm2, %v8720_v52 }
 0x69c   : > { %7473 = vmatprep.subr.bf16.mxu0 %v8720_v52 }
 0x69d   : > { %7440 = vmatmul.mubr.msk.bf16.vlgmr.msra.gmra.mrb[12].mxu1 %vm1085_vm3, %v1196_v18 }
 0x69e   : > { %7445 = vmatprep.mubr.msk.bf16.mxu1 %vm8721_vm2, %v8720_v52 }
 0x6a2   : > { %7464 = vmatmul.mubr.msk.bf16.vlgmr.msra.gmra.mrb[8].mxu0 %vm1085_vm3, %v1419_v29  ;;  %v7973_v29 = vld [vmem:[#allocation4] sm:$0xff]  }
 0x6a3   : > { %7481 = vmatprep.mubr.msk.bf16.mxu0 %vm8721_vm2, %v8720_v52  ;;  %7474 = vmatpush3.bf16.msra.mxu0 %v7973_v29  ;;  %v7985_v29 = vld [vmem:[%s10783_s9 + $0x20] sm:$0xff]  }
 0x6a4   : > { %7475 = vmatprep.subr.bf16.mxu0 %v8720_v52 }
 0x768   : > { %v9233_v30 = vpop.f32.mrb[8].mxu1 }
 0x769   : > { %v7435_v31 = vpop.f32.mrb[9].mxu1 }
 0x76a   : > { %v1192_v32 = vpop.f32.mrb[10].mxu1  ;;  %v7974_v31 = vld [vmem:[#allocation4 + $0x8] sm:$0xff]  }
 0x76b   : > { %v7436_v33 = vpop.f32.mrb[11].mxu1  ;;  %7476 = vmatpush3.bf16.msra.mxu0 %v7974_v31  ;;  %v7975_v32 = vld [vmem:[#allocation4 + $0x10] sm:$0xff]   ;;  %v7986_v31 = vld [vmem:[%s10783_s9 + $0x28] sm:$0xff]  }
 0x76c   : > { %7477 = vmatprep.subr.bf16.mxu0 %v8720_v52 }
 0x76d   : > { %v1351_v34 = vpop.f32.mrb[4].mxu0 }
 0x76e   : > { %v1357_v35 = vmul.f32 0.25, %v1351_v34  ;;  %v7453_v36 = vpop.f32.mrb[5].mxu0 }
 0x76f   : > { %v1354_v37 = vpop.f32.mrb[6].mxu0  ;;  %7478 = vmatpush3.bf16.msra.mxu0 %v7975_v32  ;;  %v7987_v32 = vld [vmem:[%s10783_s9 + $0x30] sm:$0xff]  }
 0x770   : > { %v1239_v38 = vpop.f32.mrb[12].mxu1  ;;  %v7454_v39 = vpop.f32.mrb[7].mxu0  ;;  %v1358_v40 = vsel %vm1133_vm5, %v1357_v35, -inf  ;;  %7479 = vmatprep.subr.bf16.mxu0 %v8720_v52  ;;  %v7976_v37 = vld [vmem:[#allocation4 + $0x18] sm:$0xff]  }
 0x771   : > { %v1245_v45 = vmul.f32 0.25, %v1239_v38  ;;  %1359 = vmax.xlane.f32.xlu1 %v1358_v40  ;;  %v7441_v46 = vpop.f32.mrb[13].mxu1 }
 0x772   : > { %v1242_v47 = vpop.f32.mrb[14].mxu1 }
 0x773   : > { %v7442_v48 = vpop.f32.mrb[15].mxu1  ;;  %v1246_v49 = vsel %vm1133_vm5, %v1245_v45, -inf  ;;  %7480 = vmatpush3.bf16.msra.mxu0 %v7976_v37 }
 0x774   : > { %1247 = vmax.xlane.f32.xlu0 %v1246_v49  ;;  %7497 = vmatprep.subr.bf16.mxu0 %v8720_v52 }
 0x775   : > { %v1462_v50 = vpop.f32.mrb[8].mxu0 }
 0x776   : > { %v1468_v51 = vmul.f32 0.25, %v1462_v50  ;;  %v7465_v54 = vpop.f32.mrb[9].mxu0 }
 0x777   : > { %v1465_v55 = vpop.f32.mrb[10].mxu0 }
 0x778   : > { %v7466_v56 = vpop.f32.mrb[11].mxu0  ;;  %v1469_v57 = vsel %vm1133_vm5, %v1468_v51, -inf }
 0x779   : > { %1470 = vmax.xlane.f32.xlu0 %v1469_v57 }
 0x782   : > { %1259 = vrot.lane.b32.xlu1 %v9199_v3, %s8725_s4 }
 0x786   : > { %1481 = vrot.lane.b32.xlu1 %v9199_v3, %s10808_s28 }
 0x7fe   : > { %v1360_v58 = vpop.xlane.xlu1 %1359 }
 0x7ff   : > { %v1361_v59 = vsub.f32 %v1357_v35, %v1360_v58 }
 0x801   : > { %v1362_v60 = vmul.f32 1.442695, %v1361_v59  ;;  %v1248_v61 = vpop.xlane.xlu0 %1247  ;;  %v9277_v59 = vsub.s32 3, %v9163_v41 }
 0x802   : > { %v1249_v62 = vsub.f32 %v1245_v45, %v1248_v61  ;;  %v1260_v63 = vpop.permute.xlu1 %1259 }
 0x803   : > { %8291 = vpow2.f32 %v1362_v60  ;;  %v1265_v1 = vsel %vm1151_vm4, %v1260_v63, 0  ;;  %v1626_v60 = vrot.slane %v9171_v43, %v9277_v59 }
 0x804   : > { %v1250_v2 = vmul.f32 1.442695, %v1249_v62  ;;  %7444 = vmatpush3.bf16.msra.mxu1 %v1265_v1 }
 0x805   : > { %7455 = vmatprep.subr.bf16.mxu1 %v8720_v52 }
 0x806   : > { %8293 = vpow2.f32 %v1250_v2  ;;  %v1471_v4 = vpop.xlane.xlu0 %1470  ;;  %v1482_v23 = vpop.permute.xlu1 %1481 }
 0x807   : > { %v1472_v5 = vsub.f32 %v1468_v51, %v1471_v4  ;;  %v1487_v26 = vsel %vm1151_vm4, %v1482_v23, 0 }
 0x809   : > { %v1473_v6 = vmul.f32 1.442695, %v1472_v5 }
 0x80b   : > { %8295 = vpow2.f32 %v1473_v6 }
 0x80d   : > { %v8292_v7 = vpop.eup %8291 }
 0x80e   : > { %v1364_v8 = vsel %vm1133_vm5, %v8292_v7, 0.0 }
 0x80f   : > { %1365 = vadd.xlane.f32.xlu0 %v1364_v8 }
 0x810   : > { %v8294_v9 = vpop.eup %8293 }
 0x811   : > { %v1252_v10 = vsel %vm1133_vm5, %v8294_v9, 0.0 }
 0x813   : > { %1253 = vadd.xlane.f32.xlu0 %v1252_v10  ;;  %v7977_v10 = vld [vmem:[#allocation6] sm:$0xff]  }
 0x815   : > { %v8296_v11 = vpop.eup %8295 }
 0x816   : > { %v1475_v12 = vsel %vm1133_vm5, %v8296_v11, 0.0 }
 0x817   : > { %1476 = vadd.xlane.f32.xlu0 %v1475_v12  ;;  %v7980_v12 = vld [vmem:[#allocation6 + $0x18] sm:$0xff]  }
 0x82d   : > { %1370 = vrot.lane.b32.xlu0 %v9199_v3, %s10810_s24 }
 0x89c   : > { %v1366_v13 = vpop.xlane.xlu0 %1365 }
 0x8a0   : > { %v1254_v14 = vpop.xlane.xlu0 %1253 }
 0x8a1   : > { %8297 = vrcp.f32 %v1254_v14 }
 0x8a2   : > { %8299 = vrcp.f32 %v1366_v13  ;;  %v7981_v13 = vld [vmem:[%s10783_s9] sm:$0xff]  }
 0x8a4   : > { %v1477_v15 = vpop.xlane.xlu0 %1476 }
 0x8a5   : > { %8301 = vrcp.f32 %v1477_v15 }
 0x8a8   : > { %v1371_v18 = vpop.permute.xlu0 %1370 }
 0x8a9   : > { %v1376_v22 = vsel %vm1151_vm4, %v1371_v18, 0  ;;  %v1648_v18 = vsub.s32 5, %v9163_v41 }
 0x8ab   : > { %v8298_v16 = vpop.eup %8297 }
 0x8ac   : > { %v1256_v17 = vmul.f32 %v8298_v16, %v8294_v9  ;;  %v8300_v21 = vpop.eup %8299 }
 0x8ad   : > { %v1368_v3 = vmul.f32 %v8300_v21, %v8292_v7 }
 0x8ae   : > { %v1257_v20 = vpack.c.bf16 %v1256_v17, %v1256_v17  ;;  %v9296_v17 = vsub.s32 4, %v9163_v41 }
 0x8af   : > { %v1369_v24 = vpack.c.bf16 %v1368_v3, %v1368_v3  ;;  %v8302_v25 = vpop.eup %8301  ;;  %v1649_v3 = vrot.slane %v9171_v43, %v1648_v18 }
 0x8b0   : > { %7446 = vmatmul.mubr.msk.bf16.vlgmr.msra.gmra.mrb[16].mxu1 %vm1147_vm6, %v1257_v20  ;;  %v1479_v27 = vmul.f32 %v8302_v25, %v8296_v11  ;;  %v7979_v11 = vld [vmem:[#allocation6 + $0x10] sm:$0xff]   ;;  %v1644_v20 = vrot.slane %v9171_v43, %v9296_v17 }
 0x8b1   : > { %7456 = vmatpush3.bf16.msra.mxu1 %v1376_v22  ;;  %7457 = vmatprep.mubr.msk.bf16.mxu1 %vm8721_vm2, %v8720_v52 }
 0x8b2   : > { %7467 = vmatprep.subr.bf16.mxu1 %v8720_v52  ;;  %v1480_v28 = vpack.c.bf16 %v1479_v27, %v1479_v27  ;;  %v7983_v27 = vld [vmem:[%s10783_s9 + $0x10] sm:$0xff]  }
 0x8b8   : > { %7458 = vmatmul.mubr.msk.bf16.vlgmr.msra.gmra.mrb[20].mxu1 %vm1147_vm6, %v1369_v24 }
 0x8b9   : > { %7468 = vmatpush3.bf16.msra.mxu1 %v1487_v26  ;;  %7469 = vmatprep.mubr.msk.bf16.mxu1 %vm8721_vm2, %v8720_v52  ;;  %v7982_v26 = vld [vmem:[%s10783_s9 + $0x8] sm:$0xff]  }
 0x8ba   : > { %7485 = vmatprep.subr.bf16.mxu1 %v8720_v52 }
 0x8c0   : > { %7470 = vmatmul.mubr.msk.bf16.vlgmr.msra.gmra.mrb[24].mxu1 %vm1147_vm6, %v1480_v28  ;;  %v7984_v28 = vld [vmem:[%s10783_s9 + $0x18] sm:$0xff]  }
 0x8c1   : > { %7493 = vmatprep.mubr.msk.bf16.mxu1 %vm8721_vm2, %v8720_v52  ;;  %7486 = vmatpush3.bf16.msra.mxu1 %v7977_v10  ;;  %v7994_v10 = vld [vmem:[%s10780_s6 + $0x54] ss:$8 sps:$4 sm:$0xff]  }
 0x8c2   : > { %7487 = vmatprep.subr.bf16.mxu1 %v8720_v52 }
 0x983   : > { %v1301_v33 = vpop.f32.mrb[16].mxu1 }
 0x984   : > { %1530 = vrot.lane.b32.xlu1 %v1301_v33, %s10816_s7  ;;  %v7447_v34 = vpop.f32.mrb[17].mxu1  ;;  %v7988_v33 = vld [vmem:[%s10783_s9 + $0x38] sm:$0xff]  }
 0x985   : > { %v1304_v35 = vpop.f32.mrb[18].mxu1  ;;  %v1662_v34 = vsub.s32 6, %v9163_v41 }
 0x986   : > { %v7448_v36 = vpop.f32.mrb[19].mxu1 }
 0x987   : > { %v1663_v35 = vrot.slane %v9171_v43, %v1662_v34 }
 0x98b   : > { %v1412_v38 = vpop.f32.mrb[20].mxu1 }
 0x98c   : > { %1534 = vrot.lane.b32.xlu1 %v1412_v38, %s10814_s1  ;;  %v7459_v39 = vpop.f32.mrb[21].mxu1 }
 0x98d   : > { %v1415_v40 = vpop.f32.mrb[22].mxu1 }
 0x98e   : > { %v7460_v45 = vpop.f32.mrb[23].mxu1 }
 0x993   : > { %v1523_v46 = vpop.f32.mrb[24].mxu1 }
 0x994   : > { %1538 = vrot.lane.b32.xlu0 %v1523_v46, %s10818_s26  ;;  %v7471_v47 = vpop.f32.mrb[25].mxu1 }
 0x995   : > { %v1526_v48 = vpop.f32.mrb[26].mxu1 }
 0x996   : > { %v7472_v49 = vpop.f32.mrb[27].mxu1 }
 0x9f6   : > { %v1531_v50 = vpop.permute.xlu1 %1530 }
 0x9f7   : > { %v1541_v54 = vsel %vm1085_vm3, %v9233_v30, %v1531_v50 }
 0x9fe   : > { %v1535_v51 = vpop.permute.xlu1 %1534 }
 0x9ff   : > { %v1543_v55 = vsel %vm1542_vm7, %v1541_v54, %v1535_v51 }
 0xa06   : > { %v1539_v56 = vpop.permute.xlu0 %1538 }
 0xa07   : > { %v1545_v57 = vsel %vm1544_vm8, %v1543_v55, %v1539_v56 }
 0xa08   : > { %v1554_v58 = vpack.c.bf16 %v1545_v57, %v1545_v57  ;;  %v1848_v57 = vsub.s32 7, %v9163_v41  ;;  %v8017_v41 = vld [vmem:[#allocation9] sm:$0xff]  }
 0xa0a   : > { %7482 = vmatmul.mubr.msk.bf16.vlgmr.msra.gmra.mrb[12].mxu0 %vm909_vm0, %v1554_v58  ;;  %v1849_v58 = vrot.slane %v9171_v43, %v1848_v57  ;;  %v7991_v43 = vld [vmem:[%s10780_s6 + $0x44] ss:$8 sps:$4 sm:$0xff]  }
 0xa0b   : > { %7513 = vmatprep.mubr.msk.bf16.mxu0 %vm8721_vm2, %v8720_v52  ;;  %7498 = vmatpush3.bf16.msra.mxu0 %v7981_v13  ;;  %v8000_v13 = vld [vmem:[%s10780_s6 + $0x74] ss:$8 sps:$4 sm:$0xff]  }
 0xa0c   : > { %7499 = vmatprep.subr.bf16.mxu0 %v8720_v52 }
 0xa0f   : > { %7500 = vmatpush3.bf16.msra.mxu0 %v7982_v26 }
 0xa10   : > { %7501 = vmatprep.subr.bf16.mxu0 %v8720_v52 }
 0xa13   : > { %7502 = vmatpush3.bf16.msra.mxu0 %v7983_v27 }
 0xa14   : > { %7503 = vmatprep.subr.bf16.mxu0 %v8720_v52 }
 0xa17   : > { %7504 = vmatpush3.bf16.msra.mxu0 %v7984_v28 }
 0xa18   : > { %7505 = vmatprep.subr.bf16.mxu0 %v8720_v52 }
 0xa1b   : > { %7506 = vmatpush3.bf16.msra.mxu0 %v7985_v29 }
 0xa1c   : > { %7507 = vmatprep.subr.bf16.mxu0 %v8720_v52 }
 0xa1f   : > { %7508 = vmatpush3.bf16.msra.mxu0 %v7986_v31 }
 0xa20   : > { %7509 = vmatprep.subr.bf16.mxu0 %v8720_v52 }
 0xa23   : > { %7510 = vmatpush3.bf16.msra.mxu0 %v7987_v32 }
 0xa24   : > { %7511 = vmatprep.subr.bf16.mxu0 %v8720_v52 }
 0xa27   : > { %7512 = vmatpush3.bf16.msra.mxu0 %v7988_v33 }
 0xa28   : > { %7529 = vmatprep.subr.bf16.mxu0 %v8720_v52 }
 0xadd   : > { %v1616_v61 = vpop.f32.mrb[12].mxu0 }
 0xade   : > { %v1622_v30 = vadd.f32 %v1616_v61, %v9133_v19  ;;  %v7483_v62 = vpop.f32.mrb[13].mxu0  ;;  %v7978_v19 = vld [vmem:[#allocation6 + $0x8] sm:$0xff]  }
 0xadf   : > { %v1619_v63 = vpop.f32.mrb[14].mxu0  ;;  %7488 = vmatpush3.bf16.msra.mxu1 %v7978_v19  ;;  %v7992_v19 = vld [vmem:[%s10780_s6 + $0x50] ss:$8 sps:$4 sm:$0xff]  }
 0xae0   : > { %v9282_v1 = vadd.f32 %v1626_v60, %v1622_v30  ;;  %v7484_v2 = vpop.f32.mrb[15].mxu0  ;;  %7489 = vmatprep.subr.bf16.mxu1 %v8720_v52 }
 0xae2   : > { %v1628_v4 = vsel %vm955_vm1, %v9282_v1, 0.0 }
 0xae3   : > { %1629 = vadd.xlane.f32.xlu1 %v1628_v4  ;;  %7490 = vmatpush3.bf16.msra.mxu1 %v7979_v11  ;;  %v7997_v11 = vld [vmem:[%s10780_s6 + $0x64] ss:$8 sps:$4 sm:$0xff]  }
 0xae4   : > { %7491 = vmatprep.subr.bf16.mxu1 %v8720_v52 }
 0xae7   : > { %7492 = vmatpush3.bf16.msra.mxu1 %v7980_v12  ;;  %v7995_v12 = vld [vmem:[%s10780_s6 + $0x60] ss:$8 sps:$4 sm:$0xff]  }
 0xae8   : > { %1938 = vmatprep.subr.bf16.mxu1 %v7991_v43 }
 0xb70   : > { %v1630_v5 = vpop.xlane.xlu1 %1629 }
 0xb71   : > { %v1631_v6 = vmul.f32 0.015625, %v1630_v5 }
 0xb73   : > { %v1632_v7 = vsub.f32 %v9282_v1, %v1631_v6 }
 0xb75   : > { %v1633_v8 = vmul.f32 %v1632_v7, %v1632_v7 }
 0xb77   : > { %v1634_v9 = vsel %vm955_vm1, %v1633_v8, 0.0 }
 0xb78   : > { %1635 = vadd.xlane.f32.xlu0 %v1634_v9 }
 0xc05   : > { %v1636_v14 = vpop.xlane.xlu0 %1635 }
 0xc06   : > { %v1637_v15 = vmul.f32 0.015625, %v1636_v14  ;;  %v7998_v14 = vld [vmem:[%s10780_s6 + $0x70] ss:$8 sps:$4 sm:$0xff]  }
 0xc08   : > { %v1638_v16 = vadd.f32 1e-06, %v1637_v15 }
 0xc0a   : > { %8303 = vrsqrt.f32 %v1638_v16 }
 0xc14   : > { %v8304_v21 = vpop.eup %8303 }
 0xc15   : > { %v1640_v22 = vmul.f32 %v8304_v21, %v1632_v7  ;;  %v9379_v21 = vld [vmem:[%s10851_s20 + $0x10] sm:$0xff] }
 0xc16   : > { %v1890_v28 = vrot.slane %v9379_v21, %v9184_v53 }
 0xc17   : > { %v1645_v23 = vmul.f32 %v1644_v20, %v1640_v22  ;;  %v1870_v22 = vrot.slane %v9379_v21, %v9166_v42 }
 0xc19   : > { %v1650_v24 = vadd.f32 %v1649_v3, %v1645_v23 }
 0xc1b   : > { %v1659_v25 = vpack.c.bf16 %v1650_v24, %v1650_v24  ;;  %v1875_v24 = vrot.slane %v9379_v21, %v9174_v44 }
 0xc1d   : > { %7494 = vmatmul.mubr.msk.bf16.vlgmr.msra.gmra.mrb[28].mxu1 %vm909_vm0, %v1659_v25 }
 0xc1e   : > { %1970 = vmatprep.mubr.bf16.mxu1 %v8719_v0 }
 0xcf0   : > { %v1725_v36 = vpop.f32.mrb[28].mxu1 }
 0xcf1   : > { %v1726_v37 = vadd.f32 %v1725_v36, %v1663_v35  ;;  %v7495_v38 = vpop.f32.mrb[29].mxu1 }
 0xcf2   : > { %v1728_v39 = vpop.f32.mrb[30].mxu1 }
 0xcf3   : > { %v1732_v40 = vmul.f32 0.044715, %v1726_v37  ;;  %v7496_v45 = vpop.f32.mrb[31].mxu1  ;;  %v1731_v51 = vmul.f32 0.5, %v1726_v37 }
 0xcf5   : > { %v1733_v46 = vmul.f32 %v1732_v40, %v1726_v37 }
 0xcf7   : > { %v1734_v47 = vmul.f32 %v1733_v46, %v1726_v37 }
 0xcf9   : > { %v1735_v48 = vadd.f32 %v1734_v47, %v1726_v37  ;;  %v6847_v37 = vld [vmem:[%s10851_s20 + $0x18] sm:$0xff] }
 0xcfa   : > { %v1894_v38 = vrot.slane %v6847_v37, %v9184_v53 }
 0xcfb   : > { %v1736_v49 = vmul.f32 0.7978846, %v1735_v48 }
 0xcfd   : > { %8305 = vtanh.f32 %v1736_v49 }
 0xd07   : > { %v8306_v50 = vpop.eup %8305 }
 0xd08   : > { %v1738_v54 = vadd.f32 1.0, %v8306_v50 }
 0xd0a   : > { %v1739_v55 = vmul.f32 %v1738_v54, %v1731_v51 }
 0xd0c   : > { %v1756_v56 = vpack.c.bf16 %v1739_v55, %v1739_v55 }
 0xd0e   : > { %7514 = vmatmul.mubr.bf16.vlgmr.msra.gmra.mrb[16].mxu0 %v1756_v56 }
 0xd0f   : > { %7531 = vmatprep.mubr.msk.bf16.mxu0 %vm8721_vm2, %v8720_v52 }
 0xde1   : > { %v1839_v60 = vpop.f32.mrb[16].mxu0 }
 0xde2   : > { %v1845_v61 = vadd.f32 %v1839_v60, %v9282_v1  ;;  %v7515_v30 = vpop.f32.mrb[17].mxu0  ;;  %v7989_v1 = vld [vmem:[%s10780_s6 + $0x40] ss:$8 sps:$4 sm:$0xff]  }
 0xde3   : > { %v1842_v62 = vpop.f32.mrb[18].mxu0  ;;  %1939 = vmatpush1.bf16.msra.mxu1 %v7989_v1 }
 0xde4   : > { %v9345_v63 = vadd.f32 %v1849_v58, %v1845_v61  ;;  %v7516_v2 = vpop.f32.mrb[19].mxu0  ;;  %1940 = vmatprep.subr.bf16.mxu1 %v7994_v10 }
 0xde6   : > { %v1854_v4 = vsel %vm955_vm1, %v9345_v63, 0.0 }
 0xde7   : > { %1855 = vadd.xlane.f32.xlu0 %v1854_v4  ;;  %1941 = vmatpush1.bf16.msra.mxu1 %v7992_v19 }
 0xde8   : > { %1942 = vmatprep.subr.bf16.mxu1 %v7997_v11 }
 0xdeb   : > { %1943 = vmatpush1.bf16.msra.mxu1 %v7995_v12 }
 0xdec   : > { %1944 = vmatprep.subr.bf16.mxu1 %v8000_v13 }
 0xdef   : > { %1945 = vmatpush1.bf16.msra.mxu1 %v7998_v14 }
 0xdf0   : > { %7517 = vmatprep.subr.bf16.mxu1 %v8720_v52 }
 0xe74   : > { %v1856_v5 = vpop.xlane.xlu0 %1855 }
 0xe75   : > { %v1857_v6 = vmul.f32 0.015625, %v1856_v5 }
 0xe77   : > { %v1858_v7 = vsub.f32 %v9345_v63, %v1857_v6 }
 0xe79   : > { %v1859_v8 = vmul.f32 %v1858_v7, %v1858_v7 }
 0xe7b   : > { %v1860_v9 = vsel %vm955_vm1, %v1859_v8, 0.0 }
 0xe7c   : > { %1861 = vadd.xlane.f32.xlu0 %v1860_v9 }
 0xf09   : > { %v1862_v15 = vpop.xlane.xlu0 %1861 }
 0xf0a   : > { %v1863_v16 = vmul.f32 0.015625, %v1862_v15 }
 0xf0c   : > { %v1864_v20 = vadd.f32 1e-06, %v1863_v16 }
 0xf0e   : > { %8307 = vrsqrt.f32 %v1864_v20 }
 0xf18   : > { %v8308_v3 = vpop.eup %8307 }
 0xf19   : > { %v1866_v23 = vmul.f32 %v8308_v3, %v1858_v7 }
 0xf1b   : > { %v1871_v25 = vmul.f32 %v1870_v22, %v1866_v23 }
 0xf1d   : > { %v1876_v26 = vadd.f32 %v1875_v24, %v1871_v25 }
 0xf1f   : > { %v1886_v27 = vpack.c.bf16 %v1876_v26, %v1876_v26 }
 0xf21   : > { %6864 = vmatmul.mubr.msk.bf16.vlgmr.msra.gmra.mrb[32].mxu1 %vm909_vm0, %v1886_v27 }
 0xf22   : > { %7519 = vmatprep.mubr.msk.bf16.mxu1 %vm8721_vm2, %v8720_v52 }
 0xff4   : > { %v1972_v29 = vpop.f32.mrb[32].mxu1 }
 0xff5   : > { %v1973_v31 = vadd.f32 %v1972_v29, %v1890_v28  ;;  %v1974_v32 = vpop.f32.mrb[33].mxu1 }
 0xff6   : > { %v1976_v33 = vpop.f32.mrb[34].mxu1  ;;  %v1975_v45 = vadd.f32 %v1974_v32, %v1894_v38 }
 0xff7   : > { %v1979_v35 = vpack.c.bf16 %v1973_v31, %v1973_v31  ;;  %v1977_v36 = vpop.f32.mrb[35].mxu1 }
 0xff8   : > { %v9405_v49 = vpack.c.bf16 %v1975_v45, %v1975_v45 }
 0xff9   : > { %2091 = vrot.lane.b32.xlu0 %v1979_v35, %s10818_s26  ;;  %1981 = vrot.lane.b32.xlu1 %v1979_v35, %s10812_s25 }
 0xffa   : > { %v2047_v54 = vsel %vm1151_vm4, %v9405_v49, 0 }
 0xffd   : > { %2314 = vrot.lane.b32.xlu0 %v1979_v35, %s10816_s7  ;;  %2089 = vrot.lane.b32.xlu1 %v1979_v35, %s8725_s4 }
0x1001   : > { %2203 = vrot.lane.b32.xlu1 %v1979_v35, %s10814_s1 }
0x1005   : > { %2201 = vrot.lane.b32.xlu1 %v1979_v35, %s10810_s24 }
0x1009   : > { %2312 = vrot.lane.b32.xlu1 %v1979_v35, %s10852_s2 }
0x106b   : > { %v2092_v39 = vpop.permute.xlu0 %2091  ;;  %v1982_v40 = vpop.permute.xlu1 %1981 }
0x106c   : > { %v2097_v46 = vsel %vm1085_vm3, %v2092_v39, 0  ;;  %v1987_v47 = vsel %vm1085_vm3, %v1982_v40, 0 }
0x106d   : > { %7518 = vmatpush3.bf16.xpose.msra.mxu1 %v1987_v47  ;;  %7530 = vmatpush3.bf16.xpose.msra.mxu0 %v2097_v46 }
0x106e   : > { %7523 = vmatprep.subr.bf16.mxu1 %v8720_v52  ;;  %7541 = vmatprep.subr.bf16.mxu0 %v8720_v52 }
0x106f   : > { %v2090_v48 = vpop.permute.xlu1 %2089  ;;  %v2315_v55 = vpop.permute.xlu0 %2314 }
0x1070   : > { %v2320_v58 = vsel %vm1085_vm3, %v2315_v55, 0 }
0x1073   : > { %v2204_v50 = vpop.permute.xlu1 %2203 }
0x1074   : > { %v2209_v51 = vsel %vm1085_vm3, %v2204_v50, 0  ;;  %7520 = vmatmul.mubr.msk.bf16.vlgmr.msra.gmra.mrb[36].mxu1 %vm1085_vm3, %v1979_v35  ;;  %7532 = vmatmul.mubr.msk.bf16.vlgmr.msra.gmra.mrb[20].mxu0 %vm1085_vm3, %v2090_v48 }
0x1075   : > { %7524 = vmatpush3.bf16.msra.mxu1 %v2047_v54  ;;  %7542 = vmatpush3.bf16.xpose.msra.mxu0 %v2209_v51 }
0x1076   : > { %7543 = vmatprep.mubr.msk.bf16.mxu0 %vm8721_vm2, %v8720_v52  ;;  %7553 = vmatprep.subr.bf16.mxu0 %v8720_v52 }
0x1077   : > { %7525 = vmatprep.mubr.msk.bf16.mxu1 %vm8721_vm2, %v8720_v52  ;;  %7535 = vmatprep.subr.bf16.mxu1 %v8720_v52  ;;  %v2202_v56 = vpop.permute.xlu1 %2201 }
0x107b   : > { %v2313_v60 = vpop.permute.xlu1 %2312 }
0x107c   : > { %7544 = vmatmul.mubr.msk.bf16.vlgmr.msra.gmra.mrb[24].mxu0 %vm1085_vm3, %v2202_v56 }
0x107d   : > { %7554 = vmatpush3.bf16.xpose.msra.mxu0 %v2320_v58  ;;  %7555 = vmatprep.mubr.msk.bf16.mxu0 %vm8721_vm2, %v8720_v52 }
0x107e   : > { %7565 = vmatprep.subr.bf16.mxu0 %v8720_v52 }
0x1084   : > { %7556 = vmatmul.mubr.msk.bf16.vlgmr.msra.gmra.mrb[28].mxu0 %vm1085_vm3, %v2313_v60 }
0x1085   : > { %7573 = vmatprep.mubr.msk.bf16.mxu0 %vm8721_vm2, %v8720_v52 }
0x1147   : > { %v2023_v61 = vpop.f32.mrb[36].mxu1  ;;  %v2133_v30 = vpop.f32.mrb[20].mxu0 }
0x1148   : > { %v2029_v62 = vmul.f32 0.25, %v2023_v61  ;;  %v2139_v2 = vmul.f32 0.25, %v2133_v30  ;;  %v7521_v4 = vpop.f32.mrb[37].mxu1  ;;  %v7533_v5 = vpop.f32.mrb[21].mxu0 }
0x1149   : > { %v2026_v6 = vpop.f32.mrb[38].mxu1  ;;  %v2136_v7 = vpop.f32.mrb[22].mxu0 }
0x114a   : > { %v7522_v8 = vpop.f32.mrb[39].mxu1  ;;  %v7534_v9 = vpop.f32.mrb[23].mxu0  ;;  %v2030_v43 = vsel %vm1133_vm5, %v2029_v62, -inf  ;;  %v2140_v1 = vsel %vm1133_vm5, %v2139_v2, -inf }
0x114b   : > { %2031 = vmax.xlane.f32.xlu0 %v2030_v43  ;;  %2141 = vmax.xlane.f32.xlu1 %v2140_v1 }
0x114f   : > { %v2245_v10 = vpop.f32.mrb[24].mxu0 }
0x1150   : > { %v2251_v19 = vmul.f32 0.25, %v2245_v10  ;;  %v7545_v11 = vpop.f32.mrb[25].mxu0 }
0x1151   : > { %v2248_v12 = vpop.f32.mrb[26].mxu0 }
0x1152   : > { %v7546_v13 = vpop.f32.mrb[27].mxu0  ;;  %v2252_v14 = vsel %vm1133_vm5, %v2251_v19, -inf }
0x1153   : > { %2253 = vmax.xlane.f32.xlu0 %v2252_v14 }
0x1157   : > { %v2356_v15 = vpop.f32.mrb[28].mxu0 }
0x1158   : > { %v2362_v16 = vmul.f32 0.25, %v2356_v15  ;;  %v7557_v20 = vpop.f32.mrb[29].mxu0 }
0x1159   : > { %v2359_v22 = vpop.f32.mrb[30].mxu0  ;;  %v8002_v20 = vld [vmem:[#allocation4 + $0x28] sm:$0xff]  }
0x115a   : > { %v7558_v3 = vpop.f32.mrb[31].mxu0  ;;  %v2363_v23 = vsel %vm1133_vm5, %v2362_v16, -inf }
0x115b   : > { %2364 = vmax.xlane.f32.xlu0 %v2363_v23 }
0x11d8   : > { %v2032_v24 = vpop.xlane.xlu0 %2031  ;;  %v2142_v25 = vpop.xlane.xlu1 %2141 }
0x11d9   : > { %v2033_v26 = vsub.f32 %v2029_v62, %v2032_v24  ;;  %v2143_v27 = vsub.f32 %v2139_v2, %v2142_v25  ;;  %v8003_v24 = vld [vmem:[#allocation4 + $0x30] sm:$0xff]  }
0x11db   : > { %v2034_v28 = vmul.f32 1.442695, %v2033_v26  ;;  %v2144_v29 = vmul.f32 1.442695, %v2143_v27 }
0x11dd   : > { %8309 = vpow2.f32 %v2034_v28 }
0x11de   : > { %8311 = vpow2.f32 %v2144_v29 }
0x11e0   : > { %v2254_v31 = vpop.xlane.xlu0 %2253 }
0x11e1   : > { %v2255_v32 = vsub.f32 %v2251_v19, %v2254_v31  ;;  %v8004_v31 = vld [vmem:[#allocation4 + $0x38] sm:$0xff]  }
0x11e3   : > { %v2256_v33 = vmul.f32 1.442695, %v2255_v32 }
0x11e5   : > { %8313 = vpow2.f32 %v2256_v33 }
0x11e7   : > { %v8310_v35 = vpop.eup %8309 }
0x11e8   : > { %v8312_v36 = vpop.eup %8311  ;;  %v2036_v37 = vsel %vm1133_vm5, %v8310_v35, 0.0  ;;  %v2365_v45 = vpop.xlane.xlu0 %2364 }
0x11e9   : > { %2037 = vadd.xlane.f32.xlu0 %v2036_v37  ;;  %v2146_v38 = vsel %vm1133_vm5, %v8312_v36, 0.0  ;;  %v2366_v46 = vsub.f32 %v2362_v16, %v2365_v45  ;;  %v8001_v16 = vld [vmem:[#allocation4 + $0x20] sm:$0xff]  }
0x11ea   : > { %2147 = vadd.xlane.f32.xlu1 %v2146_v38  ;;  %7566 = vmatpush3.bf16.msra.mxu0 %v8001_v16  ;;  %v8011_v16 = vld [vmem:[%s10783_s9 + $0x50] sm:$0xff]  }
0x11eb   : > { %v2367_v47 = vmul.f32 1.442695, %v2366_v46  ;;  %7567 = vmatprep.subr.bf16.mxu0 %v8720_v52 }
0x11ed   : > { %8315 = vpow2.f32 %v2367_v47 }
0x11ee   : > { %7568 = vmatpush3.bf16.msra.mxu0 %v8002_v20  ;;  %v8013_v20 = vld [vmem:[%s10783_s9 + $0x60] sm:$0xff]  }
0x11ef   : > { %v8314_v39 = vpop.eup %8313  ;;  %7569 = vmatprep.subr.bf16.mxu0 %v8720_v52 }
0x11f0   : > { %v2258_v40 = vsel %vm1133_vm5, %v8314_v39, 0.0 }
0x11f1   : > { %2259 = vadd.xlane.f32.xlu0 %v2258_v40 }
0x11f2   : > { %7570 = vmatpush3.bf16.msra.mxu0 %v8003_v24  ;;  %v2557_v24 = vrot.slane %v9379_v21, %v1662_v34  ;;  %v2744_v34 = vrot.slane %v9379_v21, %v1848_v57  ;;  %v8018_v57 = vld [vmem:[#allocation9 + $0x8] sm:$0xff]  }
0x11f3   : > { %7571 = vmatprep.subr.bf16.mxu0 %v8720_v52 }
0x11f6   : > { %7572 = vmatpush3.bf16.msra.mxu0 %v8004_v31 }
0x11f7   : > { %v8316_v48 = vpop.eup %8315  ;;  %7589 = vmatprep.subr.bf16.mxu0 %v8720_v52 }
0x11f8   : > { %v2369_v50 = vsel %vm1133_vm5, %v8316_v48, 0.0 }
0x11fb   : > { %2264 = vrot.lane.b32.xlu1 %v9405_v49, %s10810_s24  ;;  %s7227_s24 = sshll.u32 %s10867_s27, 4 }
0x1207   : > { %2153 = vrot.lane.b32.xlu0 %v9405_v49, %s8725_s4 }
0x121f   : > { %2370 = vadd.xlane.f32.xlu1 %v2369_v50 }
0x1230   : > { %2375 = vrot.lane.b32.xlu1 %v9405_v49, %s10852_s2 }
0x1276   : > { %v2038_v51 = vpop.xlane.xlu0 %2037 }
0x1277   : > { %8317 = vrcp.f32 %v2038_v51  ;;  %v2148_v54 = vpop.xlane.xlu1 %2147 }
0x1278   : > { %8319 = vrcp.f32 %v2148_v54 }
0x127b   : > { %v2265_v2 = vpop.permute.xlu1 %2264 }
0x127c   : > { %v2270_v6 = vsel %vm1151_vm4, %v2265_v2, 0 }
0x127e   : > { %v2260_v55 = vpop.xlane.xlu0 %2259 }
0x127f   : > { %8321 = vrcp.f32 %v2260_v55 }
0x1281   : > { %v8318_v56 = vpop.eup %8317 }
0x1282   : > { %v2040_v58 = vmul.f32 %v8318_v56, %v8310_v35  ;;  %v2154_v60 = vpop.permute.xlu0 %2153  ;;  %v8320_v30 = vpop.eup %8319 }
0x1283   : > { %v2159_v62 = vsel %vm1151_vm4, %v2154_v60, 0  ;;  %v2150_v49 = vmul.f32 %v8320_v30, %v8312_v36 }
0x1284   : > { %v2041_v61 = vpack.c.bf16 %v2040_v58, %v2040_v58 }
0x1285   : > { %v2151_v4 = vpack.c.bf16 %v2150_v49, %v2150_v49 }
0x1286   : > { %7526 = vmatmul.mubr.msk.bf16.vlgmr.msra.gmra.mrb[40].mxu1 %vm1147_vm6, %v2041_v61 }
0x1287   : > { %7536 = vmatpush3.bf16.msra.mxu1 %v2159_v62  ;;  %7537 = vmatprep.mubr.msk.bf16.mxu1 %vm8721_vm2, %v8720_v52 }
0x1288   : > { %7547 = vmatprep.subr.bf16.mxu1 %v8720_v52 }
0x1289   : > { %v8322_v5 = vpop.eup %8321 }
0x128a   : > { %v2262_v7 = vmul.f32 %v8322_v5, %v8314_v39  ;;  %v8007_v5 = vld [vmem:[#allocation6 + $0x30] sm:$0xff]  }
0x128c   : > { %v2263_v8 = vpack.c.bf16 %v2262_v7, %v2262_v7  ;;  %v8009_v7 = vld [vmem:[%s10783_s9 + $0x40] sm:$0xff]  }
0x128e   : > { %7538 = vmatmul.mubr.msk.bf16.vlgmr.msra.gmra.mrb[44].mxu1 %vm1147_vm6, %v2151_v4  ;;  %v8005_v4 = vld [vmem:[#allocation6 + $0x20] sm:$0xff]  }
0x128f   : > { %7548 = vmatpush3.bf16.msra.mxu1 %v2270_v6  ;;  %7549 = vmatprep.mubr.msk.bf16.mxu1 %vm8721_vm2, %v8720_v52  ;;  %v8008_v6 = vld [vmem:[#allocation6 + $0x38] sm:$0xff]  }
0x1290   : > { %7559 = vmatprep.subr.bf16.mxu1 %v8720_v52 }
0x1296   : > { %7550 = vmatmul.mubr.msk.bf16.vlgmr.msra.gmra.mrb[48].mxu1 %vm1147_vm6, %v2263_v8 }
0x1297   : > { %7561 = vmatprep.mubr.msk.bf16.mxu1 %vm8721_vm2, %v8720_v52 }
0x12ac   : > { %v2371_v9 = vpop.xlane.xlu1 %2370 }
0x12ad   : > { %8323 = vrcp.f32 %v2371_v9 }
0x12b0   : > { %v2376_v43 = vpop.permute.xlu1 %2375 }
0x12b1   : > { %v2381_v1 = vsel %vm1151_vm4, %v2376_v43, 0 }
0x12b2   : > { %7560 = vmatpush3.bf16.msra.mxu1 %v2381_v1  ;;  %v2537_v1 = vrot.slane %v9379_v21, %v9296_v17 }
0x12b3   : > { %7577 = vmatprep.subr.bf16.mxu1 %v8720_v52 }
0x12b7   : > { %v8324_v10 = vpop.eup %8323 }
0x12b8   : > { %v2373_v19 = vmul.f32 %v8324_v10, %v8316_v48  ;;  %v2519_v48 = vrot.slane %v9379_v21, %v9277_v59 }
0x12ba   : > { %v2374_v11 = vpack.c.bf16 %v2373_v19, %v2373_v19 }
0x12bc   : > { %7562 = vmatmul.mubr.msk.bf16.vlgmr.msra.gmra.mrb[52].mxu1 %vm1147_vm6, %v2374_v11  ;;  %v2542_v11 = vrot.slane %v9379_v21, %v1648_v18  ;;  %v8012_v18 = vld [vmem:[%s10783_s9 + $0x58] sm:$0xff]  }
0x12bd   : > { %7585 = vmatprep.mubr.msk.bf16.mxu1 %vm8721_vm2, %v8720_v52  ;;  %7578 = vmatpush3.bf16.msra.mxu1 %v8005_v4  ;;  %v8019_v21 = vld [vmem:[#allocation9 + $0x10] sm:$0xff]  }
0x12be   : > { %7579 = vmatprep.subr.bf16.mxu1 %v8720_v52 }
0x1359   : > { %v2083_v12 = vpop.f32.mrb[40].mxu1 }
0x135a   : > { %v7527_v13 = vpop.f32.mrb[41].mxu1 }
0x135b   : > { %v2086_v14 = vpop.f32.mrb[42].mxu1 }
0x135c   : > { %v7528_v15 = vpop.f32.mrb[43].mxu1 }
0x135d   : > { %v8010_v15 = vld [vmem:[%s10783_s9 + $0x48] sm:$0xff]  }
0x1361   : > { %v2195_v22 = vpop.f32.mrb[44].mxu1 }
0x1362   : > { %2424 = vrot.lane.b32.xlu1 %v2195_v22, %s10816_s7  ;;  %v7539_v3 = vpop.f32.mrb[45].mxu1  ;;  %v8014_v22 = vld [vmem:[%s10783_s9 + $0x68] sm:$0xff]  }
0x1363   : > { %v2198_v23 = vpop.f32.mrb[46].mxu1  ;;  %v8015_v3 = vld [vmem:[%s10783_s9 + $0x70] sm:$0xff]  }
0x1364   : > { %v7540_v25 = vpop.f32.mrb[47].mxu1  ;;  %v8016_v23 = vld [vmem:[%s10783_s9 + $0x78] sm:$0xff]  }
0x1369   : > { %v2306_v26 = vpop.f32.mrb[48].mxu1 }
0x136a   : > { %2428 = vrot.lane.b32.xlu0 %v2306_v26, %s10814_s1  ;;  %v7551_v27 = vpop.f32.mrb[49].mxu1 }
0x136b   : > { %v2309_v28 = vpop.f32.mrb[50].mxu1 }
0x136c   : > { %v7552_v29 = vpop.f32.mrb[51].mxu1 }
0x138f   : > { %v2417_v32 = vpop.f32.mrb[52].mxu1 }
0x1390   : > { %2432 = vrot.lane.b32.xlu1 %v2417_v32, %s10818_s26  ;;  %v7563_v33 = vpop.f32.mrb[53].mxu1 }
0x1391   : > { %v2420_v35 = vpop.f32.mrb[54].mxu1 }
0x1392   : > { %v7564_v36 = vpop.f32.mrb[55].mxu1 }
0x13d4   : > { %v2425_v37 = vpop.permute.xlu1 %2424 }
0x13d5   : > { %v2435_v39 = vsel %vm1085_vm3, %v2083_v12, %v2425_v37 }
0x13dc   : > { %v2429_v38 = vpop.permute.xlu0 %2428 }
0x13dd   : > { %v2436_v40 = vsel %vm1542_vm7, %v2435_v39, %v2429_v38 }
0x1402   : > { %v2433_v45 = vpop.permute.xlu1 %2432 }
0x1403   : > { %v2437_v46 = vsel %vm1544_vm8, %v2436_v40, %v2433_v45 }
0x1404   : > { %v2447_v47 = vpack.c.bf16 %v2437_v46, %v2437_v46 }
0x1406   : > { %7574 = vmatmul.mubr.msk.bf16.vlgmr.msra.gmra.mrb[32].mxu0 %vm909_vm0, %v2447_v47 }
0x1407   : > { %7605 = vmatprep.mubr.msk.bf16.mxu0 %vm8721_vm2, %v8720_v52  ;;  %7590 = vmatpush3.bf16.msra.mxu0 %v8009_v7 }
0x1408   : > { %7591 = vmatprep.subr.bf16.mxu0 %v8720_v52 }
0x140b   : > { %7592 = vmatpush3.bf16.msra.mxu0 %v8010_v15  ;;  %v8027_v15 = vld [vmem:[#allocation10 + $0x30] sm:$0xff]  }
0x140c   : > { %7593 = vmatprep.subr.bf16.mxu0 %v8720_v52 }
0x140f   : > { %7594 = vmatpush3.bf16.msra.mxu0 %v8011_v16  ;;  %v8028_v16 = vld [vmem:[#allocation10 + $0x38] sm:$0xff]  }
0x1410   : > { %7595 = vmatprep.subr.bf16.mxu0 %v8720_v52 }
0x1413   : > { %7596 = vmatpush3.bf16.msra.mxu0 %v8012_v18 }
0x1414   : > { %7597 = vmatprep.subr.bf16.mxu0 %v8720_v52 }
0x1417   : > { %7598 = vmatpush3.bf16.msra.mxu0 %v8013_v20 }
0x1418   : > { %7599 = vmatprep.subr.bf16.mxu0 %v8720_v52 }
0x141b   : > { %7600 = vmatpush3.bf16.msra.mxu0 %v8014_v22 }
0x141c   : > { %7601 = vmatprep.subr.bf16.mxu0 %v8720_v52 }
0x141f   : > { %7602 = vmatpush3.bf16.msra.mxu0 %v8015_v3 }
0x1420   : > { %7603 = vmatprep.subr.bf16.mxu0 %v8720_v52 }
0x1423   : > { %7604 = vmatpush3.bf16.msra.mxu0 %v8016_v23 }
0x14d9   : > { %v2509_v50 = vpop.f32.mrb[32].mxu0 }
0x14da   : > { %v2515_v51 = vadd.f32 %v2509_v50, %v9345_v63  ;;  %v7575_v54 = vpop.f32.mrb[33].mxu0  ;;  %v8006_v63 = vld [vmem:[#allocation6 + $0x28] sm:$0xff]  }
0x14db   : > { %v2512_v55 = vpop.f32.mrb[34].mxu0  ;;  %7580 = vmatpush3.bf16.msra.mxu1 %v8006_v63  ;;  %v9537_v63 = vld [vmem:[#allocation7] sm:$0xf] }
0x14dc   : > { %v9474_v56 = vadd.f32 %v2519_v48, %v2515_v51  ;;  %v7576_v58 = vpop.f32.mrb[35].mxu0  ;;  %7581 = vmatprep.subr.bf16.mxu1 %v8720_v52  ;;  %v2782_v18 = vrot.slane %v9537_v63, %v9184_v53 }
0x14de   : > { %v2521_v60 = vsel %vm955_vm1, %v9474_v56, 0.0 }
0x14df   : > { %2522 = vadd.xlane.f32.xlu0 %v2521_v60  ;;  %7582 = vmatpush3.bf16.msra.mxu1 %v8007_v5  ;;  %v2763_v5 = vrot.slane %v9537_v63, %v9166_v42 }
0x14e0   : > { %7583 = vmatprep.subr.bf16.mxu1 %v8720_v52 }
0x14e3   : > { %7584 = vmatpush3.bf16.msra.mxu1 %v8008_v6 }
0x14e4   : > { %7609 = vmatprep.subr.bf16.mxu1 %v8720_v52 }
0x156c   : > { %v2523_v61 = vpop.xlane.xlu0 %2522 }
0x156d   : > { %v2524_v30 = vmul.f32 0.015625, %v2523_v61 }
0x156f   : > { %v2525_v62 = vsub.f32 %v9474_v56, %v2524_v30 }
0x1571   : > { %v2526_v49 = vmul.f32 %v2525_v62, %v2525_v62 }
0x1573   : > { %v2527_v2 = vsel %vm955_vm1, %v2526_v49, 0.0 }
0x1574   : > { %2528 = vadd.xlane.f32.xlu1 %v2527_v2 }
0x1601   : > { %v2529_v8 = vpop.xlane.xlu1 %2528 }
0x1602   : > { %v2530_v9 = vmul.f32 0.015625, %v2529_v8  ;;  %v2768_v8 = vrot.slane %v9537_v63, %v9174_v44 }
0x1604   : > { %v2531_v43 = vadd.f32 1e-06, %v2530_v9 }
0x1606   : > { %8325 = vrsqrt.f32 %v2531_v43 }
0x1610   : > { %v8326_v10 = vpop.eup %8325 }
0x1611   : > { %v2533_v19 = vmul.f32 %v8326_v10, %v2525_v62 }
0x1613   : > { %v2538_v12 = vmul.f32 %v2537_v1, %v2533_v19  ;;  %v8021_v1 = vld [vmem:[#allocation10] sm:$0xff]   ;;  %v8022_v19 = vld [vmem:[#allocation10 + $0x8] sm:$0xff]  }
0x1615   : > { %v2543_v13 = vadd.f32 %v2542_v11, %v2538_v12  ;;  %v8023_v11 = vld [vmem:[#allocation10 + $0x10] sm:$0xff]   ;;  %v8024_v12 = vld [vmem:[#allocation10 + $0x18] sm:$0xff]  }
0x1617   : > { %v2553_v14 = vpack.c.bf16 %v2543_v13, %v2543_v13  ;;  %v8025_v13 = vld [vmem:[#allocation10 + $0x20] sm:$0xff]  }
0x1619   : > { %7586 = vmatmul.mubr.msk.bf16.vlgmr.msra.gmra.mrb[56].mxu1 %vm909_vm0, %v2553_v14  ;;  %v8026_v14 = vld [vmem:[#allocation10 + $0x28] sm:$0xff]  }
0x161a   : > { %7617 = vmatprep.mubr.msk.bf16.mxu1 %vm8721_vm2, %v8720_v52  ;;  %7610 = vmatpush3.bf16.msra.mxu1 %v8017_v41 }
0x161b   : > { %7611 = vmatprep.subr.bf16.mxu1 %v8720_v52 }
0x161e   : > { %7612 = vmatpush3.bf16.msra.mxu1 %v8018_v57 }
0x161f   : > { %7613 = vmatprep.subr.bf16.mxu1 %v8720_v52 }
0x1622   : > { %7614 = vmatpush3.bf16.msra.mxu1 %v8019_v21 }
0x1623   : > { %7615 = vmatprep.subr.bf16.mxu1 %v8720_v52 }
0x16ec   : > { %v2619_v25 = vpop.f32.mrb[56].mxu1 }
0x16ed   : > { %v2620_v26 = vadd.f32 %v2619_v25, %v2557_v24  ;;  %v7587_v27 = vpop.f32.mrb[57].mxu1 }
0x16ee   : > { %v2622_v28 = vpop.f32.mrb[58].mxu1 }
0x16ef   : > { %v2626_v29 = vmul.f32 0.044715, %v2620_v26  ;;  %v7588_v31 = vpop.f32.mrb[59].mxu1  ;;  %v2625_v38 = vmul.f32 0.5, %v2620_v26 }
0x16f1   : > { %v2627_v32 = vmul.f32 %v2626_v29, %v2620_v26 }
0x16f3   : > { %v2628_v33 = vmul.f32 %v2627_v32, %v2620_v26 }
0x16f5   : > { %v2629_v35 = vadd.f32 %v2628_v33, %v2620_v26 }
0x16f7   : > { %v2630_v36 = vmul.f32 0.7978846, %v2629_v35 }
0x16f9   : > { %8327 = vtanh.f32 %v2630_v36 }
0x1703   : > { %v8328_v37 = vpop.eup %8327 }
0x1704   : > { %v2632_v39 = vadd.f32 1.0, %v8328_v37  ;;  %v2968_v37 = vld [vmem:[%s794_s30] sm:$0xff]  ;;  %s10855_s30 = sld [smem:[#allocation23_spill]] }
0x1706   : > { %v2633_v40 = vmul.f32 %v2632_v39, %v2625_v38  ;;  %v9563_v38 = vrot.slane %v2968_v37, 4 }
0x1708   : > { %v2651_v45 = vpack.c.bf16 %v2633_v40, %v2633_v40  ;;  %v2982_v39 = vmul.f32 %v9563_v38, %v9563_v38 }
0x170a   : > { %7606 = vmatmul.mubr.bf16.vlgmr.msra.gmra.mrb[36].mxu0 %v2651_v45  ;;  %v2985_v40 = vsel %vm2972_vm9, %v2982_v39, 0.0  ;;  %v8029_v45 = vld [vmem:[%s10790_s16] ss:$12 sps:$4 sm:$0xff]   ;;  %s9770_s22 = scalar_lea.vmem %s10855_s30, %s7227_s24  ;;  %s10860_s30 = smov 16  }
0x170b   : > { %3196 = vmatprep.mubr.bf16.mxu0 %v8719_v0  ;;  %2986 = vadd.xlane.f32.xlu1 %v2985_v40 }
0x17dd   : > { %v2734_v46 = vpop.f32.mrb[36].mxu0 }
0x17de   : > { %v2740_v47 = vadd.f32 %v2734_v46, %v9474_v56  ;;  %v7607_v48 = vpop.f32.mrb[37].mxu0  ;;  %v8020_v56 = vld [vmem:[#allocation9 + $0x18] sm:$0xff]   ;;  %v8032_v46 = vld [vmem:[%s10790_s16 + $0x8] ss:$12 sps:$4 sm:$0xff]  }
0x17df   : > { %v2737_v50 = vpop.f32.mrb[38].mxu0  ;;  %7616 = vmatpush3.bf16.msra.mxu1 %v8020_v56  ;;  %v8036_v48 = vld [vmem:[%s10790_s16 + $0x20] ss:$12 sps:$4 sm:$0xff]  }
0x17e0   : > { %v7608_v51 = vpop.f32.mrb[39].mxu0  ;;  %v2745_v54 = vadd.f32 %v2744_v34, %v2740_v47  ;;  %7621 = vmatprep.subr.bf16.mxu1 %v8720_v52  ;;  %v8031_v34 = vld [vmem:[%s10790_s16 + $0x4] ss:$12 sps:$4 sm:$0xff]   ;;  %v8035_v47 = vld [vmem:[%s10790_s16 + $0x1c] ss:$12 sps:$4 sm:$0xff]  }
0x17e1   : > { %3164 = vmatprep.subr.bf16.mxu0 %v8031_v34  ;;  %v8033_v50 = vld [vmem:[%s10790_s16 + $0x18] ss:$12 sps:$4 sm:$0xff]   ;;  %v8039_v51 = vld [vmem:[%s10790_s16 + $0x34] ss:$12 sps:$4 sm:$0xff]  }
0x17e2   : > { %v2747_v55 = vsel %vm955_vm1, %v2745_v54, 0.0  ;;  %3165 = vmatpush1.bf16.msra.mxu0 %v8029_v45  ;;  %v8043_v56 = vld [vmem:[%s10790_s16 + $0x4c] ss:$12 sps:$4 sm:$0xff]  }
0x17e3   : > { %2748 = vadd.xlane.f32.xlu0 %v2747_v55  ;;  %3166 = vmatprep.subr.bf16.mxu0 %v8035_v47  ;;  %v8037_v55 = vld [vmem:[%s10790_s16 + $0x30] ss:$12 sps:$4 sm:$0xff]  }
0x17e6   : > { %3167 = vmatpush1.bf16.msra.mxu0 %v8033_v50 }
0x17e7   : > { %3168 = vmatprep.subr.bf16.mxu0 %v8039_v51  ;;  %v9725_v51 = vld [vmem:[%s10788_s14] sm:$0xff] }
0x17ea   : > { %3169 = vmatpush1.bf16.msra.mxu0 %v8037_v55 }
0x17eb   : > { %3170 = vmatprep.subr.bf16.mxu0 %v8043_v56 }
0x1870   : > { %v2749_v58 = vpop.xlane.xlu0 %2748 }
0x1871   : > { %v2750_v60 = vmul.f32 0.015625, %v2749_v58  ;;  %v2879_v58 = vrot.slane %v9537_v63, %v9277_v59  ;;  %v8045_v63 = vld [vmem:[%s10790_s16 + $0x60] ss:$12 sps:$4 sm:$0xff]  }
0x1873   : > { %v2751_v61 = vsub.f32 %v2745_v54, %v2750_v60  ;;  %v8040_v54 = vld [vmem:[%s10790_s16 + $0x38] ss:$12 sps:$4 sm:$0xff]  }
0x1875   : > { %v2752_v30 = vmul.f32 %v2751_v61, %v2751_v61 }
0x1877   : > { %v2753_v62 = vsel %vm955_vm1, %v2752_v30, 0.0 }
0x1878   : > { %2754 = vadd.xlane.f32.xlu0 %v2753_v62 }
0x1905   : > { %v2755_v49 = vpop.xlane.xlu0 %2754 }
0x1906   : > { %v2756_v2 = vmul.f32 0.015625, %v2755_v49  ;;  %v8041_v49 = vld [vmem:[%s10790_s16 + $0x48] ss:$12 sps:$4 sm:$0xff]  }
0x1907   : > { %3171 = vmatpush1.bf16.msra.mxu0 %v8041_v49 }
0x1908   : > { %v2757_v4 = vadd.f32 1e-06, %v2756_v2  ;;  %v8044_v2 = vld [vmem:[%s10790_s16 + $0x50] ss:$12 sps:$4 sm:$0xff]  }
0x190a   : > { %8329 = vrsqrt.f32 %v2757_v4  ;;  %v8047_v4 = vld [vmem:[%s10790_s16 + $0x64] ss:$12 sps:$4 sm:$0xff]  }
0x190b   : > { %3172 = vmatprep.subr.bf16.mxu0 %v8047_v4 }
0x190c   : > { %3173 = vmatpush1.bf16.msra.mxu0 %v8045_v63 }
0x1914   : > { %v8330_v6 = vpop.eup %8329 }
0x1915   : > { %v2759_v7 = vmul.f32 %v8330_v6, %v2751_v61  ;;  %v8051_v6 = vld [vmem:[%s10790_s16 + $0x7c] ss:$12 sps:$4 sm:$0xff]  }
0x1916   : > { %3174 = vmatprep.subr.bf16.mxu0 %v8051_v6 }
0x1917   : > { %v2764_v9 = vmul.f32 %v2763_v5, %v2759_v7  ;;  %v8048_v5 = vld [vmem:[%s10790_s16 + $0x68] ss:$12 sps:$4 sm:$0xff]   ;;  %v8049_v7 = vld [vmem:[%s10790_s16 + $0x78] ss:$12 sps:$4 sm:$0xff]  }
0x1918   : > { %3175 = vmatpush1.bf16.msra.mxu0 %v8049_v7 }
0x1919   : > { %v2769_v43 = vadd.f32 %v2768_v8, %v2764_v9  ;;  %v8052_v8 = vld [vmem:[%s10790_s16 + $0x80] ss:$12 sps:$4 sm:$0xff]  }
0x191a   : > { %v8055_v9 = vld [vmem:[%s10790_s16 + $0x94] ss:$12 sps:$4 sm:$0xff]  }
0x191b   : > { %v2778_v10 = vpack.c.bf16 %v2769_v43, %v2769_v43  ;;  %v8053_v43 = vld [vmem:[%s10790_s16 + $0x90] ss:$12 sps:$4 sm:$0xff]   ;;  %3176 = vmatprep.subr.bf16.mxu0 %v8055_v9 }
0x191c   : > { %3177 = vmatpush1.bf16.msra.mxu0 %v8053_v43 }
0x191d   : > { %7618 = vmatmul.mubr.msk.bf16.vlgmr.msra.gmra.mrb[60].mxu1 %vm909_vm0, %v2778_v10  ;;  %v8059_v10 = vld [vmem:[%s10790_s16 + $0xac] ss:$12 sps:$4 sm:$0xff]  }
0x191e   : > { %7622 = vmatpush3.bf16.msra.mxu1 %v8021_v1  ;;  %7637 = vmatprep.mubr.msk.bf16.mxu1 %vm8721_vm2, %v8720_v52  ;;  %v8056_v1 = vld [vmem:[%s10790_s16 + $0x98] ss:$12 sps:$4 sm:$0xff]  }
0x191f   : > { %7623 = vmatprep.subr.bf16.mxu1 %v8720_v52  ;;  %3178 = vmatprep.subr.bf16.mxu0 %v8059_v10 }
0x1922   : > { %7624 = vmatpush3.bf16.msra.mxu1 %v8022_v19  ;;  %v8057_v19 = vld [vmem:[%s10790_s16 + $0xa8] ss:$12 sps:$4 sm:$0xff]  }
0x1923   : > { %7625 = vmatprep.subr.bf16.mxu1 %v8720_v52  ;;  %3179 = vmatpush1.bf16.msra.mxu0 %v8057_v19 }
0x1924   : > { %7661 = vmatprep.subr.bf16.mxu0 %v8720_v52 }
0x1926   : > { %7626 = vmatpush3.bf16.msra.mxu1 %v8023_v11  ;;  %v8060_v11 = vld [vmem:[%s10790_s16 + $0xb0] ss:$12 sps:$4 sm:$0xff]  }
0x1927   : > { %7627 = vmatprep.subr.bf16.mxu1 %v8720_v52 }
0x192a   : > { %7628 = vmatpush3.bf16.msra.mxu1 %v8024_v12  ;;  %v2987_v12 = vpop.xlane.xlu1 %2986 }
0x192b   : > { %7629 = vmatprep.subr.bf16.mxu1 %v8720_v52 }
0x192e   : > { %7630 = vmatpush3.bf16.msra.mxu1 %v8025_v13  ;;  %v2990_v13 = vmul.f32 0.0078125, %v2987_v12 }
0x192f   : > { %7631 = vmatprep.subr.bf16.mxu1 %v8720_v52 }
0x1932   : > { %7632 = vmatpush3.bf16.msra.mxu1 %v8026_v14  ;;  %v2992_v14 = vadd.f32 1e-05, %v2990_v13 }
0x1933   : > { %7633 = vmatprep.subr.bf16.mxu1 %v8720_v52 }
0x1936   : > { %7634 = vmatpush3.bf16.msra.mxu1 %v8027_v15 }
0x1937   : > { %7635 = vmatprep.subr.bf16.mxu1 %v8720_v52 }
0x193a   : > { %7636 = vmatpush3.bf16.msra.mxu1 %v8028_v16 }
0x193b   : > { %7641 = vmatprep.subr.bf16.mxu1 %v8720_v52 }
0x19f0   : > { %v2844_v20 = vpop.f32.mrb[60].mxu1 }
0x19f1   : > { %v2845_v22 = vadd.f32 %v2844_v20, %v2782_v18  ;;  %v7619_v3 = vpop.f32.mrb[61].mxu1 }
0x19f2   : > { %v2847_v23 = vpop.f32.mrb[62].mxu1 }
0x19f3   : > { %v2851_v24 = vmul.f32 0.044715, %v2845_v22  ;;  %v7620_v25 = vpop.f32.mrb[63].mxu1  ;;  %v2850_v32 = vmul.f32 0.5, %v2845_v22 }
0x19f5   : > { %v2852_v26 = vmul.f32 %v2851_v24, %v2845_v22 }
0x19f7   : > { %v2853_v27 = vmul.f32 %v2852_v26, %v2845_v22 }
0x19f9   : > { %v2854_v28 = vadd.f32 %v2853_v27, %v2845_v22  ;;  %v2980_v22 = vld [vmem:[#allocation12] sm:$0x1f] }
0x19fa   : > { %v3000_v23 = vrot.slane %v2980_v22, %v9166_v42 }
0x19fb   : > { %v2855_v29 = vmul.f32 0.7978846, %v2854_v28 }
0x19fd   : > { %8331 = vtanh.f32 %v2855_v29 }
0x19fe   : > { %8333 = vrsqrt.f32 %v2992_v14 }
0x1a07   : > { %v8332_v31 = vpop.eup %8331 }
0x1a08   : > { %v2857_v33 = vadd.f32 1.0, %v8332_v31  ;;  %v8334_v20 = vpop.eup %8333 }
0x1a09   : > { %v2996_v3 = vmul.f32 %v8334_v20, %v9563_v38 }
0x1a0a   : > { %v2858_v35 = vmul.f32 %v2857_v33, %v2850_v32 }
0x1a0b   : > { %v3002_v26 = vmul.f32 %v3000_v23, %v2996_v3 }
0x1a0c   : > { %v2875_v36 = vpack.c.bf16 %v2858_v35, %v2858_v35 }
0x1a0e   : > { %7638 = vmatmul.mubr.bf16.vlgmr.msra.gmra.mrb[64].mxu1 %v2875_v36 }
0x1a0f   : > { %7657 = vmatprep.mubr.msk.bf16.mxu1 %vm8721_vm2, %v8720_v52  ;;  %7642 = vmatpush3.bf16.msra.mxu1 %v8032_v46 }
0x1a10   : > { %7643 = vmatprep.subr.bf16.mxu1 %v8720_v52 }
0x1a13   : > { %7644 = vmatpush3.bf16.msra.mxu1 %v8036_v48 }
0x1a14   : > { %7645 = vmatprep.subr.bf16.mxu1 %v8720_v52 }
0x1a17   : > { %7646 = vmatpush3.bf16.msra.mxu1 %v8040_v54 }
0x1a18   : > { %7647 = vmatprep.subr.bf16.mxu1 %v8720_v52 }
0x1a1b   : > { %7648 = vmatpush3.bf16.msra.mxu1 %v8044_v2 }
0x1a1c   : > { %7649 = vmatprep.subr.bf16.mxu1 %v8720_v52 }
0x1a1f   : > { %7650 = vmatpush3.bf16.msra.mxu1 %v8048_v5 }
0x1a20   : > { %7651 = vmatprep.subr.bf16.mxu1 %v8720_v52 }
0x1a23   : > { %7652 = vmatpush3.bf16.msra.mxu1 %v8052_v8 }
0x1a24   : > { %7653 = vmatprep.subr.bf16.mxu1 %v8720_v52 }
0x1a27   : > { %7654 = vmatpush3.bf16.msra.mxu1 %v8056_v1 }
0x1a28   : > { %7655 = vmatprep.subr.bf16.mxu1 %v8720_v52 }
0x1a2b   : > { %7656 = vmatpush3.bf16.msra.mxu1 %v8060_v11 }
0x1a2c   : > { %7679 = vmatprep.subr.bf16.mxu1 %v8720_v52 }
0x1ae1   : > { %v2962_v60 = vpop.f32.mrb[64].mxu1 }
0x1ae2   : > { %v2963_v61 = vadd.f32 %v2962_v60, %v2879_v58  ;;  %v7639_v30 = vpop.f32.mrb[65].mxu1  ;;  %v9731_v58 = vld [vmem:[%s10787_s13] sm:$0xff]  ;;  %v9736_v60 = vld [vmem:[%s10787_s13 + $0x8] sm:$0xf] }
0x1ae3   : > { %v2965_v62 = vpop.f32.mrb[66].mxu1 }
0x1ae4   : > { %v7640_v41 = vpop.f32.mrb[67].mxu1  ;;  %v9602_v57 = vsel %vm2972_vm9, %v2963_v61, %v9563_v38  ;;  %v9741_v61 = vld [vmem:[%s10788_s14 + $0x8] sm:$0xf] }
0x1ae5   : > { %v2981_v21 = vmul.f32 %v9602_v57, %v9602_v57 }
0x1ae7   : > { %2983 = vadd.xlane.f32.xlu0 %v2981_v21 }
0x1b74   : > { %v2984_v15 = vpop.xlane.xlu0 %2983 }
0x1b75   : > { %v2989_v16 = vmul.f32 0.0078125, %v2984_v15 }
0x1b77   : > { %v2991_v18 = vadd.f32 1e-05, %v2989_v16 }
0x1b79   : > { %8335 = vrsqrt.f32 %v2991_v18 }
0x1b83   : > { %v8336_v24 = vpop.eup %8335 }
0x1b84   : > { %v2995_v25 = vmul.f32 %v8336_v24, %v9602_v57 }
0x1b86   : > { %v3001_v27 = vmul.f32 %v3000_v23, %v2995_v25  ;;  %v9773_v23 = vld [vmem:[%s9770_s22] sm:$0xff] }
0x1b88   : > { %v3035_v28 = vpack.c.bf16 %v3002_v26, %v3001_v27 }
0x1b8a   : > { %3197 = vmatmul.mubr.bf16.vlgmr.msra.gmra.mrb[40].mxu0 %v3035_v28  ;;  %7658 = vmatmul.mubr.bf16.vlgmr.msra.gmra.mrb[68].mxu1 %v3035_v28  ;;  %v9776_v28 = vld [vmem:[%s9770_s22 + $0x8] sm:$0xf] }
0x1b8b   : > { %7663 = vmatprep.mubr.msk.bf16.mxu0 %vm8721_vm2, %v8720_v52  ;;  %7681 = vmatprep.mubr.msk.bf16.mxu1 %vm8721_vm2, %v8720_v52 }
0x1c5d   : > { %v9664_v29 = vpop.f32.mrb[40].mxu0  ;;  %v3241_v31 = vpop.f32.mrb[68].mxu1 }
0x1c5e   : > { %v9666_v32 = vpop.f32.mrb[41].mxu0  ;;  %v7659_v42 = vpop.f32.mrb[69].mxu1  ;;  %v3248_v45 = vsub.f32 0.0, %v9664_v29  ;;  %v3268_v10 = vmul.f32 %v9664_v29, %v9731_v58 }
0x1c5f   : > { %v3244_v33 = vpop.f32.mrb[70].mxu1  ;;  %3286 = vrot.lane.b32.xlu1 %v9666_v32, %s10816_s7  ;;  %v9670_v35 = vpop.f32.mrb[42].mxu0  ;;  %v3274_v36 = vsub.f32 0.0, %v9666_v32  ;;  %v3294_v21 = vmul.f32 %v9666_v32, %v9731_v58 }
0x1c60   : > { %v9673_v37 = vpack.c.bf16 %v3244_v33, %v3241_v31  ;;  %v9675_v39 = vpop.f32.mrb[43].mxu0  ;;  %v7660_v40 = vpop.f32.mrb[71].mxu1  ;;  %v3249_v46 = vsub.f32 0.0, %v9670_v35  ;;  %v3269_v19 = vmul.f32 %v9670_v35, %v9736_v60 }
0x1c61   : > { %3278 = vrot.lane.b32.xlu0 %v3274_v36, %s8725_s4  ;;  %v3275_v34 = vsub.f32 0.0, %v9675_v39  ;;  %v3295_v56 = vmul.f32 %v9675_v39, %v9736_v60 }
0x1c62   : > { %v3384_v15 = vsel %vm3382_vm10, %v9673_v37, 0 }
0x1c63   : > { %3288 = vrot.lane.b32.xlu1 %v9675_v39, %s10816_s7 }
0x1c65   : > { %3252 = vrot.lane.b32.xlu0 %v3248_v45, %s8725_s4 }
0x1c67   : > { %3280 = vrot.lane.b32.xlu1 %v3275_v34, %s8725_s4 }
0x1c69   : > { %3260 = vrot.lane.b32.xlu0 %v9664_v29, %s10816_s7 }
0x1c6b   : > { %3254 = vrot.lane.b32.xlu1 %v3249_v46, %s8725_s4 }
0x1c6d   : > { %3463 = vrot.lane.b32.xlu0 %v3274_v36, %s10852_s2 }
0x1c6f   : > { %3262 = vrot.lane.b32.xlu1 %v9670_v35, %s10816_s7 }
0x1c71   : > { %3469 = vrot.lane.b32.xlu0 %v9666_v32, %s8725_s4 }
0x1c73   : > { %3471 = vrot.lane.b32.xlu1 %v9675_v39, %s8725_s4 }
0x1c75   : > { %3427 = vrot.lane.b32.xlu0 %v3248_v45, %s10852_s2 }
0x1c77   : > { %3429 = vrot.lane.b32.xlu1 %v3249_v46, %s10852_s2 }
0x1c79   : > { %3433 = vrot.lane.b32.xlu0 %v9664_v29, %s8725_s4 }
0x1c7b   : > { %3435 = vrot.lane.b32.xlu1 %v9670_v35, %s8725_s4 }
0x1c7d   : > { %3657 = vrot.lane.b32.xlu0 %v3274_v36, %s10818_s26 }
0x1c7f   : > { %3665 = vrot.lane.b32.xlu1 %v9675_v39, %s10852_s2 }
0x1c81   : > { %3663 = vrot.lane.b32.xlu0 %v9666_v32, %s10852_s2 }
0x1c83   : > { %3625 = vrot.lane.b32.xlu1 %v3249_v46, %s10818_s26 }
0x1c85   : > { %3623 = vrot.lane.b32.xlu0 %v3248_v45, %s10818_s26 }
0x1c87   : > { %3631 = vrot.lane.b32.xlu1 %v9670_v35, %s10852_s2 }
0x1c89   : > { %3629 = vrot.lane.b32.xlu0 %v9664_v29, %s10852_s2 }
0x1c8b   : > { %3858 = vrot.lane.b32.xlu1 %v9675_v39, %s10818_s26 }
0x1c8d   : > { %3850 = vrot.lane.b32.xlu0 %v3274_v36, %s10816_s7 }
0x1c8f   : > { %3818 = vrot.lane.b32.xlu1 %v3249_v46, %s10816_s7 }
0x1c91   : > { %3856 = vrot.lane.b32.xlu0 %v9666_v32, %s10818_s26 }
0x1c93   : > { %3465 = vrot.lane.b32.xlu1 %v3275_v34, %s10852_s2 }
0x1c95   : > { %3816 = vrot.lane.b32.xlu0 %v3248_v45, %s10816_s7 }
0x1c97   : > { %3659 = vrot.lane.b32.xlu1 %v3275_v34, %s10818_s26 }
0x1c9b   : > { %3852 = vrot.lane.b32.xlu1 %v3275_v34, %s10816_s7 }
0x1cd1   : > { %v3287_v47 = vpop.permute.xlu1 %3286 }
0x1cd3   : > { %v3279_v48 = vpop.permute.xlu0 %3278 }
0x1cd4   : > { %v3292_v54 = vsel %vm1085_vm3, %v3279_v48, %v3287_v47 }
0x1cd5   : > { %v3289_v50 = vpop.permute.xlu1 %3288  ;;  %v3296_v30 = vmul.f32 %v3292_v54, %v9725_v51 }
0x1cd7   : > { %v3253_v55 = vpop.permute.xlu0 %3252  ;;  %v3298_v4 = vadd.f32 %v3296_v30, %v3294_v21 }
0x1cd9   : > { %v3281_v62 = vpop.permute.xlu1 %3280 }
0x1cda   : > { %v3293_v41 = vsel %vm1085_vm3, %v3281_v62, %v3289_v50 }
0x1cdb   : > { %v3297_v49 = vmul.f32 %v3293_v41, %v9741_v61  ;;  %v3261_v2 = vpop.permute.xlu0 %3260 }
0x1cdc   : > { %v3266_v6 = vsel %vm1085_vm3, %v3253_v55, %v3261_v2 }
0x1cdd   : > { %v3299_v63 = vadd.f32 %v3297_v49, %v3295_v56  ;;  %v3255_v5 = vpop.permute.xlu1 %3254  ;;  %v3270_v8 = vmul.f32 %v3266_v6, %v9725_v51 }
0x1cdf   : > { %v3301_v7 = vpack.c.bf16 %v3299_v63, %v3298_v4  ;;  %v3272_v12 = vadd.f32 %v3270_v8, %v3268_v10  ;;  %v3464_v3 = vpop.permute.xlu0 %3463 }
0x1ce1   : > { %v3263_v9 = vpop.permute.xlu1 %3262  ;;  %v3306_v43 = vsel %vm1542_vm7, %v3301_v7, 0 }
0x1ce2   : > { %v3267_v1 = vsel %vm1085_vm3, %v3255_v5, %v3263_v9  ;;  %7662 = vmatpush3.bf16.xpose.msra.mxu0 %v3306_v43 }
0x1ce3   : > { %v3271_v11 = vmul.f32 %v3267_v1, %v9741_v61  ;;  %7667 = vmatprep.subr.bf16.mxu0 %v8720_v52  ;;  %v3470_v40 = vpop.permute.xlu0 %3469 }
0x1ce4   : > { %v3475_v56 = vsel %vm1085_vm3, %v3464_v3, %v3470_v40 }
0x1ce5   : > { %v3273_v13 = vadd.f32 %v3271_v11, %v3269_v19  ;;  %v3472_v16 = vpop.permute.xlu1 %3471  ;;  %v3479_v2 = vmul.f32 %v3475_v56, %v9725_v51 }
0x1ce7   : > { %v3300_v14 = vpack.c.bf16 %v3273_v13, %v3272_v12  ;;  %v3428_v48 = vpop.permute.xlu0 %3427 }
0x1ce9   : > { %7664 = vmatmul.mubr.msk.bf16.vlgmr.msra.gmra.mrb[44].mxu0 %vm1542_vm7, %v3300_v14  ;;  %v3430_v18 = vpop.permute.xlu1 %3429 }
0x1cea   : > { %7668 = vmatpush3.bf16.msra.mxu0 %v3384_v15  ;;  %7669 = vmatprep.mubr.msk.bf16.mxu0 %vm8721_vm2, %v8720_v52 }
0x1ceb   : > { %7673 = vmatprep.subr.bf16.mxu0 %v8720_v52  ;;  %v3434_v54 = vpop.permute.xlu0 %3433 }
0x1cec   : > { %v3439_v6 = vsel %vm1085_vm3, %v3428_v48, %v3434_v54 }
0x1ced   : > { %v3436_v20 = vpop.permute.xlu1 %3435  ;;  %v3451_v43 = vmul.f32 %v3439_v6, %v9725_v51 }
0x1cee   : > { %v3440_v63 = vsel %vm1085_vm3, %v3430_v18, %v3436_v20 }
0x1cef   : > { %v3658_v30 = vpop.permute.xlu0 %3657  ;;  %v3452_v7 = vmul.f32 %v3440_v63, %v9741_v61 }
0x1cf1   : > { %v3666_v22 = vpop.permute.xlu1 %3665 }
0x1cf3   : > { %v3664_v41 = vpop.permute.xlu0 %3663 }
0x1cf4   : > { %v3669_v1 = vsel %vm1085_vm3, %v3658_v30, %v3664_v41 }
0x1cf5   : > { %v3626_v25 = vpop.permute.xlu1 %3625  ;;  %v3673_v19 = vmul.f32 %v3669_v1, %v9725_v51 }
0x1cf7   : > { %v3624_v4 = vpop.permute.xlu0 %3623 }
0x1cf9   : > { %v3632_v46 = vpop.permute.xlu1 %3631 }
0x1cfa   : > { %v3636_v12 = vsel %vm1085_vm3, %v3626_v25, %v3632_v46 }
0x1cfb   : > { %v3630_v8 = vpop.permute.xlu0 %3629  ;;  %v3646_v14 = vmul.f32 %v3636_v12, %v9741_v61 }
0x1cfc   : > { %v3635_v15 = vsel %vm1085_vm3, %v3624_v4, %v3630_v8 }
0x1cfd   : > { %v3859_v50 = vpop.permute.xlu1 %3858  ;;  %v3645_v20 = vmul.f32 %v3635_v15, %v9725_v51 }
0x1cff   : > { %v3851_v11 = vpop.permute.xlu0 %3850 }
0x1d01   : > { %v3819_v55 = vpop.permute.xlu1 %3818 }
0x1d05   : > { %v3466_v62 = vpop.permute.xlu1 %3465 }
0x1d06   : > { %v3476_v21 = vsel %vm1085_vm3, %v3466_v62, %v3472_v16  ;;  %v3857_v16 = vpop.permute.xlu0 %3856 }
0x1d07   : > { %v3480_v49 = vmul.f32 %v3476_v21, %v9741_v61 }
0x1d09   : > { %v3660_v5 = vpop.permute.xlu1 %3659 }
0x1d0a   : > { %v3670_v9 = vsel %vm1085_vm3, %v3660_v5, %v3666_v22  ;;  %v3862_v22 = vsel %vm1085_vm3, %v3851_v11, %v3857_v16 }
0x1d0b   : > { %v3674_v10 = vmul.f32 %v3670_v9, %v9741_v61 }
0x1d0d   : > { %v3853_v13 = vpop.permute.xlu1 %3852 }
0x1d0e   : > { %v3863_v18 = vsel %vm1085_vm3, %v3853_v13, %v3859_v50 }
0x1d0f   : > { %v3867_v3 = vmul.f32 %v3863_v18, %v9741_v61 }
0x1dbc   : > { %v3342_v24 = vpop.f32.mrb[44].mxu0 }
0x1dbd   : > { %v3349_v26 = vmul.f32 0.17677669, %v3342_v24  ;;  %v7665_v27 = vpop.f32.mrb[45].mxu0  ;;  %v3817_v24 = vpop.permute.xlu0 %3816 }
0x1dbe   : > { %v3345_v31 = vpop.f32.mrb[46].mxu0 }
0x1dbf   : > { %v3350_v42 = vmul.f32 0.17677669, %v3345_v31  ;;  %v7666_v33 = vpop.f32.mrb[47].mxu0  ;;  %v9779_v36 = vadd.f32 %v3349_v26, %v9773_v23 }
0x1dc1   : > { %v3354_v45 = vsel %vm3353_vm11, %v9779_v36, -inf  ;;  %v9784_v34 = vadd.f32 %v3350_v42, %v9776_v28 }
0x1dc2   : > { %3355 = vmax.xlane.f32.xlu0 %v3354_v45 }
0x1dc3   : > { %v3358_v47 = vsel %vm3357_vm12, %v9784_v34, -inf }
0x1dc4   : > { %3359 = vmax.xlane.f32.xlu1 %v3358_v47 }
0x1dd5   : > { %3824 = vrot.lane.b32.xlu1 %v9670_v35, %s10818_s26 }
0x1dd8   : > { %3822 = vrot.lane.b32.xlu0 %v9664_v29, %s10818_s26  ;;  %s10862_s26 = smov 64  }
0x1dd9   : > { %3445 = vrot.lane.b32.xlu1 %v9736_v60, %s10814_s1 }
0x1ddc   : > { %3443 = vrot.lane.b32.xlu0 %v9731_v58, %s10814_s1 }
0x1ddd   : > { %3485 = vrot.lane.b32.xlu1 %v3480_v49, %s10814_s1 }
0x1de0   : > { %3483 = vrot.lane.b32.xlu0 %v3479_v2, %s10814_s1 }
0x1de1   : > { %3639 = vrot.lane.b32.xlu1 %v9736_v60, %s10812_s25 }
0x1de4   : > { %3637 = vrot.lane.b32.xlu0 %v9731_v58, %s10812_s25 }
0x1de5   : > { %3457 = vrot.lane.b32.xlu1 %v3452_v7, %s10814_s1 }
0x1de8   : > { %3455 = vrot.lane.b32.xlu0 %v3451_v43, %s10814_s1 }
0x1de9   : > { %3679 = vrot.lane.b32.xlu1 %v3674_v10, %s10812_s25 }
0x1dec   : > { %3677 = vrot.lane.b32.xlu0 %v3673_v19, %s10812_s25 }
0x1ded   : > { %3832 = vrot.lane.b32.xlu1 %v9736_v60, %s10856_s19  ;;  %v3866_v60 = vmul.f32 %v3862_v22, %v9725_v51 }
0x1df0   : > { %3830 = vrot.lane.b32.xlu0 %v9731_v58, %s10856_s19 }
0x1df1   : > { %3651 = vrot.lane.b32.xlu1 %v3646_v14, %s10812_s25 }
0x1df4   : > { %3649 = vrot.lane.b32.xlu0 %v3645_v20, %s10812_s25 }
0x1df5   : > { %3872 = vrot.lane.b32.xlu1 %v3867_v3, %s10856_s19 }
0x1df8   : > { %3870 = vrot.lane.b32.xlu0 %v3866_v60, %s10856_s19 }
0x1e4f   : > { %v3356_v25 = vpop.xlane.xlu0 %3355 }
0x1e51   : > { %v3360_v26 = vpop.xlane.xlu1 %3359 }
0x1e52   : > { %v3362_v6 = vsub.f32 %v9784_v34, %v3360_v26 }
0x1e53   : > { %v3823_v58 = vpop.permute.xlu0 %3822 }
0x1e54   : > { %v3828_v27 = vsel %vm1085_vm3, %v3817_v24, %v3823_v58  ;;  %v3365_v19 = vmul.f32 1.442695, %v3362_v6 }
0x1e55   : > { %v3838_v31 = vmul.f32 %v3828_v27, %v9725_v51  ;;  %v3825_v42 = vpop.permute.xlu1 %3824 }
0x1e56   : > { %v3829_v33 = vsel %vm1085_vm3, %v3819_v55, %v3825_v42 }
0x1e57   : > { %v3839_v40 = vmul.f32 %v3829_v33, %v9741_v61  ;;  %3842 = vrot.lane.b32.xlu0 %v3838_v31, %s10856_s19  ;;  %v9839_v45 = vpop.permute.xlu0 %3443  ;;  %v3361_v61 = vsub.f32 %v9779_v36, %v3356_v25 }
0x1e58   : > { %v3477_v48 = vmul.f32 %v9839_v45, %v9666_v32  ;;  %v3449_v49 = vmul.f32 %v9839_v45, %v9664_v29 }
0x1e59   : > { %3844 = vrot.lane.b32.xlu1 %v3839_v40, %s10856_s19  ;;  %v9842_v46 = vpop.permute.xlu1 %3445  ;;  %v3363_v56 = vmul.f32 1.442695, %v3361_v61 }
0x1e5a   : > { %v3478_v51 = vmul.f32 %v9842_v46, %v9675_v39  ;;  %v3450_v2 = vmul.f32 %v9842_v46, %v9670_v35 }
0x1e5b   : > { %v3484_v47 = vpop.permute.xlu0 %3483  ;;  %8337 = vpow2.f32 %v3363_v56 }
0x1e5c   : > { %v3489_v54 = vadd.f32 %v3484_v47, %v3477_v48  ;;  %8339 = vpow2.f32 %v3365_v19 }
0x1e5d   : > { %v3486_v50 = vpop.permute.xlu1 %3485 }
0x1e5e   : > { %v3490_v55 = vadd.f32 %v3486_v50, %v3478_v51 }
0x1e5f   : > { %v9848_v30 = vpop.permute.xlu0 %3637 }
0x1e60   : > { %v3492_v62 = vpack.c.bf16 %v3490_v55, %v3489_v54  ;;  %v3671_v36 = vmul.f32 %v9848_v30, %v9666_v32  ;;  %v3643_v14 = vmul.f32 %v9848_v30, %v9664_v29 }
0x1e61   : > { %v9851_v41 = vpop.permute.xlu1 %3639 }
0x1e62   : > { %v3672_v9 = vmul.f32 %v9851_v41, %v9675_v39  ;;  %v3644_v15 = vmul.f32 %v9851_v41, %v9670_v35 }
0x1e63   : > { %v3456_v21 = vpop.permute.xlu0 %3455 }
0x1e64   : > { %v3461_v63 = vadd.f32 %v3456_v21, %v3449_v49 }
0x1e65   : > { %v3458_v4 = vpop.permute.xlu1 %3457  ;;  %v8338_v18 = vpop.eup %8337 }
0x1e66   : > { %v3462_v5 = vadd.f32 %v3458_v4, %v3450_v2  ;;  %v3367_v58 = vsel %vm3353_vm11, %v8338_v18, 0.0  ;;  %v8340_v33 = vpop.eup %8339 }
0x1e67   : > { %v3678_v7 = vpop.permute.xlu0 %3677  ;;  %v3370_v40 = vsel %vm3357_vm12, %v8340_v33, 0.0 }
0x1e68   : > { %v3491_v8 = vpack.c.bf16 %v3462_v5, %v3461_v63  ;;  %v3683_v1 = vadd.f32 %v3678_v7, %v3671_v36 }
0x1e69   : > { %v3680_v43 = vpop.permute.xlu1 %3679 }
0x1e6a   : > { %v3684_v10 = vadd.f32 %v3680_v43, %v3672_v9 }
0x1e6b   : > { %v9862_v11 = vpop.permute.xlu0 %3830 }
0x1e6c   : > { %v3686_v12 = vpack.c.bf16 %v3684_v10, %v3683_v1  ;;  %v3864_v24 = vmul.f32 %v9862_v11, %v9666_v32 }
0x1e6d   : > { %v9864_v13 = vpop.permute.xlu1 %3832 }
0x1e6e   : > { %v3865_v25 = vmul.f32 %v9864_v13, %v9675_v39  ;;  %v3836_v39 = vmul.f32 %v9862_v11, %v9664_v29  ;;  %v3837_v47 = vmul.f32 %v9864_v13, %v9670_v35 }
0x1e6f   : > { %v3650_v34 = vpop.permute.xlu0 %3649 }
0x1e70   : > { %v3655_v20 = vadd.f32 %v3650_v34, %v3643_v14 }
0x1e71   : > { %v3652_v16 = vpop.permute.xlu1 %3651 }
0x1e72   : > { %v3656_v22 = vadd.f32 %v3652_v16, %v3644_v15 }
0x1e73   : > { %v3871_v3 = vpop.permute.xlu0 %3870 }
0x1e74   : > { %v3685_v60 = vpack.c.bf16 %v3656_v22, %v3655_v20  ;;  %v3876_v27 = vadd.f32 %v3871_v3, %v3864_v24 }
0x1e75   : > { %v3873_v26 = vpop.permute.xlu1 %3872 }
0x1e76   : > { %v3877_v31 = vadd.f32 %v3873_v26, %v3865_v25  ;;  %3368 = vadd.xlane.f32.xlu0 %v3367_v58 }
0x1e78   : > { %v3879_v42 = vpack.c.bf16 %v3877_v31, %v3876_v27 }
0x1e7d   : > { %3371 = vadd.xlane.f32.xlu1 %v3370_v40 }
0x1e8c   : > { %3497 = vrot.lane.b32.xlu0 %v3492_v62, %s10856_s19 }
0x1e8e   : > { %3494 = vrot.lane.b32.xlu1 %v3491_v8, %s10856_s19 }
0x1e90   : > { %3691 = vrot.lane.b32.xlu0 %v3686_v12, %s10812_s25 }
0x1e92   : > { %3688 = vrot.lane.b32.xlu1 %v3685_v60, %s10812_s25 }
0x1e94   : > { %3884 = vrot.lane.b32.xlu0 %v3879_v42, %s10814_s1 }
0x1ec9   : > { %v3843_v32 = vpop.permute.xlu0 %3842 }
0x1eca   : > { %v3848_v51 = vadd.f32 %v3843_v32, %v3836_v39 }
0x1ecb   : > { %v3845_v48 = vpop.permute.xlu1 %3844 }
0x1ecc   : > { %v3849_v50 = vadd.f32 %v3845_v48, %v3837_v47 }
0x1ece   : > { %v3878_v54 = vpack.c.bf16 %v3849_v50, %v3848_v51 }
0x1ed0   : > { %3881 = vrot.lane.b32.xlu1 %v3878_v54, %s10814_s1 }
0x1f03   : > { %v3369_v55 = vpop.xlane.xlu0 %3368 }
0x1f04   : > { %8341 = vrcp.f32 %v3369_v55 }
0x1f07   : > { %v3498_v2 = vpop.permute.xlu0 %3497 }
0x1f08   : > { %v3503_v29 = vsel %vm1542_vm7, %v3498_v2, 0 }
0x1f0a   : > { %v3372_v61 = vpop.xlane.xlu1 %3371 }
0x1f0b   : > { %8343 = vrcp.f32 %v3372_v61  ;;  %v3692_v35 = vpop.permute.xlu0 %3691 }
0x1f0c   : > { %v3697_v5 = vsel %vm1542_vm7, %v3692_v35, 0 }
0x1f0e   : > { %v8342_v62 = vpop.eup %8341  ;;  %v3495_v63 = vpop.permute.xlu1 %3494 }
0x1f0f   : > { %v3375_v56 = vmul.f32 %v8342_v62, %v8338_v18  ;;  %v3885_v6 = vpop.permute.xlu0 %3884 }
0x1f10   : > { %v3890_v8 = vsel %vm1542_vm7, %v3885_v6, 0 }
0x1f12   : > { %v3689_v7 = vpop.permute.xlu1 %3688 }
0x1f15   : > { %v8344_v21 = vpop.eup %8343 }
0x1f16   : > { %v3376_v49 = vmul.f32 %v8344_v21, %v8340_v33 }
0x1f18   : > { %v3377_v4 = vpack.c.bf16 %v3376_v49, %v3375_v56 }
0x1f1a   : > { %7670 = vmatmul.mubr.msk.bf16.vlgmr.msra.gmra.mrb[48].mxu0 %vm3353_vm11, %v3377_v4 }
0x1f1b   : > { %7674 = vmatpush3.bf16.xpose.msra.mxu0 %v3503_v29  ;;  %7675 = vmatprep.mubr.msk.bf16.mxu0 %vm8721_vm2, %v8720_v52 }
0x1f1c   : > { %7685 = vmatprep.subr.bf16.mxu0 %v8720_v52 }
0x1f22   : > { %7676 = vmatmul.mubr.msk.bf16.vlgmr.msra.gmra.mrb[52].mxu0 %vm1542_vm7, %v3495_v63 }
0x1f23   : > { %7686 = vmatpush3.bf16.xpose.msra.mxu0 %v3697_v5  ;;  %7687 = vmatprep.mubr.msk.bf16.mxu0 %vm8721_vm2, %v8720_v52 }
0x1f24   : > { %7697 = vmatprep.subr.bf16.mxu0 %v8720_v52 }
0x1f2a   : > { %7688 = vmatmul.mubr.msk.bf16.vlgmr.msra.gmra.mrb[56].mxu0 %vm1542_vm7, %v3689_v7 }
0x1f2b   : > { %7698 = vmatpush3.bf16.xpose.msra.mxu0 %v3890_v8  ;;  %7699 = vmatprep.mubr.msk.bf16.mxu0 %vm8721_vm2, %v8720_v52 }
0x1f2c   : > { %7709 = vmatprep.subr.bf16.mxu0 %v8720_v52 }
0x1f42   : > { %v3882_v36 = vpop.permute.xlu1 %3881 }
0x1f43   : > { %7700 = vmatmul.mubr.msk.bf16.vlgmr.msra.gmra.mrb[60].mxu0 %vm1542_vm7, %v3882_v36 }
0x1f44   : > { %7725 = vmatprep.mubr.msk.bf16.mxu0 %vm8721_vm2, %v8720_v52 }
0x1fed   : > { %v9904_v9 = vpop.f32.mrb[48].mxu0 }
0x1fee   : > { %v7671_v43 = vpop.f32.mrb[49].mxu0 }
0x1fef   : > { %v9906_v1 = vpop.f32.mrb[50].mxu0 }
0x1ff0   : > { %v7672_v10 = vpop.f32.mrb[51].mxu0 }
0x1ff5   : > { %v3539_v19 = vpop.f32.mrb[52].mxu0 }
0x1ff6   : > { %v3546_v12 = vmul.f32 0.17677669, %v3539_v19  ;;  %v7677_v34 = vpop.f32.mrb[53].mxu0 }
0x1ff7   : > { %v3542_v14 = vpop.f32.mrb[54].mxu0 }
0x1ff8   : > { %v3548_v15 = vadd.f32 %v3546_v12, %v9773_v23  ;;  %v3547_v16 = vmul.f32 0.17677669, %v3542_v14  ;;  %v7678_v18 = vpop.f32.mrb[55].mxu0 }
0x1ffa   : > { %v3549_v20 = vadd.f32 %v3547_v16, %v9776_v28  ;;  %v3550_v22 = vsel %vm3353_vm11, %v3548_v15, -inf }
0x1ffb   : > { %3551 = vmax.xlane.f32.xlu0 %v3550_v22 }
0x1ffc   : > { %v3553_v3 = vsel %vm3357_vm12, %v3549_v20, -inf }
0x1ffd   : > { %3554 = vmax.xlane.f32.xlu1 %v3553_v3  ;;  %v3733_v60 = vpop.f32.mrb[56].mxu0 }
0x1ffe   : > { %v3740_v24 = vmul.f32 0.17677669, %v3733_v60  ;;  %v7689_v25 = vpop.f32.mrb[57].mxu0 }
0x1fff   : > { %v3736_v26 = vpop.f32.mrb[58].mxu0 }
0x2000   : > { %v3742_v58 = vadd.f32 %v3740_v24, %v9773_v23  ;;  %v3741_v27 = vmul.f32 0.17677669, %v3736_v26  ;;  %v7690_v31 = vpop.f32.mrb[59].mxu0 }
0x2002   : > { %v3743_v42 = vadd.f32 %v3741_v27, %v9776_v28  ;;  %v3744_v33 = vsel %vm3353_vm11, %v3742_v58, -inf }
0x2003   : > { %3745 = vmax.xlane.f32.xlu0 %v3744_v33 }
0x2004   : > { %v3747_v40 = vsel %vm3357_vm12, %v3743_v42, -inf }
0x2007   : > { %3748 = vmax.xlane.f32.xlu0 %v3747_v40 }
0x2016   : > { %v3926_v32 = vpop.f32.mrb[60].mxu0 }
0x2017   : > { %v3933_v39 = vmul.f32 0.17677669, %v3926_v32  ;;  %v7701_v47 = vpop.f32.mrb[61].mxu0 }
0x2018   : > { %v3929_v48 = vpop.f32.mrb[62].mxu0 }
0x2019   : > { %v3935_v51 = vadd.f32 %v3933_v39, %v9773_v23  ;;  %v3934_v50 = vmul.f32 0.17677669, %v3929_v48  ;;  %v7702_v54 = vpop.f32.mrb[63].mxu0 }
0x201b   : > { %v3936_v55 = vadd.f32 %v3934_v50, %v9776_v28  ;;  %v3937_v61 = vsel %vm3353_vm11, %v3935_v51, -inf }
0x201c   : > { %3938 = vmax.xlane.f32.xlu0 %v3937_v61 }
0x201d   : > { %v3940_v62 = vsel %vm3357_vm12, %v3936_v55, -inf }
0x201e   : > { %3941 = vmax.xlane.f32.xlu1 %v3940_v62 }
0x2088   : > { %v3552_v21 = vpop.xlane.xlu0 %3551 }
0x2089   : > { %v3556_v56 = vsub.f32 %v3548_v15, %v3552_v21 }
0x208a   : > { %v3555_v49 = vpop.xlane.xlu1 %3554 }
0x208b   : > { %v3558_v2 = vmul.f32 1.442695, %v3556_v56  ;;  %v3557_v4 = vsub.f32 %v3549_v20, %v3555_v49 }
0x208d   : > { %8345 = vpow2.f32 %v3558_v2  ;;  %v3560_v29 = vmul.f32 1.442695, %v3557_v4 }
0x208f   : > { %8347 = vpow2.f32 %v3560_v29 }
0x2090   : > { %v3746_v35 = vpop.xlane.xlu0 %3745 }
0x2091   : > { %v3750_v23 = vsub.f32 %v3742_v58, %v3746_v35 }
0x2093   : > { %v3752_v63 = vmul.f32 1.442695, %v3750_v23 }
0x2094   : > { %v3749_v5 = vpop.xlane.xlu0 %3748 }
0x2095   : > { %8349 = vpow2.f32 %v3752_v63  ;;  %v3751_v28 = vsub.f32 %v3743_v42, %v3749_v5 }
0x2097   : > { %v8346_v6 = vpop.eup %8345  ;;  %v3754_v7 = vmul.f32 1.442695, %v3751_v28 }
0x2098   : > { %v3562_v8 = vsel %vm3353_vm11, %v8346_v6, 0.0 }
0x2099   : > { %v8348_v36 = vpop.eup %8347  ;;  %8351 = vpow2.f32 %v3754_v7  ;;  %3563 = vadd.xlane.f32.xlu0 %v3562_v8  ;;  %v8061_v7 = vld [vmem:[#allocation13] sm:$0xff]  }
0x209a   : > { %v3565_v43 = vsel %vm3357_vm12, %v8348_v36, 0.0  ;;  %7710 = vmatpush3.bf16.msra.mxu0 %v8061_v7 }
0x209b   : > { %3566 = vadd.xlane.f32.xlu1 %v3565_v43  ;;  %v8062_v43 = vld [vmem:[#allocation13 + $0x8] sm:$0xff]   ;;  %7711 = vmatprep.subr.bf16.mxu0 %v8720_v52 }
0x209e   : > { %7712 = vmatpush3.bf16.msra.mxu0 %v8062_v43  ;;  %v8081_v43 = vld [vmem:[%s10857_s5 + $0x40] ss:$16 sps:$4 sm:$0xff]  }
0x209f   : > { %v8350_v10 = vpop.eup %8349  ;;  %7713 = vmatprep.subr.bf16.mxu0 %v8720_v52 }
0x20a0   : > { %v3756_v19 = vsel %vm3353_vm11, %v8350_v10, 0.0 }
0x20a1   : > { %3757 = vadd.xlane.f32.xlu0 %v3756_v19  ;;  %v8063_v19 = vld [vmem:[#allocation13 + $0x10] sm:$0xff]  }
0x20a2   : > { %7714 = vmatpush3.bf16.msra.mxu0 %v8063_v19  ;;  %v8089_v19 = vld [vmem:[%s10857_s5 + $0x64] ss:$16 sps:$4 sm:$0xff]  }
0x20a3   : > { %v8352_v12 = vpop.eup %8351  ;;  %7715 = vmatprep.subr.bf16.mxu0 %v8720_v52 }
0x20a4   : > { %v3759_v34 = vsel %vm3357_vm12, %v8352_v12, 0.0 }
0x20a5   : > { %3760 = vadd.xlane.f32.xlu1 %v3759_v34 }
0x20a9   : > { %v3939_v14 = vpop.xlane.xlu0 %3938 }
0x20aa   : > { %v3943_v15 = vsub.f32 %v3935_v51, %v3939_v14 }
0x20ab   : > { %v3942_v22 = vpop.xlane.xlu1 %3941 }
0x20ac   : > { %v3945_v16 = vmul.f32 1.442695, %v3943_v15  ;;  %v3944_v3 = vsub.f32 %v3936_v55, %v3942_v22  ;;  %v8067_v22 = vld [vmem:[#allocation13 + $0x30] sm:$0xff]  }
0x20ae   : > { %8353 = vpow2.f32 %v3945_v16  ;;  %v3947_v60 = vmul.f32 1.442695, %v3944_v3  ;;  %v8064_v16 = vld [vmem:[#allocation13 + $0x18] sm:$0xff]  }
0x20af   : > { %7716 = vmatpush3.bf16.msra.mxu0 %v8064_v16  ;;  %v8068_v3 = vld [vmem:[#allocation13 + $0x38] sm:$0xff]   ;;  %v8095_v16 = vld [vmem:[%s10857_s5 + $0x84] ss:$16 sps:$4 sm:$0xff]  }
0x20b0   : > { %8355 = vpow2.f32 %v3947_v60  ;;  %7717 = vmatprep.subr.bf16.mxu0 %v8720_v52 }
0x20b6   : > { %3767 = vrot.lane.b32.xlu1 %v9673_v37, %s10812_s25 }
0x20b8   : > { %v8354_v18 = vpop.eup %8353 }
0x20b9   : > { %v3949_v20 = vsel %vm3353_vm11, %v8354_v18, 0.0 }
0x20ba   : > { %3950 = vadd.xlane.f32.xlu0 %v3949_v20  ;;  %v8356_v24 = vpop.eup %8355  ;;  %v8066_v20 = vld [vmem:[#allocation13 + $0x28] sm:$0xff]  }
0x20bb   : > { %v3952_v25 = vsel %vm3357_vm12, %v8356_v24, 0.0 }
0x20d0   : > { %3574 = vrot.lane.b32.xlu0 %v9673_v37, %s10856_s19 }
0x20da   : > { %3953 = vadd.xlane.f32.xlu1 %v3952_v25 }
0x20eb   : > { %3960 = vrot.lane.b32.xlu1 %v9673_v37, %s10814_s1 }
0x2126   : > { %v3564_v58 = vpop.xlane.xlu0 %3563 }
0x2128   : > { %v3567_v26 = vpop.xlane.xlu1 %3566 }
0x2129   : > { %8357 = vrcp.f32 %v3567_v26 }
0x212a   : > { %8359 = vrcp.f32 %v3564_v58 }
0x212e   : > { %v3758_v31 = vpop.xlane.xlu0 %3757 }
0x2132   : > { %v3761_v27 = vpop.xlane.xlu1 %3760 }
0x2133   : > { %8361 = vrcp.f32 %v3761_v27  ;;  %v8358_v42 = vpop.eup %8357 }
0x2134   : > { %8363 = vrcp.f32 %v3758_v31  ;;  %v8360_v40 = vpop.eup %8359  ;;  %v3571_v32 = vmul.f32 %v8358_v42, %v8348_v36 }
0x2135   : > { %v3570_v47 = vmul.f32 %v8360_v40, %v8346_v6 }
0x2136   : > { %v3768_v51 = vpop.permute.xlu1 %3767 }
0x2137   : > { %v3572_v50 = vpack.c.bf16 %v3571_v32, %v3570_v47  ;;  %v3773_v54 = vsel %vm3382_vm10, %v3768_v51, 0 }
0x213d   : > { %v8362_v37 = vpop.eup %8361 }
0x213e   : > { %v8364_v55 = vpop.eup %8363  ;;  %v3765_v61 = vmul.f32 %v8362_v37, %v8352_v12 }
0x213f   : > { %v3764_v62 = vmul.f32 %v8364_v55, %v8350_v10 }
0x2141   : > { %v3766_v21 = vpack.c.bf16 %v3765_v61, %v3764_v62 }
0x2147   : > { %v3951_v33 = vpop.xlane.xlu0 %3950 }
0x2148   : > { %8365 = vrcp.f32 %v3951_v33 }
0x214b   : > { %v3575_v39 = vpop.permute.xlu0 %3574 }
0x214c   : > { %v3580_v48 = vsel %vm3382_vm10, %v3575_v39, 0 }
0x214d   : > { %7680 = vmatpush3.bf16.msra.mxu1 %v3580_v48 }
0x214e   : > { %7691 = vmatprep.subr.bf16.mxu1 %v8720_v52 }
0x2150   : > { %7682 = vmatmul.mubr.msk.bf16.vlgmr.msra.gmra.mrb[72].mxu1 %vm3353_vm11, %v3572_v50 }
0x2151   : > { %7692 = vmatpush3.bf16.msra.mxu1 %v3773_v54  ;;  %7693 = vmatprep.mubr.msk.bf16.mxu1 %vm8721_vm2, %v8720_v52 }
0x2152   : > { %7703 = vmatprep.subr.bf16.mxu1 %v8720_v52  ;;  %v8366_v4 = vpop.eup %8365 }
0x2153   : > { %v3957_v35 = vmul.f32 %v8366_v4, %v8354_v18  ;;  %v8065_v18 = vld [vmem:[#allocation13 + $0x20] sm:$0xff]  }
0x2154   : > { %7718 = vmatpush3.bf16.msra.mxu0 %v8065_v18  ;;  %v8075_v4 = vld [vmem:[%s10857_s5 + $0x20] ss:$16 sps:$4 sm:$0xff]   ;;  %v8096_v18 = vld [vmem:[%s10857_s5 + $0x88] ss:$16 sps:$4 sm:$0xff]  }
0x2155   : > { %7719 = vmatprep.subr.bf16.mxu0 %v8720_v52 }
0x2158   : > { %7694 = vmatmul.mubr.msk.bf16.vlgmr.msra.gmra.mrb[76].mxu1 %vm3353_vm11, %v3766_v21  ;;  %7720 = vmatpush3.bf16.msra.mxu0 %v8066_v20  ;;  %v8072_v21 = vld [vmem:[%s10857_s5 + $0x8] ss:$16 sps:$4 sm:$0xff]   ;;  %v8098_v20 = vld [vmem:[%s10857_s5 + $0x8c] ss:$16 sps:$4 sm:$0xff]  }
0x2159   : > { %7705 = vmatprep.mubr.msk.bf16.mxu1 %vm8721_vm2, %v8720_v52  ;;  %7721 = vmatprep.subr.bf16.mxu0 %v8720_v52 }
0x215c   : > { %7722 = vmatpush3.bf16.msra.mxu0 %v8067_v22  ;;  %v8101_v22 = vld [vmem:[%s10857_s5 + $0xa4] ss:$16 sps:$4 sm:$0xff]  }
0x215d   : > { %7723 = vmatprep.subr.bf16.mxu0 %v8720_v52 }
0x2160   : > { %7724 = vmatpush3.bf16.msra.mxu0 %v8068_v3  ;;  %v8104_v3 = vld [vmem:[%s10857_s5 + $0xac] ss:$16 sps:$4 sm:$0xff]  }
0x2167   : > { %v3954_v56 = vpop.xlane.xlu1 %3953 }
0x2168   : > { %8367 = vrcp.f32 %v3954_v56  ;;  %v8074_v56 = vld [vmem:[%s10857_s5 + $0xc] ss:$16 sps:$4 sm:$0xff]  }
0x2169   : > { %4405 = vmatprep.subr.bf16.mxu0 %v8074_v56 }
0x216b   : > { %v3961_v49 = vpop.permute.xlu1 %3960 }
0x216c   : > { %v3966_v2 = vsel %vm3382_vm10, %v3961_v49, 0  ;;  %v8077_v49 = vld [vmem:[%s10857_s5 + $0x24] ss:$16 sps:$4 sm:$0xff]  }
0x216d   : > { %7704 = vmatpush3.bf16.msra.mxu1 %v3966_v2  ;;  %v8080_v2 = vld [vmem:[%s10857_s5 + $0x2c] ss:$16 sps:$4 sm:$0xff]  }
0x2172   : > { %v8368_v29 = vpop.eup %8367 }
0x2173   : > { %v3958_v23 = vmul.f32 %v8368_v29, %v8356_v24  ;;  %v8078_v29 = vld [vmem:[%s10857_s5 + $0x28] ss:$16 sps:$4 sm:$0xff]  }
0x2175   : > { %v3959_v63 = vpack.c.bf16 %v3958_v23, %v3957_v35 }
0x2177   : > { %7706 = vmatmul.mubr.msk.bf16.vlgmr.msra.gmra.mrb[80].mxu1 %vm3353_vm11, %v3959_v63 }
0x2178   : > { %4394 = vmatprep.mubr.bf16.mxu1 %v8719_v0 }
0x2223   : > { %v3616_v5 = vpop.f32.mrb[72].mxu1 }
0x2224   : > { %v7683_v28 = vpop.f32.mrb[73].mxu1 }
0x2225   : > { %v3619_v6 = vpop.f32.mrb[74].mxu1 }
0x2226   : > { %v7918_v8 = vpack.i.bf16 %v3619_v6, %v3616_v5  ;;  %v7684_v36 = vpop.f32.mrb[75].mxu1 }
0x2228   : > { %7919 = vrot.lane.b32.xlu1 %v7918_v8, %s10814_s1  ;;  %s7228_s1 = sshll.u32 %s10867_s27, 6 }
0x222b   : > { %v3809_v10 = vpop.f32.mrb[76].mxu1 }
0x222c   : > { %v7695_v12 = vpop.f32.mrb[77].mxu1 }
0x222d   : > { %v3812_v34 = vpop.f32.mrb[78].mxu1  ;;  %v8092_v12 = vld [vmem:[%s10857_s5 + $0x6c] ss:$16 sps:$4 sm:$0xff]  }
0x222e   : > { %v7923_v14 = vpack.i.bf16 %v3812_v34, %v3809_v10  ;;  %v7696_v15 = vpop.f32.mrb[79].mxu1  ;;  %v8084_v10 = vld [vmem:[%s10857_s5 + $0x48] ss:$16 sps:$4 sm:$0xff]   ;;  %v8087_v34 = vld [vmem:[%s10857_s5 + $0x60] ss:$16 sps:$4 sm:$0xff]  }
0x222f   : > { %v8093_v15 = vld [vmem:[%s10857_s5 + $0x80] ss:$16 sps:$4 sm:$0xff]  }
0x2230   : > { %7924 = vrot.lane.b32.xlu0 %v7923_v14, %s10812_s25  ;;  %v8090_v14 = vld [vmem:[%s10857_s5 + $0x68] ss:$16 sps:$4 sm:$0xff]  }
0x224a   : > { %v4002_v60 = vpop.f32.mrb[80].mxu1 }
0x224b   : > { %v7707_v24 = vpop.f32.mrb[81].mxu1 }
0x224c   : > { %v4005_v25 = vpop.f32.mrb[82].mxu1  ;;  %v8102_v24 = vld [vmem:[%s10857_s5 + $0xa8] ss:$16 sps:$4 sm:$0xff]  }
0x224d   : > { %v7928_v26 = vpack.i.bf16 %v4005_v25, %v4002_v60  ;;  %v7708_v58 = vpop.f32.mrb[83].mxu1  ;;  %v8099_v60 = vld [vmem:[%s10857_s5 + $0xa0] ss:$16 sps:$4 sm:$0xff]   ;;  %v8107_v25 = vld [vmem:[%s10857_s5 + $0xc4] ss:$16 sps:$4 sm:$0xff]  }
0x224e   : > { %v8105_v58 = vld [vmem:[%s10857_s5 + $0xc0] ss:$16 sps:$4 sm:$0xff]  }
0x224f   : > { %7929 = vrot.lane.b32.xlu1 %v7928_v26, %s10856_s19  ;;  %v8110_v26 = vld [vmem:[%s10857_s5 + $0xcc] ss:$16 sps:$4 sm:$0xff]  }
0x229a   : > { %v7920_v27 = vpop.permute.xlu1 %7919 }
0x229b   : > { %v7922_v42 = vunpack.i.h.bf16 %v7920_v27  ;;  %v7921_v33 = vunpack.i.l.bf16 %v7920_v27  ;;  %v8108_v27 = vld [vmem:[%s10857_s5 + $0xc8] ss:$16 sps:$4 sm:$0xff]  }
0x229d   : > { %v4034_v47 = vsel %vm1542_vm7, %v9906_v1, %v7922_v42  ;;  %v4033_v48 = vsel %vm1542_vm7, %v9904_v9, %v7921_v33  ;;  %v8069_v1 = vld [vmem:[%s10857_s5] ss:$16 sps:$4 sm:$0xff]   ;;  %v8071_v9 = vld [vmem:[%s10857_s5 + $0x4] ss:$16 sps:$4 sm:$0xff]   ;;  %v8116_v42 = vld [vmem:[%s10857_s5 + $0xec] ss:$16 sps:$4 sm:$0xff]  }
0x229e   : > { %4362 = vmatprep.subr.bf16.mxu1 %v8071_v9  ;;  %v8111_v33 = vld [vmem:[%s10857_s5 + $0xe0] ss:$16 sps:$4 sm:$0xff]  }
0x229f   : > { %4363 = vmatpush1.bf16.msra.mxu1 %v8069_v1 }
0x22a0   : > { %4364 = vmatprep.subr.bf16.mxu1 %v8077_v49  ;;  %v8117_v49 = vld [vmem:[%s10858_s18 + $0x40] sm:$0xff]  }
0x22a2   : > { %v7925_v31 = vpop.permute.xlu0 %7924 }
0x22a3   : > { %v7927_v40 = vunpack.i.h.bf16 %v7925_v31  ;;  %v7926_v32 = vunpack.i.l.bf16 %v7925_v31  ;;  %4365 = vmatpush1.bf16.msra.mxu1 %v8075_v4  ;;  %v8113_v31 = vld [vmem:[%s10857_s5 + $0xe4] ss:$16 sps:$4 sm:$0xff]   ;;  %v8120_v4 = vld [vmem:[%s10858_s18 + $0x8] sm:$0xff]  }
0x22a5   : > { %v4035_v37 = vsel %vm909_vm0, %v4033_v48, %v7926_v32  ;;  %v4036_v54 = vsel %vm909_vm0, %v4034_v47, %v7927_v40  ;;  %v8114_v40 = vld [vmem:[%s10857_s5 + $0xe8] ss:$16 sps:$4 sm:$0xff]  }
0x22c1   : > { %v7930_v39 = vpop.permute.xlu1 %7929 }
0x22c2   : > { %v7932_v51 = vunpack.i.h.bf16 %v7930_v39  ;;  %v7931_v50 = vunpack.i.l.bf16 %v7930_v39 }
0x22c4   : > { %v4038_v55 = vsel %vm4037_vm13, %v4035_v37, %v7931_v50  ;;  %v4039_v61 = vsel %vm4037_vm13, %v4036_v54, %v7932_v51 }
0x22c5   : > { %v4056_v62 = vpack.c.bf16 %v4039_v61, %v4038_v55  ;;  %v10072_v55 = vld [vmem:[#allocation12] sm:$0x1f] }
0x22c6   : > { %v4166_v61 = vrot.slane %v10072_v55, %v9174_v44  ;;  %v8119_v44 = vld [vmem:[%s10858_s18 + $0x48] sm:$0xff]  }
0x22c7   : > { %7726 = vmatmul.mubr.bf16.vlgmr.msra.gmra.mrb[64].mxu0 %v4056_v62 }
0x22c8   : > { %4437 = vmatprep.mubr.bf16.mxu0 %v8719_v0  ;;  %4406 = vmatpush1.bf16.msra.mxu0 %v8072_v21 }
0x22c9   : > { %4407 = vmatprep.subr.bf16.mxu0 %v8080_v2  ;;  %v8118_v2 = vld [vmem:[%s10858_s18] sm:$0xff]  }
0x22cc   : > { %4408 = vmatpush1.bf16.msra.mxu0 %v8078_v29  ;;  %v8121_v29 = vld [vmem:[%s10858_s18 + $0x50] sm:$0xff]  }
0x239a   : > { %v4139_v35 = vpop.f32.mrb[64].mxu0 }
0x239b   : > { %v9989_v23 = vadd.f32 %v4139_v35, %v9602_v57  ;;  %v7727_v63 = vpop.f32.mrb[65].mxu0  ;;  %v8083_v57 = vld [vmem:[%s10857_s5 + $0x44] ss:$16 sps:$4 sm:$0xff]  }
0x239c   : > { %v4142_v5 = vpop.f32.mrb[66].mxu0  ;;  %4366 = vmatprep.subr.bf16.mxu1 %v8083_v57  ;;  %v8122_v35 = vld [vmem:[%s10858_s18 + $0x10] sm:$0xff]   ;;  %v8123_v63 = vld [vmem:[%s10858_s18 + $0x58] sm:$0xff]  }
0x239d   : > { %v9992_v28 = vadd.f32 %v4142_v5, %v9563_v38  ;;  %v7728_v6 = vpop.f32.mrb[67].mxu0  ;;  %v4148_v7 = vmul.f32 %v9989_v23, %v9989_v23  ;;  %v8086_v38 = vld [vmem:[%s10857_s5 + $0x4c] ss:$16 sps:$4 sm:$0xff]   ;;  %4367 = vmatpush1.bf16.msra.mxu1 %v8081_v43  ;;  %v8129_v57 = vld [vmem:[%s10858_s18 + $0x70] sm:$0xff]  }
0x239e   : > { %4409 = vmatprep.subr.bf16.mxu0 %v8086_v38  ;;  %4368 = vmatprep.subr.bf16.mxu1 %v8089_v19  ;;  %v8124_v5 = vld [vmem:[%s10858_s18 + $0x18] sm:$0xff]   ;;  %v8125_v6 = vld [vmem:[%s10858_s18 + $0x60] sm:$0xff]   ;;  %v8130_v38 = vld [vmem:[%s10858_s18 + $0x30] sm:$0xff]  }
0x239f   : > { %4150 = vadd.xlane.f32.xlu0 %v4148_v7  ;;  %v4149_v8 = vmul.f32 %v9992_v28, %v9992_v28  ;;  %4410 = vmatpush1.bf16.msra.mxu0 %v8084_v10  ;;  %v8126_v7 = vld [vmem:[%s10858_s18 + $0x20] sm:$0xff]   ;;  %v8131_v43 = vld [vmem:[%s10858_s18 + $0x78] sm:$0xff]  }
0x23a0   : > { %4411 = vmatprep.subr.bf16.mxu0 %v8092_v12  ;;  %v8132_v10 = vld [vmem:[%s10858_s18 + $0x38] sm:$0xff]  }
0x23a1   : > { %v4152_v36 = vsel %vm2972_vm9, %v4149_v8, 0.0  ;;  %4369 = vmatpush1.bf16.msra.mxu1 %v8087_v34  ;;  %v8127_v8 = vld [vmem:[%s10858_s18 + $0x68] sm:$0xff]  }
0x23a2   : > { %4153 = vadd.xlane.f32.xlu1 %v4152_v36  ;;  %4370 = vmatprep.subr.bf16.mxu1 %v8095_v16  ;;  %v8128_v36 = vld [vmem:[%s10858_s18 + $0x28] sm:$0xff]  }
0x23a3   : > { %4412 = vmatpush1.bf16.msra.mxu0 %v8090_v14 }
0x23a4   : > { %4413 = vmatprep.subr.bf16.mxu0 %v8098_v20 }
0x23a5   : > { %4371 = vmatpush1.bf16.msra.mxu1 %v8093_v15 }
0x23a6   : > { %4372 = vmatprep.subr.bf16.mxu1 %v8101_v22 }
0x23a7   : > { %4414 = vmatpush1.bf16.msra.mxu0 %v8096_v18 }
0x23a8   : > { %4415 = vmatprep.subr.bf16.mxu0 %v8104_v3 }
0x23a9   : > { %4373 = vmatpush1.bf16.msra.mxu1 %v8099_v60 }
0x23aa   : > { %4374 = vmatprep.subr.bf16.mxu1 %v8107_v25 }
0x23ab   : > { %4416 = vmatpush1.bf16.msra.mxu0 %v8102_v24 }
0x23ac   : > { %4417 = vmatprep.subr.bf16.mxu0 %v8110_v26 }
0x23ad   : > { %4375 = vmatpush1.bf16.msra.mxu1 %v8105_v58 }
0x23ae   : > { %4376 = vmatprep.subr.bf16.mxu1 %v8113_v31 }
0x23af   : > { %4418 = vmatpush1.bf16.msra.mxu0 %v8108_v27 }
0x23b0   : > { %4419 = vmatprep.subr.bf16.mxu0 %v8116_v42 }
0x23b1   : > { %4377 = vmatpush1.bf16.msra.mxu1 %v8111_v33 }
0x23b2   : > { %7347 = vmatprep.subr.bf16.mxu1 %v8117_v49 }
0x23b3   : > { %4420 = vmatpush1.bf16.msra.mxu0 %v8114_v40 }
0x242c   : > { %v4151_v32 = vpop.xlane.xlu0 %4150 }
0x242d   : > { %v4155_v39 = vmul.f32 0.0078125, %v4151_v32 }
0x242f   : > { %v4157_v47 = vadd.f32 1e-05, %v4155_v39  ;;  %v4154_v48 = vpop.xlane.xlu1 %4153 }
0x2430   : > { %v4156_v51 = vmul.f32 0.0078125, %v4154_v48 }
0x2431   : > { %8369 = vrsqrt.f32 %v4157_v47 }
0x2432   : > { %v4158_v50 = vadd.f32 1e-05, %v4156_v51 }
0x2434   : > { %8371 = vrsqrt.f32 %v4158_v50 }
0x243b   : > { %v8370_v37 = vpop.eup %8369 }
0x243c   : > { %v4161_v54 = vmul.f32 %v8370_v37, %v9989_v23 }
0x243e   : > { %v8372_v62 = vpop.eup %8371  ;;  %v4167_v9 = vmul.f32 %v4166_v61, %v4161_v54 }
0x243f   : > { %v4162_v1 = vmul.f32 %v8372_v62, %v9992_v28 }
0x2441   : > { %v4168_v21 = vmul.f32 %v4166_v61, %v4162_v1 }
0x2443   : > { %v4201_v56 = vpack.c.bf16 %v4168_v21, %v4167_v9 }
0x2445   : > { %4395 = vmatmul.mubr.bf16.vlgmr.msra.gmra.mrb[84].mxu1 %v4201_v56  ;;  %4438 = vmatmul.mubr.bf16.vlgmr.msra.gmra.mrb[68].mxu0 %v4201_v56 }
0x2446   : > { %4868 = vmatprep.mubr.bf16.mxu0 %v8719_v0  ;;  %7348 = vmatpush3.bf16.msra.mxu1 %v8118_v2 }
0x2447   : > { %7349 = vmatprep.subr.bf16.mxu1 %v8119_v44 }
0x244a   : > { %7350 = vmatpush3.bf16.msra.mxu1 %v8120_v4 }
0x244b   : > { %7351 = vmatprep.subr.bf16.mxu1 %v8121_v29  ;;  %v8133_v29 = vld [vmem:[%s10790_s16 + $0xc0] ss:$12 sps:$4 sm:$0xff]  }
0x244e   : > { %7352 = vmatpush3.bf16.msra.mxu1 %v8122_v35  ;;  %v8135_v35 = vld [vmem:[%s10790_s16 + $0xc4] ss:$12 sps:$4 sm:$0xff]  }
0x244f   : > { %7353 = vmatprep.subr.bf16.mxu1 %v8123_v63  ;;  %v8136_v63 = vld [vmem:[%s10790_s16 + $0xc8] ss:$12 sps:$4 sm:$0xff]   ;;  %4836 = vmatprep.subr.bf16.mxu0 %v8135_v35 }
0x2450   : > { %4837 = vmatpush1.bf16.msra.mxu0 %v8133_v29 }
0x2452   : > { %7354 = vmatpush3.bf16.msra.mxu1 %v8124_v5  ;;  %v8139_v5 = vld [vmem:[%s10790_s16 + $0xdc] ss:$12 sps:$4 sm:$0xff]  }
0x2453   : > { %7355 = vmatprep.subr.bf16.mxu1 %v8125_v6  ;;  %v8140_v6 = vld [vmem:[%s10790_s16 + $0xe0] ss:$12 sps:$4 sm:$0xff]   ;;  %4838 = vmatprep.subr.bf16.mxu0 %v8139_v5 }
0x2456   : > { %7356 = vmatpush3.bf16.msra.mxu1 %v8126_v7  ;;  %v8137_v7 = vld [vmem:[%s10790_s16 + $0xd8] ss:$12 sps:$4 sm:$0xff]  }
0x2457   : > { %7357 = vmatprep.subr.bf16.mxu1 %v8127_v8  ;;  %4839 = vmatpush1.bf16.msra.mxu0 %v8137_v7 }
0x245a   : > { %7358 = vmatpush3.bf16.msra.mxu1 %v8128_v36 }
0x245b   : > { %7359 = vmatprep.subr.bf16.mxu1 %v8129_v57 }
0x245e   : > { %7360 = vmatpush3.bf16.msra.mxu1 %v8130_v38 }
0x245f   : > { %7361 = vmatprep.subr.bf16.mxu1 %v8131_v43 }
0x2462   : > { %7362 = vmatpush3.bf16.msra.mxu1 %v8132_v10 }
0x2463   : > { %7729 = vmatprep.subr.bf16.mxu1 %v8720_v52 }
0x2518   : > { %v4396_v19 = vpop.f32.mrb[84].mxu1  ;;  %v4439_v12 = vpop.f32.mrb[68].mxu0 }
0x2519   : > { %v4448_v34 = vsub.f32 0.0, %v4396_v19  ;;  %v4398_v14 = vpop.f32.mrb[85].mxu1  ;;  %v4441_v15 = vpop.f32.mrb[69].mxu0 }
0x251a   : > { %v4449_v16 = vsub.f32 0.0, %v4398_v14  ;;  %v4400_v18 = vpop.f32.mrb[86].mxu1  ;;  %v4443_v20 = vpop.f32.mrb[70].mxu0 }
0x251b   : > { %v4452_v22 = vmul.f32 1.442695, %v4448_v34  ;;  %v4450_v3 = vsub.f32 0.0, %v4400_v18  ;;  %v4402_v60 = vpop.f32.mrb[87].mxu1  ;;  %v4445_v24 = vpop.f32.mrb[71].mxu0 }
0x251c   : > { %v4454_v25 = vmul.f32 1.442695, %v4449_v16  ;;  %v4451_v26 = vsub.f32 0.0, %v4402_v60  ;;  %v8143_v16 = vld [vmem:[%s10790_s16 + $0xf4] ss:$12 sps:$4 sm:$0xff]  }
0x251d   : > { %8373 = vpow2.f32 %v4452_v22  ;;  %v4456_v58 = vmul.f32 1.442695, %v4450_v3  ;;  %4840 = vmatprep.subr.bf16.mxu0 %v8143_v16  ;;  %v8148_v22 = vld [vmem:[%s10790_s16 + $0x110] ss:$12 sps:$4 sm:$0xff]   ;;  %v8149_v3 = vld [vmem:[%s10790_s16 + $0x120] ss:$12 sps:$4 sm:$0xff]  }
0x251e   : > { %8375 = vpow2.f32 %v4454_v25  ;;  %v4458_v27 = vmul.f32 1.442695, %v4451_v26  ;;  %v8155_v25 = vld [vmem:[%s10790_s16 + $0x13c] ss:$12 sps:$4 sm:$0xff]   ;;  %v8153_v26 = vld [vmem:[%s10790_s16 + $0x138] ss:$12 sps:$4 sm:$0xff]  }
0x251f   : > { %8377 = vpow2.f32 %v4456_v58  ;;  %v8156_v58 = vld [vmem:[%s10790_s16 + $0x140] ss:$12 sps:$4 sm:$0xff]  }
0x2520   : > { %8379 = vpow2.f32 %v4458_v27  ;;  %v8159_v27 = vld [vmem:[%s10790_s16 + $0x154] ss:$12 sps:$4 sm:$0xff]  }
0x2527   : > { %v8374_v31 = vpop.eup %8373 }
0x2528   : > { %v8376_v42 = vpop.eup %8375  ;;  %v4460_v33 = vadd.f32 1.0, %v8374_v31  ;;  %v8157_v31 = vld [vmem:[%s10790_s16 + $0x150] ss:$12 sps:$4 sm:$0xff]  }
0x2529   : > { %v8378_v40 = vpop.eup %8377  ;;  %v4461_v32 = vadd.f32 1.0, %v8376_v42  ;;  %v8160_v42 = vld [vmem:[%s10790_s16 + $0x158] ss:$12 sps:$4 sm:$0xff]  }
0x252a   : > { %v8380_v39 = vpop.eup %8379  ;;  %8381 = vrcp.f32 %v4460_v33  ;;  %v4462_v47 = vadd.f32 1.0, %v8378_v40  ;;  %v8163_v33 = vld [vmem:[%s10790_s16 + $0x16c] ss:$12 sps:$4 sm:$0xff]   ;;  %v8161_v40 = vld [vmem:[%s10790_s16 + $0x168] ss:$12 sps:$4 sm:$0xff]  }
0x252b   : > { %8383 = vrcp.f32 %v4461_v32  ;;  %v4463_v48 = vadd.f32 1.0, %v8380_v39  ;;  %v8164_v32 = vld [vmem:[%s10790_s16 + $0x170] ss:$12 sps:$4 sm:$0xff]  }
0x252c   : > { %8385 = vrcp.f32 %v4462_v47 }
0x252d   : > { %8387 = vrcp.f32 %v4463_v48 }
0x2534   : > { %v8382_v51 = vpop.eup %8381 }
0x2535   : > { %v8384_v50 = vpop.eup %8383  ;;  %v4472_v37 = vmul.f32 %v8382_v51, %v4396_v19 }
0x2536   : > { %v8386_v54 = vpop.eup %8385  ;;  %v4473_v61 = vmul.f32 %v8384_v50, %v4398_v14 }
0x2537   : > { %v8388_v62 = vpop.eup %8387  ;;  %v4476_v1 = vmul.f32 %v4472_v37, %v4439_v12  ;;  %v4474_v9 = vmul.f32 %v8386_v54, %v4400_v18  ;;  %v8147_v18 = vld [vmem:[%s10790_s16 + $0x10c] ss:$12 sps:$4 sm:$0xff]  }
0x2538   : > { %v4477_v21 = vmul.f32 %v4473_v61, %v4441_v15  ;;  %v4475_v56 = vmul.f32 %v8388_v62, %v4402_v60  ;;  %v8151_v60 = vld [vmem:[%s10790_s16 + $0x124] ss:$12 sps:$4 sm:$0xff]   ;;  %v4671_v62 = vrot.slane %v10072_v55, %v9184_v53 }
0x2539   : > { %v4478_v49 = vmul.f32 %v4474_v9, %v4443_v20  ;;  %v8145_v20 = vld [vmem:[%s10790_s16 + $0x108] ss:$12 sps:$4 sm:$0xff]  }
0x253a   : > { %v4479_v2 = vmul.f32 %v4475_v56, %v4445_v24  ;;  %v8152_v24 = vld [vmem:[%s10790_s16 + $0x128] ss:$12 sps:$4 sm:$0xff]  }
0x253b   : > { %v4512_v44 = vpack.c.bf16 %v4478_v49, %v4476_v1 }
0x253c   : > { %v4513_v4 = vpack.c.bf16 %v4479_v2, %v4477_v21 }
0x253e   : > { %4642 = vmatprep.mubr.bf16.mxu1 %v4513_v4 }
0x253f   : > { %4643 = vmatmul.mubr.bf16.vlgmr.msra.gmra.mrb[88].mxu1 %v4512_v44 }
0x2540   : > { %7745 = vmatprep.mubr.msk.bf16.mxu1 %vm8721_vm2, %v8720_v52  ;;  %7730 = vmatpush3.bf16.msra.mxu1 %v8136_v63 }
0x2541   : > { %7731 = vmatprep.subr.bf16.mxu1 %v8720_v52 }
0x2544   : > { %7732 = vmatpush3.bf16.msra.mxu1 %v8140_v6 }
0x2545   : > { %7733 = vmatprep.subr.bf16.mxu1 %v8720_v52 }
0x2612   : > { %v7363_v8 = vpop.f32.mrb[88].mxu1 }
0x2613   : > { %v7364_v36 = vpop.f32.mrb[89].mxu1 }
0x2614   : > { %v7365_v57 = vadd.f32 %v7364_v36, %v7363_v8  ;;  %v7366_v38 = vpop.f32.mrb[90].mxu1 }
0x2615   : > { %v7367_v43 = vpop.f32.mrb[91].mxu1 }
0x2616   : > { %v10150_v10 = vadd.f32 %v7365_v57, %v9989_v23  ;;  %v7368_v19 = vadd.f32 %v7367_v43, %v7366_v38  ;;  %v8141_v23 = vld [vmem:[%s10790_s16 + $0xf0] ss:$12 sps:$4 sm:$0xff]  }
0x2617   : > { %4841 = vmatpush1.bf16.msra.mxu0 %v8141_v23 }
0x2618   : > { %v10153_v12 = vadd.f32 %v7368_v19, %v9992_v28  ;;  %v4653_v34 = vmul.f32 %v10150_v10, %v10150_v10  ;;  %v8144_v28 = vld [vmem:[%s10790_s16 + $0xf8] ss:$12 sps:$4 sm:$0xff]   ;;  %4842 = vmatprep.subr.bf16.mxu0 %v8147_v18 }
0x2619   : > { %7734 = vmatpush3.bf16.msra.mxu1 %v8144_v28 }
0x261a   : > { %4655 = vadd.xlane.f32.xlu0 %v4653_v34  ;;  %v4654_v14 = vmul.f32 %v10153_v12, %v10153_v12  ;;  %7735 = vmatprep.subr.bf16.mxu1 %v8720_v52 }
0x261b   : > { %4843 = vmatpush1.bf16.msra.mxu0 %v8145_v20 }
0x261c   : > { %v4657_v15 = vsel %vm2972_vm9, %v4654_v14, 0.0  ;;  %4844 = vmatprep.subr.bf16.mxu0 %v8151_v60 }
0x261d   : > { %7736 = vmatpush3.bf16.msra.mxu1 %v8148_v22  ;;  %v10306_v22 = vld [vmem:[%s10788_s14] sm:$0xff] }
0x261e   : > { %4658 = vadd.xlane.f32.xlu0 %v4657_v15  ;;  %7737 = vmatprep.subr.bf16.mxu1 %v8720_v52 }
0x261f   : > { %4845 = vmatpush1.bf16.msra.mxu0 %v8149_v3 }
0x2620   : > { %4846 = vmatprep.subr.bf16.mxu0 %v8155_v25 }
0x2621   : > { %7738 = vmatpush3.bf16.msra.mxu1 %v8152_v24 }
0x2622   : > { %7739 = vmatprep.subr.bf16.mxu1 %v8720_v52 }
0x2623   : > { %4847 = vmatpush1.bf16.msra.mxu0 %v8153_v26 }
0x2624   : > { %4848 = vmatprep.subr.bf16.mxu0 %v8159_v27 }
0x2625   : > { %7740 = vmatpush3.bf16.msra.mxu1 %v8156_v58 }
0x2626   : > { %7741 = vmatprep.subr.bf16.mxu1 %v8720_v52 }
0x2627   : > { %4849 = vmatpush1.bf16.msra.mxu0 %v8157_v31 }
0x2628   : > { %4850 = vmatprep.subr.bf16.mxu0 %v8163_v33 }
0x2629   : > { %7742 = vmatpush3.bf16.msra.mxu1 %v8160_v42 }
0x262a   : > { %7743 = vmatprep.subr.bf16.mxu1 %v8720_v52 }
0x262b   : > { %4851 = vmatpush1.bf16.msra.mxu0 %v8161_v40 }
0x262c   : > { %7749 = vmatprep.subr.bf16.mxu0 %v8720_v52 }
0x262d   : > { %7744 = vmatpush3.bf16.msra.mxu1 %v8164_v32  ;;  %v10320_v32 = vld [vmem:[%s10788_s14 + $0x8] sm:$0xf] }
0x262e   : > { %7755 = vmatprep.subr.bf16.mxu1 %v8720_v52 }
0x26a7   : > { %v4656_v39 = vpop.xlane.xlu0 %4655 }
0x26a8   : > { %v4660_v47 = vmul.f32 0.0078125, %v4656_v39 }
0x26aa   : > { %v4662_v48 = vadd.f32 1e-05, %v4660_v47 }
0x26ab   : > { %v4659_v51 = vpop.xlane.xlu0 %4658 }
0x26ac   : > { %8389 = vrsqrt.f32 %v4662_v48  ;;  %v4661_v50 = vmul.f32 0.0078125, %v4659_v51 }
0x26ae   : > { %v4663_v37 = vadd.f32 1e-05, %v4661_v50 }
0x26b0   : > { %8391 = vrsqrt.f32 %v4663_v37 }
0x26b6   : > { %v8390_v54 = vpop.eup %8389 }
0x26b7   : > { %v4666_v61 = vmul.f32 %v8390_v54, %v10150_v10 }
0x26b9   : > { %v4672_v21 = vmul.f32 %v4671_v62, %v4666_v61 }
0x26ba   : > { %v8392_v1 = vpop.eup %8391 }
0x26bb   : > { %v4667_v9 = vmul.f32 %v8392_v1, %v10153_v12 }
0x26bd   : > { %v4673_v56 = vmul.f32 %v4671_v62, %v4667_v9 }
0x26bf   : > { %v4707_v49 = vpack.c.bf16 %v4673_v56, %v4672_v21 }
0x26c1   : > { %4869 = vmatmul.mubr.bf16.vlgmr.msra.gmra.mrb[72].mxu0 %v4707_v49  ;;  %7746 = vmatmul.mubr.bf16.vlgmr.msra.gmra.mrb[92].mxu1 %v4707_v49 }
0x26c2   : > { %7751 = vmatprep.mubr.msk.bf16.mxu0 %vm8721_vm2, %v8720_v52  ;;  %7757 = vmatprep.mubr.msk.bf16.mxu1 %vm8721_vm2, %v8720_v52 }
0x2794   : > { %v10229_v2 = vpop.f32.mrb[72].mxu0  ;;  %v4913_v44 = vpop.f32.mrb[92].mxu1 }
0x2795   : > { %v7747_v4 = vpop.f32.mrb[93].mxu1  ;;  %5102 = vrot.lane.b32.xlu0 %v10229_v2, %s8725_s4  ;;  %v10233_v53 = vpop.f32.mrb[73].mxu0  ;;  %v10250_v7 = vsub.f32 0.0, %v10229_v2 }
0x2796   : > { %v4916_v55 = vpop.f32.mrb[94].mxu1  ;;  %5130 = vrot.lane.b32.xlu1 %v10233_v53, %s8725_s4  ;;  %v10237_v29 = vpop.f32.mrb[74].mxu0  ;;  %v10262_v8 = vsub.f32 0.0, %v10233_v53 }
0x2797   : > { %v10239_v35 = vpack.c.bf16 %v4916_v55, %v4913_v44  ;;  %v10241_v63 = vpop.f32.mrb[75].mxu0  ;;  %v7748_v5 = vpop.f32.mrb[95].mxu1  ;;  %v10265_v36 = vsub.f32 0.0, %v10237_v29 }
0x2798   : > { %v10276_v57 = vsub.f32 0.0, %v10241_v63 }
0x2799   : > { %5318 = vrot.lane.b32.xlu0 %v10233_v53, %s10852_s2  ;;  %v5053_v6 = vsel %vm3382_vm10, %v10239_v35, 0 }
0x279a   : > { %7756 = vmatpush3.bf16.msra.mxu1 %v5053_v6  ;;  %5104 = vrot.lane.b32.xlu1 %v10237_v29, %s8725_s4 }
0x279b   : > { %7767 = vmatprep.subr.bf16.mxu1 %v8720_v52 }
0x279d   : > { %5096 = vrot.lane.b32.xlu0 %v10250_v7, %s10852_s2 }
0x279e   : > { %5132 = vrot.lane.b32.xlu1 %v10241_v63, %s8725_s4 }
0x27a1   : > { %5284 = vrot.lane.b32.xlu0 %v10250_v7, %s10859_s29 }
0x27a2   : > { %5320 = vrot.lane.b32.xlu1 %v10241_v63, %s10852_s2 }
0x27a5   : > { %5124 = vrot.lane.b32.xlu0 %v10262_v8, %s10852_s2 }
0x27a6   : > { %5098 = vrot.lane.b32.xlu1 %v10265_v36, %s10852_s2 }
0x27a9   : > { %5290 = vrot.lane.b32.xlu0 %v10229_v2, %s10852_s2 }
0x27aa   : > { %5286 = vrot.lane.b32.xlu1 %v10265_v36, %s10859_s29 }
0x27ad   : > { %5312 = vrot.lane.b32.xlu0 %v10262_v8, %s10859_s29 }
0x27ae   : > { %5126 = vrot.lane.b32.xlu1 %v10276_v57, %s10852_s2 }
0x27b1   : > { %5499 = vrot.lane.b32.xlu0 %v10262_v8, %s10860_s30 }
0x27b2   : > { %5292 = vrot.lane.b32.xlu1 %v10237_v29, %s10852_s2 }
0x27b5   : > { %5505 = vrot.lane.b32.xlu0 %v10233_v53, %s10859_s29 }
0x27b6   : > { %5314 = vrot.lane.b32.xlu1 %v10276_v57, %s10859_s29 }
0x27b9   : > { %5471 = vrot.lane.b32.xlu0 %v10250_v7, %s10860_s30 }
0x27ba   : > { %5507 = vrot.lane.b32.xlu1 %v10241_v63, %s10859_s29 }
0x27bd   : > { %5477 = vrot.lane.b32.xlu0 %v10229_v2, %s10859_s29 }
0x27be   : > { %5501 = vrot.lane.b32.xlu1 %v10276_v57, %s10860_s30 }
0x27c2   : > { %5473 = vrot.lane.b32.xlu1 %v10265_v36, %s10860_s30 }
0x27c6   : > { %5479 = vrot.lane.b32.xlu1 %v10237_v29, %s10859_s29 }
0x2807   : > { %v5103_v38 = vpop.permute.xlu0 %5102 }
0x2808   : > { %v5131_v43 = vpop.permute.xlu1 %5130 }
0x280b   : > { %v5319_v19 = vpop.permute.xlu0 %5318 }
0x280c   : > { %v5105_v34 = vpop.permute.xlu1 %5104 }
0x280f   : > { %v5097_v14 = vpop.permute.xlu0 %5096 }
0x2810   : > { %v5133_v15 = vpop.permute.xlu1 %5132  ;;  %v5108_v60 = vsel %vm1085_vm3, %v5097_v14, %v5103_v38 }
0x2811   : > { %v5112_v26 = vmul.f32 %v10306_v22, %v5108_v60  ;;  %v5110_v60 = vmul.f32 %v10229_v2, %v9839_v45 }
0x2813   : > { %v5285_v16 = vpop.permute.xlu0 %5284 }
0x2814   : > { %v5321_v23 = vpop.permute.xlu1 %5320 }
0x2817   : > { %v5125_v28 = vpop.permute.xlu0 %5124 }
0x2818   : > { %v5136_v18 = vsel %vm1085_vm3, %v5125_v28, %v5131_v43  ;;  %v5099_v20 = vpop.permute.xlu1 %5098 }
0x2819   : > { %v5140_v3 = vmul.f32 %v10306_v22, %v5136_v18  ;;  %v5109_v47 = vsel %vm1085_vm3, %v5099_v20, %v5105_v34 }
0x281a   : > { %v5113_v37 = vmul.f32 %v10320_v32, %v5109_v47 }
0x281b   : > { %5144 = vrot.lane.b32.xlu0 %v5140_v3, %s10861_s3  ;;  %v5291_v24 = vpop.permute.xlu0 %5290 }
0x281c   : > { %v5287_v25 = vpop.permute.xlu1 %5286  ;;  %v5296_v40 = vsel %vm1085_vm3, %v5285_v16, %v5291_v24 }
0x281d   : > { %v5300_v50 = vmul.f32 %v10306_v22, %v5296_v40 }
0x281f   : > { %5116 = vrot.lane.b32.xlu0 %v5112_v26, %s10861_s3  ;;  %v5313_v58 = vpop.permute.xlu0 %5312 }
0x2820   : > { %v5324_v27 = vsel %vm1085_vm3, %v5313_v58, %v5319_v19  ;;  %v5127_v31 = vpop.permute.xlu1 %5126 }
0x2821   : > { %v5328_v42 = vmul.f32 %v10306_v22, %v5324_v27  ;;  %v5137_v33 = vsel %vm1085_vm3, %v5127_v31, %v5133_v15  ;;  %v5326_v31 = vmul.f32 %v10233_v53, %v9848_v30 }
0x2822   : > { %v5141_v39 = vmul.f32 %v10320_v32, %v5137_v33  ;;  %v5327_v33 = vmul.f32 %v10241_v63, %v9851_v41 }
0x2823   : > { %5332 = vrot.lane.b32.xlu0 %v5328_v42, %s10862_s26  ;;  %v5500_v48 = vpop.permute.xlu0 %5499 }
0x2824   : > { %5146 = vrot.lane.b32.xlu1 %v5141_v39, %s10861_s3  ;;  %v5293_v51 = vpop.permute.xlu1 %5292 }
0x2825   : > { %v5297_v56 = vsel %vm1085_vm3, %v5287_v25, %v5293_v51  ;;  %v5299_v51 = vmul.f32 %v10237_v29, %v9851_v41 }
0x2826   : > { %v5301_v4 = vmul.f32 %v10320_v32, %v5297_v56 }
0x2827   : > { %5304 = vrot.lane.b32.xlu0 %v5300_v50, %s10862_s26  ;;  %v5506_v54 = vpop.permute.xlu0 %5505 }
0x2828   : > { %v5511_v61 = vsel %vm1085_vm3, %v5500_v48, %v5506_v54  ;;  %5118 = vrot.lane.b32.xlu1 %v5113_v37, %s10861_s3  ;;  %v5315_v62 = vpop.permute.xlu1 %5314 }
0x2829   : > { %v5515_v1 = vmul.f32 %v10306_v22, %v5511_v61  ;;  %v5325_v9 = vsel %vm1085_vm3, %v5315_v62, %v5321_v23  ;;  %v5513_v61 = vmul.f32 %v10233_v53, %v9862_v11 }
0x282a   : > { %v5329_v21 = vmul.f32 %v10320_v32, %v5325_v9  ;;  %v5514_v9 = vmul.f32 %v10241_v63, %v9864_v13 }
0x282b   : > { %5519 = vrot.lane.b32.xlu0 %v5515_v1, %s10856_s19  ;;  %v5472_v49 = vpop.permute.xlu0 %5471 }
0x282c   : > { %5334 = vrot.lane.b32.xlu1 %v5329_v21, %s10862_s26  ;;  %v5508_v44 = vpop.permute.xlu1 %5507 }
0x282f   : > { %v5478_v55 = vpop.permute.xlu0 %5477 }
0x2830   : > { %v5483_v5 = vsel %vm1085_vm3, %v5472_v49, %v5478_v55  ;;  %5306 = vrot.lane.b32.xlu1 %v5301_v4, %s10862_s26  ;;  %v5502_v6 = vpop.permute.xlu1 %5501  ;;  %v5486_v55 = vmul.f32 %v10237_v29, %v9864_v13 }
0x2831   : > { %v5487_v38 = vmul.f32 %v10306_v22, %v5483_v5  ;;  %v5512_v43 = vsel %vm1085_vm3, %v5502_v6, %v5508_v44  ;;  %v5485_v44 = vmul.f32 %v10229_v2, %v9862_v11  ;;  %v8452_v11 = vld [vmem:[%s10787_s13] sm:$0xff] }
0x2832   : > { %v5516_v19 = vmul.f32 %v10320_v32, %v5512_v43  ;;  %v4966_v13 = vmul.f32 %v8452_v11, %v10233_v53 }
0x2833   : > { %5491 = vrot.lane.b32.xlu0 %v5487_v38, %s10856_s19 }
0x2834   : > { %5521 = vrot.lane.b32.xlu1 %v5516_v19, %s10856_s19  ;;  %v5474_v34 = vpop.permute.xlu1 %5473 }
0x2837   : > { %4950 = vrot.lane.b32.xlu0 %v10262_v8, %s8725_s4 }
0x2838   : > { %v5480_v14 = vpop.permute.xlu1 %5479 }
0x2839   : > { %v5484_v15 = vsel %vm1085_vm3, %v5474_v34, %v5480_v14 }
0x283a   : > { %v5488_v16 = vmul.f32 %v10320_v32, %v5484_v15 }
0x283b   : > { %4958 = vrot.lane.b32.xlu0 %v10233_v53, %s10860_s30 }
0x283c   : > { %5493 = vrot.lane.b32.xlu1 %v5488_v16, %s10856_s19 }
0x283f   : > { %4924 = vrot.lane.b32.xlu0 %v10250_v7, %s8725_s4  ;;  %v5138_v7 = vmul.f32 %v10233_v53, %v9839_v45 }
0x2840   : > { %4952 = vrot.lane.b32.xlu1 %v10276_v57, %s8725_s4  ;;  %v5139_v57 = vmul.f32 %v10241_v63, %v9842_v46 }
0x2843   : > { %4932 = vrot.lane.b32.xlu0 %v10229_v2, %s10860_s30 }
0x2844   : > { %4960 = vrot.lane.b32.xlu1 %v10241_v63, %s10860_s30 }
0x2848   : > { %4926 = vrot.lane.b32.xlu1 %v10265_v36, %s8725_s4  ;;  %v5111_v36 = vmul.f32 %v10237_v29, %v9842_v46  ;;  %v5298_v46 = vmul.f32 %v10229_v2, %v9848_v30 }
0x284c   : > { %4934 = vrot.lane.b32.xlu1 %v10237_v29, %s10860_s30 }
0x288d   : > { %v5145_v8 = vpop.permute.xlu0 %5144 }
0x288e   : > { %v5150_v20 = vadd.f32 %v5145_v8, %v5138_v7  ;;  %v8453_v7 = vld [vmem:[%s10787_s13 + $0x8] sm:$0xf] }
0x2891   : > { %v5117_v23 = vpop.permute.xlu0 %5116 }
0x2892   : > { %v5122_v26 = vadd.f32 %v5117_v23, %v5110_v60 }
0x2895   : > { %v5333_v28 = vpop.permute.xlu0 %5332 }
0x2896   : > { %v5147_v18 = vpop.permute.xlu1 %5146  ;;  %v5338_v39 = vadd.f32 %v5333_v28, %v5326_v31  ;;  %v4967_v28 = vmul.f32 %v8453_v7, %v10241_v63  ;;  %v4941_v63 = vmul.f32 %v8453_v7, %v10237_v29 }
0x2897   : > { %v5151_v3 = vadd.f32 %v5147_v18, %v5139_v57 }
0x2899   : > { %v5153_v24 = vpack.c.bf16 %v5151_v3, %v5150_v20  ;;  %v5305_v58 = vpop.permute.xlu0 %5304 }
0x289a   : > { %v5119_v25 = vpop.permute.xlu1 %5118  ;;  %v5310_v37 = vadd.f32 %v5305_v58, %v5298_v46  ;;  %v4940_v58 = vmul.f32 %v8452_v11, %v10229_v2 }
0x289b   : > { %v5123_v27 = vadd.f32 %v5119_v25, %v5111_v36  ;;  %5158 = vrot.lane.b32.xlu0 %v5153_v24, %s10856_s19 }
0x289d   : > { %v5152_v42 = vpack.c.bf16 %v5123_v27, %v5122_v26  ;;  %v5520_v47 = vpop.permute.xlu0 %5519 }
0x289e   : > { %v5335_v40 = vpop.permute.xlu1 %5334  ;;  %v5525_v30 = vadd.f32 %v5520_v47, %v5513_v61 }
0x289f   : > { %v5339_v45 = vadd.f32 %v5335_v40, %v5327_v33  ;;  %5155 = vrot.lane.b32.xlu1 %v5152_v42, %s10856_s19 }
0x28a1   : > { %v5341_v48 = vpack.c.bf16 %v5339_v45, %v5338_v39 }
0x28a2   : > { %v5307_v50 = vpop.permute.xlu1 %5306 }
0x28a3   : > { %v5311_v54 = vadd.f32 %v5307_v50, %v5299_v51  ;;  %5346 = vrot.lane.b32.xlu0 %v5341_v48, %s10862_s26 }
0x28a5   : > { %v5340_v62 = vpack.c.bf16 %v5311_v54, %v5310_v37  ;;  %v5492_v1 = vpop.permute.xlu0 %5491  ;;  %v8454_v54 = vld [vmem:[%s9770_s22] sm:$0xff] }
0x28a6   : > { %v5522_v21 = vpop.permute.xlu1 %5521  ;;  %v5497_v6 = vadd.f32 %v5492_v1, %v5485_v44 }
0x28a7   : > { %v5526_v56 = vadd.f32 %v5522_v21, %v5514_v9  ;;  %5343 = vrot.lane.b32.xlu1 %v5340_v62, %s10862_s26  ;;  %v8455_v9 = vld [vmem:[%s9770_s22 + $0x8] sm:$0xf]  ;;  %s10863_s22 = sld [smem:[#allocation30_spill]] }
0x28a9   : > { %v5528_v49 = vpack.c.bf16 %v5526_v56, %v5525_v30  ;;  %v4951_v41 = vpop.permute.xlu0 %4950 }
0x28ab   : > { %5533 = vrot.lane.b32.xlu0 %v5528_v49, %s10861_s3 }
0x28ad   : > { %v4959_v4 = vpop.permute.xlu0 %4958 }
0x28ae   : > { %v5494_v5 = vpop.permute.xlu1 %5493  ;;  %v4964_v14 = vsel %vm1085_vm3, %v4951_v41, %v4959_v4 }
0x28af   : > { %v5498_v38 = vadd.f32 %v5494_v5, %v5486_v55  ;;  %v4968_v15 = vmul.f32 %v10306_v22, %v4964_v14 }
0x28b1   : > { %v5527_v43 = vpack.c.bf16 %v5498_v38, %v5497_v6  ;;  %v4925_v19 = vpop.permute.xlu0 %4924  ;;  %v4970_v18 = vadd.f32 %v4968_v15, %v4966_v13 }
0x28b2   : > { %v4953_v34 = vpop.permute.xlu1 %4952 }
0x28b3   : > { %5530 = vrot.lane.b32.xlu1 %v5527_v43, %s10861_s3 }
0x28b5   : > { %v4933_v23 = vpop.permute.xlu0 %4932 }
0x28b6   : > { %v4961_v16 = vpop.permute.xlu1 %4960  ;;  %v4938_v60 = vsel %vm1085_vm3, %v4925_v19, %v4933_v23 }
0x28b7   : > { %v4965_v8 = vsel %vm1085_vm3, %v4953_v34, %v4961_v16  ;;  %v4942_v36 = vmul.f32 %v10306_v22, %v4938_v60 }
0x28b8   : > { %v4969_v57 = vmul.f32 %v10320_v32, %v4965_v8 }
0x28b9   : > { %v4944_v31 = vadd.f32 %v4942_v36, %v4940_v58 }
0x28ba   : > { %v4971_v20 = vadd.f32 %v4969_v57, %v4967_v28  ;;  %v4927_v3 = vpop.permute.xlu1 %4926 }
0x28bc   : > { %v4973_v24 = vpack.c.bf16 %v4971_v20, %v4970_v18 }
0x28be   : > { %v4935_v25 = vpop.permute.xlu1 %4934  ;;  %v4978_v53 = vsel %vm1542_vm7, %v4973_v24, 0 }
0x28bf   : > { %v4939_v26 = vsel %vm1085_vm3, %v4927_v3, %v4935_v25  ;;  %7750 = vmatpush3.bf16.xpose.msra.mxu0 %v4978_v53 }
0x28c0   : > { %v4943_v27 = vmul.f32 %v10320_v32, %v4939_v26  ;;  %7761 = vmatprep.subr.bf16.mxu0 %v8720_v52 }
0x28c2   : > { %v4945_v42 = vadd.f32 %v4943_v27, %v4941_v63 }
0x28c4   : > { %v4972_v33 = vpack.c.bf16 %v4945_v42, %v4944_v31 }
0x28c6   : > { %7752 = vmatmul.mubr.msk.bf16.vlgmr.msra.gmra.mrb[76].mxu0 %vm1542_vm7, %v4972_v33 }
0x28c7   : > { %7763 = vmatprep.mubr.msk.bf16.mxu0 %vm8721_vm2, %v8720_v52 }
0x290d   : > { %v5159_v22 = vpop.permute.xlu0 %5158 }
0x290e   : > { %v5164_v40 = vsel %vm1542_vm7, %v5159_v22, 0 }
0x290f   : > { %7762 = vmatpush3.bf16.xpose.msra.mxu0 %v5164_v40 }
0x2910   : > { %7773 = vmatprep.subr.bf16.mxu0 %v8720_v52 }
0x2911   : > { %v5156_v2 = vpop.permute.xlu1 %5155 }
0x2915   : > { %v5347_v29 = vpop.permute.xlu0 %5346 }
0x2916   : > { %v5352_v32 = vsel %vm1542_vm7, %v5347_v29, 0  ;;  %7764 = vmatmul.mubr.msk.bf16.vlgmr.msra.gmra.mrb[80].mxu0 %vm1542_vm7, %v5156_v2 }
0x2917   : > { %7774 = vmatpush3.bf16.xpose.msra.mxu0 %v5352_v32  ;;  %7775 = vmatprep.mubr.msk.bf16.mxu0 %vm8721_vm2, %v8720_v52 }
0x2918   : > { %7785 = vmatprep.subr.bf16.mxu0 %v8720_v52 }
0x2919   : > { %v5344_v39 = vpop.permute.xlu1 %5343 }
0x291d   : > { %v5534_v45 = vpop.permute.xlu0 %5533 }
0x291e   : > { %v5539_v46 = vsel %vm1542_vm7, %v5534_v45, 0  ;;  %7776 = vmatmul.mubr.msk.bf16.vlgmr.msra.gmra.mrb[84].mxu0 %vm1542_vm7, %v5344_v39 }
0x291f   : > { %7786 = vmatpush3.bf16.xpose.msra.mxu0 %v5539_v46  ;;  %7787 = vmatprep.mubr.msk.bf16.mxu0 %vm8721_vm2, %v8720_v52 }
0x2920   : > { %7797 = vmatprep.subr.bf16.mxu0 %v8720_v52 }
0x2925   : > { %v5531_v47 = vpop.permute.xlu1 %5530 }
0x2926   : > { %7788 = vmatmul.mubr.msk.bf16.vlgmr.msra.gmra.mrb[88].mxu0 %vm1542_vm7, %v5531_v47 }
0x2927   : > { %7813 = vmatprep.mubr.msk.bf16.mxu0 %vm8721_vm2, %v8720_v52 }
0x2999   : > { %v5014_v48 = vpop.f32.mrb[76].mxu0 }
0x299a   : > { %v5021_v51 = vmul.f32 0.17677669, %v5014_v48  ;;  %v7753_v50 = vpop.f32.mrb[77].mxu0 }
0x299b   : > { %v5017_v37 = vpop.f32.mrb[78].mxu0 }
0x299c   : > { %v5023_v61 = vadd.f32 %v8454_v54, %v5021_v51  ;;  %v5022_v62 = vmul.f32 0.17677669, %v5017_v37  ;;  %v7754_v1 = vpop.f32.mrb[79].mxu0 }
0x299e   : > { %v5024_v21 = vadd.f32 %v8455_v9, %v5022_v62  ;;  %v5025_v30 = vsel %vm3353_vm11, %v5023_v61, -inf }
0x299f   : > { %5026 = vmax.xlane.f32.xlu0 %v5025_v30 }
0x29a0   : > { %v5028_v56 = vsel %vm3357_vm12, %v5024_v21, -inf }
0x29a1   : > { %5029 = vmax.xlane.f32.xlu1 %v5028_v56 }
0x29e9   : > { %v5200_v49 = vpop.f32.mrb[80].mxu0 }
0x29ea   : > { %v5207_v41 = vmul.f32 0.17677669, %v5200_v49  ;;  %v7765_v44 = vpop.f32.mrb[81].mxu0 }
0x29eb   : > { %v5203_v4 = vpop.f32.mrb[82].mxu0 }
0x29ec   : > { %v5209_v55 = vadd.f32 %v8454_v54, %v5207_v41  ;;  %v5208_v5 = vmul.f32 0.17677669, %v5203_v4  ;;  %v7766_v6 = vpop.f32.mrb[83].mxu0 }
0x29ee   : > { %v5210_v38 = vadd.f32 %v8455_v9, %v5208_v5  ;;  %v5211_v43 = vsel %vm3353_vm11, %v5209_v55, -inf }
0x29ef   : > { %5212 = vmax.xlane.f32.xlu0 %v5211_v43 }
0x29f0   : > { %v5214_v15 = vsel %vm3357_vm12, %v5210_v38, -inf }
0x29f1   : > { %v5388_v19 = vpop.f32.mrb[84].mxu0 }
0x29f2   : > { %v5395_v34 = vmul.f32 0.17677669, %v5388_v19  ;;  %v7777_v14 = vpop.f32.mrb[85].mxu0 }
0x29f3   : > { %5215 = vmax.xlane.f32.xlu0 %v5214_v15  ;;  %v5391_v16 = vpop.f32.mrb[86].mxu0 }
0x29f4   : > { %v5397_v8 = vadd.f32 %v8454_v54, %v5395_v34  ;;  %v5396_v11 = vmul.f32 0.17677669, %v5391_v16  ;;  %v7778_v13 = vpop.f32.mrb[87].mxu0 }
0x29f6   : > { %v5398_v23 = vadd.f32 %v8455_v9, %v5396_v11  ;;  %v5399_v7 = vsel %vm3353_vm11, %v5397_v8, -inf }
0x29f7   : > { %5400 = vmax.xlane.f32.xlu0 %v5399_v7 }
0x29f8   : > { %v5402_v28 = vsel %vm3357_vm12, %v5398_v23, -inf }
0x29f9   : > { %5403 = vmax.xlane.f32.xlu1 %v5402_v28  ;;  %v5575_v57 = vpop.f32.mrb[88].mxu0 }
0x29fa   : > { %v5582_v18 = vmul.f32 0.17677669, %v5575_v57  ;;  %v7789_v20 = vpop.f32.mrb[89].mxu0 }
0x29fb   : > { %v5578_v3 = vpop.f32.mrb[90].mxu0 }
0x29fc   : > { %v5584_v60 = vadd.f32 %v8454_v54, %v5582_v18  ;;  %v5583_v24 = vmul.f32 0.17677669, %v5578_v3  ;;  %v7790_v36 = vpop.f32.mrb[91].mxu0 }
0x29fe   : > { %v5585_v25 = vadd.f32 %v8455_v9, %v5583_v24  ;;  %v5586_v53 = vsel %vm3353_vm11, %v5584_v60, -inf }
0x29ff   : > { %5587 = vmax.xlane.f32.xlu0 %v5586_v53 }
0x2a00   : > { %v5589_v26 = vsel %vm3357_vm12, %v5585_v25, -inf }
0x2a01   : > { %5590 = vmax.xlane.f32.xlu1 %v5589_v26 }
0x2a2c   : > { %v5027_v58 = vpop.xlane.xlu0 %5026 }
0x2a2d   : > { %v5031_v63 = vsub.f32 %v5023_v61, %v5027_v58 }
0x2a2e   : > { %v5030_v27 = vpop.xlane.xlu1 %5029 }
0x2a2f   : > { %v5033_v31 = vmul.f32 1.442695, %v5031_v63  ;;  %v5032_v42 = vsub.f32 %v5024_v21, %v5030_v27 }
0x2a31   : > { %8393 = vpow2.f32 %v5033_v31  ;;  %v5035_v33 = vmul.f32 1.442695, %v5032_v42 }
0x2a33   : > { %8395 = vpow2.f32 %v5035_v33 }
0x2a3b   : > { %v8394_v22 = vpop.eup %8393 }
0x2a3c   : > { %v5037_v40 = vsel %vm3353_vm11, %v8394_v22, 0.0 }
0x2a3d   : > { %v8396_v2 = vpop.eup %8395  ;;  %5038 = vadd.xlane.f32.xlu0 %v5037_v40 }
0x2a3e   : > { %v5040_v29 = vsel %vm3357_vm12, %v8396_v2, 0.0 }
0x2a3f   : > { %5041 = vadd.xlane.f32.xlu1 %v5040_v29 }
0x2a7c   : > { %v5213_v32 = vpop.xlane.xlu0 %5212 }
0x2a7d   : > { %v5217_v39 = vsub.f32 %v5209_v55, %v5213_v32 }
0x2a7f   : > { %v5219_v45 = vmul.f32 1.442695, %v5217_v39 }
0x2a80   : > { %v5216_v46 = vpop.xlane.xlu0 %5215 }
0x2a81   : > { %8397 = vpow2.f32 %v5219_v45  ;;  %v5218_v47 = vsub.f32 %v5210_v38, %v5216_v46 }
0x2a83   : > { %v5221_v48 = vmul.f32 1.442695, %v5218_v47 }
0x2a84   : > { %v5401_v51 = vpop.xlane.xlu0 %5400 }
0x2a85   : > { %8399 = vpow2.f32 %v5221_v48  ;;  %v5405_v50 = vsub.f32 %v5397_v8, %v5401_v51 }
0x2a86   : > { %v5404_v37 = vpop.xlane.xlu1 %5403 }
0x2a87   : > { %v5407_v54 = vmul.f32 1.442695, %v5405_v50  ;;  %v5406_v61 = vsub.f32 %v5398_v23, %v5404_v37 }
0x2a89   : > { %8401 = vpow2.f32 %v5407_v54  ;;  %v5409_v62 = vmul.f32 1.442695, %v5406_v61 }
0x2a8b   : > { %v8398_v1 = vpop.eup %8397  ;;  %8403 = vpow2.f32 %v5409_v62 }
0x2a8c   : > { %v5588_v9 = vpop.xlane.xlu0 %5587  ;;  %v5223_v21 = vsel %vm3353_vm11, %v8398_v1, 0.0 }
0x2a8d   : > { %v5592_v30 = vsub.f32 %v5584_v60, %v5588_v9  ;;  %5224 = vadd.xlane.f32.xlu0 %v5223_v21  ;;  %v8165_v9 = vld [vmem:[#allocation13 + $0x40] sm:$0xff]  }
0x2a8e   : > { %v5591_v43 = vpop.xlane.xlu1 %5590  ;;  %7798 = vmatpush3.bf16.msra.mxu0 %v8165_v9  ;;  %v8199_v9 = vld [vmem:[%s10857_s5 + $0x184] ss:$16 sps:$4 sm:$0xff]  }
0x2a8f   : > { %v8400_v56 = vpop.eup %8399  ;;  %v5594_v49 = vmul.f32 1.442695, %v5592_v30  ;;  %v5593_v19 = vsub.f32 %v5585_v25, %v5591_v43  ;;  %7799 = vmatprep.subr.bf16.mxu0 %v8720_v52  ;;  %v8170_v43 = vld [vmem:[#allocation13 + $0x68] sm:$0xff]  }
0x2a90   : > { %v5226_v41 = vsel %vm3357_vm12, %v8400_v56, 0.0 }
0x2a91   : > { %8405 = vpow2.f32 %v5594_v49  ;;  %5227 = vadd.xlane.f32.xlu1 %v5226_v41  ;;  %v5596_v34 = vmul.f32 1.442695, %v5593_v19  ;;  %v8167_v41 = vld [vmem:[#allocation13 + $0x50] sm:$0xff]  }
0x2a92   : > { %v8171_v19 = vld [vmem:[#allocation13 + $0x70] sm:$0xff]  }
0x2a93   : > { %v8402_v44 = vpop.eup %8401  ;;  %8407 = vpow2.f32 %v5596_v34  ;;  %v8172_v34 = vld [vmem:[#allocation13 + $0x78] sm:$0xff]  }
0x2a94   : > { %v5411_v4 = vsel %vm3353_vm11, %v8402_v44, 0.0 }
0x2a95   : > { %v8404_v55 = vpop.eup %8403  ;;  %5412 = vadd.xlane.f32.xlu0 %v5411_v4 }
0x2a96   : > { %v5414_v5 = vsel %vm3357_vm12, %v8404_v55, 0.0 }
0x2a97   : > { %5415 = vadd.xlane.f32.xlu1 %v5414_v5 }
0x2a9b   : > { %v10448_v6 = vpop.eup %8405 }
0x2a9c   : > { %v5598_v38 = vsel %vm3353_vm11, %v10448_v6, 0.0 }
0x2a9d   : > { %5599 = vadd.xlane.f32.xlu0 %v5598_v38  ;;  %v8408_v14 = vpop.eup %8407  ;;  %v8169_v38 = vld [vmem:[#allocation13 + $0x60] sm:$0xff]  }
0x2a9e   : > { %v5601_v16 = vsel %vm3357_vm12, %v8408_v14, 0.0 }
0x2aa8   : > { %5422 = vrot.lane.b32.xlu1 %v10239_v35, %s10862_s26 }
0x2ab3   : > { %5235 = vrot.lane.b32.xlu0 %v10239_v35, %s10856_s19 }
0x2aca   : > { %v5039_v15 = vpop.xlane.xlu0 %5038 }
0x2acb   : > { %8409 = vrcp.f32 %v5039_v15 }
0x2acc   : > { %5602 = vadd.xlane.f32.xlu1 %v5601_v16  ;;  %v5042_v8 = vpop.xlane.xlu1 %5041 }
0x2acd   : > { %8411 = vrcp.f32 %v5042_v8 }
0x2ad5   : > { %v8410_v11 = vpop.eup %8409 }
0x2ad6   : > { %v5045_v23 = vmul.f32 %v8410_v11, %v8394_v22 }
0x2ad7   : > { %v8412_v13 = vpop.eup %8411 }
0x2ad8   : > { %v5046_v7 = vmul.f32 %v8412_v13, %v8396_v2 }
0x2ada   : > { %v5047_v28 = vpack.c.bf16 %v5046_v7, %v5045_v23 }
0x2adc   : > { %7758 = vmatmul.mubr.msk.bf16.vlgmr.msra.gmra.mrb[96].mxu1 %vm3353_vm11, %v5047_v28 }
0x2add   : > { %5609 = vrot.lane.b32.xlu1 %v10239_v35, %s10861_s3  ;;  %7769 = vmatprep.mubr.msk.bf16.mxu1 %vm8721_vm2, %v8720_v52 }
0x2b1a   : > { %v5225_v18 = vpop.xlane.xlu0 %5224 }
0x2b1e   : > { %v5228_v57 = vpop.xlane.xlu1 %5227 }
0x2b1f   : > { %8413 = vrcp.f32 %v5228_v57 }
0x2b20   : > { %8415 = vrcp.f32 %v5225_v18 }
0x2b22   : > { %v5413_v3 = vpop.xlane.xlu0 %5412 }
0x2b24   : > { %v5416_v20 = vpop.xlane.xlu1 %5415 }
0x2b25   : > { %8417 = vrcp.f32 %v5416_v20 }
0x2b26   : > { %8419 = vrcp.f32 %v5413_v3 }
0x2b28   : > { %v5423_v35 = vpop.permute.xlu1 %5422 }
0x2b29   : > { %v8414_v60 = vpop.eup %8413  ;;  %v5428_v31 = vsel %vm3382_vm10, %v5423_v35, 0  ;;  %v8173_v35 = vld [vmem:[%s10857_s5 + $0x100] ss:$16 sps:$4 sm:$0xff]  }
0x2b2a   : > { %v5600_v24 = vpop.xlane.xlu0 %5599  ;;  %v8416_v36 = vpop.eup %8415  ;;  %v5232_v25 = vmul.f32 %v8414_v60, %v8400_v56  ;;  %v8166_v56 = vld [vmem:[#allocation13 + $0x48] sm:$0xff]  }
0x2b2b   : > { %v5231_v26 = vmul.f32 %v8416_v36, %v8398_v1  ;;  %8421 = vrcp.f32 %v5600_v24  ;;  %7800 = vmatpush3.bf16.msra.mxu0 %v8166_v56  ;;  %v8200_v56 = vld [vmem:[%s10857_s5 + $0x188] ss:$16 sps:$4 sm:$0xff]  }
0x2b2c   : > { %7801 = vmatprep.subr.bf16.mxu0 %v8720_v52 }
0x2b2d   : > { %v5233_v63 = vpack.c.bf16 %v5232_v25, %v5231_v26 }
0x2b2e   : > { %v5236_v53 = vpop.permute.xlu0 %5235 }
0x2b2f   : > { %v5241_v58 = vsel %vm3382_vm10, %v5236_v53, 0  ;;  %v8418_v27 = vpop.eup %8417  ;;  %7802 = vmatpush3.bf16.msra.mxu0 %v8167_v41  ;;  %v8208_v41 = vld [vmem:[%s10857_s5 + $0x1ac] ss:$16 sps:$4 sm:$0xff]  }
0x2b30   : > { %7768 = vmatpush3.bf16.msra.mxu1 %v5241_v58  ;;  %v8420_v42 = vpop.eup %8419  ;;  %v5420_v33 = vmul.f32 %v8418_v27, %v8404_v55  ;;  %7803 = vmatprep.subr.bf16.mxu0 %v8720_v52  ;;  %v8176_v27 = vld [vmem:[%s10857_s5 + $0x108] ss:$16 sps:$4 sm:$0xff]  }
0x2b31   : > { %7779 = vmatprep.subr.bf16.mxu1 %v8720_v52  ;;  %v5419_v22 = vmul.f32 %v8420_v42, %v8402_v44  ;;  %v8181_v42 = vld [vmem:[%s10857_s5 + $0x124] ss:$16 sps:$4 sm:$0xff]  }
0x2b33   : > { %7770 = vmatmul.mubr.msk.bf16.vlgmr.msra.gmra.mrb[100].mxu1 %vm3353_vm11, %v5233_v63  ;;  %v5421_v40 = vpack.c.bf16 %v5420_v33, %v5419_v22  ;;  %v8175_v63 = vld [vmem:[%s10857_s5 + $0x104] ss:$16 sps:$4 sm:$0xff]   ;;  %v8184_v33 = vld [vmem:[%s10857_s5 + $0x12c] ss:$16 sps:$4 sm:$0xff]   ;;  %v8179_v22 = vld [vmem:[%s10857_s5 + $0x120] ss:$16 sps:$4 sm:$0xff]  }
0x2b34   : > { %7780 = vmatpush3.bf16.msra.mxu1 %v5428_v31  ;;  %7781 = vmatprep.mubr.msk.bf16.mxu1 %vm8721_vm2, %v8720_v52  ;;  %v8178_v31 = vld [vmem:[%s10857_s5 + $0x10c] ss:$16 sps:$4 sm:$0xff]  }
0x2b35   : > { %7791 = vmatprep.subr.bf16.mxu1 %v8720_v52  ;;  %v8422_v39 = vpop.eup %8421 }
0x2b36   : > { %v5606_v46 = vmul.f32 %v8422_v39, %v10448_v6  ;;  %v8168_v6 = vld [vmem:[#allocation13 + $0x58] sm:$0xff]  }
0x2b37   : > { %7804 = vmatpush3.bf16.msra.mxu0 %v8168_v6  ;;  %v8209_v6 = vld [vmem:[%s10857_s5 + $0x1c0] ss:$16 sps:$4 sm:$0xff]  }
0x2b38   : > { %7805 = vmatprep.subr.bf16.mxu0 %v8720_v52 }
0x2b3b   : > { %7782 = vmatmul.mubr.msk.bf16.vlgmr.msra.gmra.mrb[104].mxu1 %vm3353_vm11, %v5421_v40  ;;  %7806 = vmatpush3.bf16.msra.mxu0 %v8169_v38  ;;  %v8182_v40 = vld [vmem:[%s10857_s5 + $0x128] ss:$16 sps:$4 sm:$0xff]  }
0x2b3c   : > { %7793 = vmatprep.mubr.msk.bf16.mxu1 %vm8721_vm2, %v8720_v52  ;;  %7807 = vmatprep.subr.bf16.mxu0 %v8720_v52  ;;  %v8212_v38 = vld [vmem:[%s10857_s5 + $0x1c8] ss:$16 sps:$4 sm:$0xff]  }
0x2b3f   : > { %7808 = vmatpush3.bf16.msra.mxu0 %v8170_v43  ;;  %v8217_v43 = vld [vmem:[%s10857_s5 + $0x1e4] ss:$16 sps:$4 sm:$0xff]  }
0x2b40   : > { %7809 = vmatprep.subr.bf16.mxu0 %v8720_v52 }
0x2b43   : > { %7810 = vmatpush3.bf16.msra.mxu0 %v8171_v19  ;;  %v8220_v19 = vld [vmem:[%s10857_s5 + $0x1ec] ss:$16 sps:$4 sm:$0xff]  }
0x2b44   : > { %7811 = vmatprep.subr.bf16.mxu0 %v8720_v52 }
0x2b47   : > { %7812 = vmatpush3.bf16.msra.mxu0 %v8172_v34  ;;  %v8215_v34 = vld [vmem:[%s10857_s5 + $0x1e0] ss:$16 sps:$4 sm:$0xff]  }
0x2b48   : > { %6055 = vmatprep.subr.bf16.mxu0 %v8178_v31  ;;  %v8230_v31 = vld [vmem:[%s10858_s18 + $0xa0] sm:$0xff]  }
0x2b59   : > { %v5603_v2 = vpop.xlane.xlu1 %5602 }
0x2b5a   : > { %8423 = vrcp.f32 %v5603_v2 }
0x2b5d   : > { %v5610_v29 = vpop.permute.xlu1 %5609 }
0x2b5e   : > { %v5615_v32 = vsel %vm3382_vm10, %v5610_v29, 0 }
0x2b5f   : > { %7792 = vmatpush3.bf16.msra.mxu1 %v5615_v32 }
0x2b60   : > { %6012 = vmatprep.subr.bf16.mxu1 %v8175_v63  ;;  %v8228_v63 = vld [vmem:[%s10858_s18 + $0x98] sm:$0xff]  }
0x2b64   : > { %v8424_v45 = vpop.eup %8423 }
0x2b65   : > { %v5607_v47 = vmul.f32 %v8424_v45, %v8408_v14 }
0x2b67   : > { %v5608_v48 = vpack.c.bf16 %v5607_v47, %v5606_v46 }
0x2b69   : > { %7794 = vmatmul.mubr.msk.bf16.vlgmr.msra.gmra.mrb[108].mxu1 %vm3353_vm11, %v5608_v48 }
0x2b6a   : > { %6044 = vmatprep.mubr.bf16.mxu1 %v8719_v0  ;;  %6013 = vmatpush1.bf16.msra.mxu1 %v8173_v35  ;;  %v8227_v35 = vld [vmem:[%s10858_s18 + $0xd8] sm:$0xff]  }
0x2b6b   : > { %6014 = vmatprep.subr.bf16.mxu1 %v8181_v42  ;;  %v8231_v42 = vld [vmem:[%s10858_s18 + $0xe8] sm:$0xff]  }
0x2b6e   : > { %6015 = vmatpush1.bf16.msra.mxu1 %v8179_v22  ;;  %v8233_v22 = vld [vmem:[%s10858_s18 + $0xf0] sm:$0xff]  }
0x2baf   : > { %v5089_v51 = vpop.f32.mrb[96].mxu1 }
0x2bb0   : > { %v7759_v50 = vpop.f32.mrb[97].mxu1 }
0x2bb1   : > { %v5092_v37 = vpop.f32.mrb[98].mxu1  ;;  %v8185_v50 = vld [vmem:[%s10857_s5 + $0x140] ss:$16 sps:$4 sm:$0xff]  }
0x2bb2   : > { %v7760_v54 = vpop.f32.mrb[99].mxu1 }
0x2bb3   : > { %v8193_v54 = vld [vmem:[%s10857_s5 + $0x164] ss:$16 sps:$4 sm:$0xff]  }
0x2c06   : > { %v5277_v61 = vpop.f32.mrb[100].mxu1 }
0x2c07   : > { %v7771_v62 = vpop.f32.mrb[101].mxu1 }
0x2c08   : > { %v5280_v1 = vpop.f32.mrb[102].mxu1  ;;  %v8191_v62 = vld [vmem:[%s10857_s5 + $0x160] ss:$16 sps:$4 sm:$0xff]  }
0x2c09   : > { %v7933_v21 = vpack.i.bf16 %v5280_v1, %v5277_v61  ;;  %v7772_v30 = vpop.f32.mrb[103].mxu1  ;;  %v8196_v61 = vld [vmem:[%s10857_s5 + $0x16c] ss:$16 sps:$4 sm:$0xff]   ;;  %v8194_v1 = vld [vmem:[%s10857_s5 + $0x168] ss:$16 sps:$4 sm:$0xff]  }
0x2c0a   : > { %v8197_v30 = vld [vmem:[%s10857_s5 + $0x180] ss:$16 sps:$4 sm:$0xff]  }
0x2c0b   : > { %7934 = vrot.lane.b32.xlu1 %v7933_v21, %s10861_s3  ;;  %v8202_v21 = vld [vmem:[%s10857_s5 + $0x18c] ss:$16 sps:$4 sm:$0xff]  }
0x2c0e   : > { %v5464_v49 = vpop.f32.mrb[104].mxu1 }
0x2c0f   : > { %v7783_v44 = vpop.f32.mrb[105].mxu1 }
0x2c10   : > { %v5467_v4 = vpop.f32.mrb[106].mxu1  ;;  %v8203_v44 = vld [vmem:[%s10857_s5 + $0x1a0] ss:$16 sps:$4 sm:$0xff]  }
0x2c11   : > { %v7938_v55 = vpack.i.bf16 %v5467_v4, %v5464_v49  ;;  %v7784_v5 = vpop.f32.mrb[107].mxu1  ;;  %v8205_v49 = vld [vmem:[%s10857_s5 + $0x1a4] ss:$16 sps:$4 sm:$0xff]   ;;  %v8206_v4 = vld [vmem:[%s10857_s5 + $0x1a8] ss:$16 sps:$4 sm:$0xff]  }
0x2c12   : > { %v8214_v5 = vld [vmem:[%s10857_s5 + $0x1cc] ss:$16 sps:$4 sm:$0xff]  }
0x2c13   : > { %7939 = vrot.lane.b32.xlu0 %v7938_v55, %s10862_s26  ;;  %v8211_v55 = vld [vmem:[%s10857_s5 + $0x1c4] ss:$16 sps:$4 sm:$0xff]  }
0x2c3c   : > { %v5651_v14 = vpop.f32.mrb[108].mxu1 }
0x2c3d   : > { %v7795_v15 = vpop.f32.mrb[109].mxu1 }
0x2c3e   : > { %v5654_v16 = vpop.f32.mrb[110].mxu1 }
0x2c3f   : > { %v7943_v8 = vpack.i.bf16 %v5654_v16, %v5651_v14  ;;  %v7796_v11 = vpop.f32.mrb[111].mxu1  ;;  %v8218_v14 = vld [vmem:[%s10857_s5 + $0x1e8] ss:$16 sps:$4 sm:$0xff]  }
0x2c41   : > { %7944 = vrot.lane.b32.xlu1 %v7943_v8, %s10856_s19  ;;  %s10864_s19 = sld [smem:[#allocation31_spill]] }
0x2c47   : > { %s804_s29 = scalar_lea.vmem %s10864_s19, %s7228_s1 }
0x2c7d   : > { %v7935_v13 = vpop.permute.xlu1 %7934 }
0x2c7e   : > { %v7937_v7 = vunpack.i.h.bf16 %v7935_v13  ;;  %v7936_v28 = vunpack.i.l.bf16 %v7935_v13 }
0x2c80   : > { %v5683_v3 = vsel %vm1542_vm7, %v5092_v37, %v7937_v7  ;;  %v5682_v52 = vsel %vm1542_vm7, %v5089_v51, %v7936_v28  ;;  %v8188_v37 = vld [vmem:[%s10857_s5 + $0x148] ss:$16 sps:$4 sm:$0xff]  }
0x2c85   : > { %v7940_v23 = vpop.permute.xlu0 %7939 }
0x2c86   : > { %v7942_v57 = vunpack.i.h.bf16 %v7940_v23  ;;  %v7941_v18 = vunpack.i.l.bf16 %v7940_v23 }
0x2c88   : > { %v5684_v36 = vsel %vm909_vm0, %v5682_v52, %v7941_v18  ;;  %v5685_v25 = vsel %vm909_vm0, %v5683_v3, %v7942_v57  ;;  %v10601_v57 = vld [vmem:[#allocation12] sm:$0x1f] }
0x2c89   : > { %v5815_v18 = vrot.slane %v10601_v57, %v9277_v59  ;;  %v8223_v59 = vld [vmem:[%s10858_s18 + $0xc8] sm:$0xff]  }
0x2cb3   : > { %v7945_v20 = vpop.permute.xlu1 %7944 }
0x2cb4   : > { %v7947_v60 = vunpack.i.h.bf16 %v7945_v20  ;;  %v7946_v24 = vunpack.i.l.bf16 %v7945_v20 }
0x2cb6   : > { %v5686_v53 = vsel %vm4037_vm13, %v5684_v36, %v7946_v24  ;;  %v5687_v26 = vsel %vm4037_vm13, %v5685_v25, %v7947_v60  ;;  %v8221_v36 = vld [vmem:[%s10858_s18 + $0xc0] sm:$0xff]  }
0x2cb7   : > { %v5705_v58 = vpack.c.bf16 %v5687_v26, %v5686_v53  ;;  %v8222_v25 = vld [vmem:[%s10858_s18 + $0x80] sm:$0xff]   ;;  %v8224_v53 = vld [vmem:[%s10858_s18 + $0x88] sm:$0xff]   ;;  %v8225_v26 = vld [vmem:[%s10858_s18 + $0xd0] sm:$0xff]  }
0x2cb9   : > { %7814 = vmatmul.mubr.bf16.vlgmr.msra.gmra.mrb[92].mxu0 %v5705_v58  ;;  %v8226_v58 = vld [vmem:[%s10858_s18 + $0x90] sm:$0xff]  }
0x2cba   : > { %6087 = vmatprep.mubr.bf16.mxu0 %v8719_v0  ;;  %6056 = vmatpush1.bf16.msra.mxu0 %v8176_v27  ;;  %v8229_v27 = vld [vmem:[%s10858_s18 + $0xe0] sm:$0xff]  }
0x2cbb   : > { %6057 = vmatprep.subr.bf16.mxu0 %v8184_v33  ;;  %v8232_v33 = vld [vmem:[%s10858_s18 + $0xa8] sm:$0xff]  }
0x2cbe   : > { %6058 = vmatpush1.bf16.msra.mxu0 %v8182_v40  ;;  %v8234_v40 = vld [vmem:[%s10858_s18 + $0xb0] sm:$0xff]  }
0x2d8c   : > { %v5788_v2 = vpop.f32.mrb[92].mxu0 }
0x2d8d   : > { %v10518_v29 = vadd.f32 %v5788_v2, %v10150_v10  ;;  %v7815_v32 = vpop.f32.mrb[93].mxu0  ;;  %v8187_v10 = vld [vmem:[%s10857_s5 + $0x144] ss:$16 sps:$4 sm:$0xff]   ;;  %v8235_v2 = vld [vmem:[%s10858_s18 + $0xf8] sm:$0xff]  }
0x2d8e   : > { %v5791_v39 = vpop.f32.mrb[94].mxu0  ;;  %6016 = vmatprep.subr.bf16.mxu1 %v8187_v10  ;;  %v8236_v32 = vld [vmem:[%s10858_s18 + $0xb8] sm:$0xff]  }
0x2d8f   : > { %v10521_v45 = vadd.f32 %v5791_v39, %v10153_v12  ;;  %v7816_v46 = vpop.f32.mrb[95].mxu0  ;;  %v5797_v47 = vmul.f32 %v10518_v29, %v10518_v29  ;;  %v8190_v12 = vld [vmem:[%s10857_s5 + $0x14c] ss:$16 sps:$4 sm:$0xff]   ;;  %6017 = vmatpush1.bf16.msra.mxu1 %v8185_v50 }
0x2d90   : > { %6059 = vmatprep.subr.bf16.mxu0 %v8190_v12  ;;  %6018 = vmatprep.subr.bf16.mxu1 %v8193_v54 }
0x2d91   : > { %5799 = vadd.xlane.f32.xlu0 %v5797_v47  ;;  %v5798_v48 = vmul.f32 %v10521_v45, %v10521_v45  ;;  %6060 = vmatpush1.bf16.msra.mxu0 %v8188_v37 }
0x2d92   : > { %6061 = vmatprep.subr.bf16.mxu0 %v8196_v61 }
0x2d93   : > { %v5801_v51 = vsel %vm2972_vm9, %v5798_v48, 0.0  ;;  %6019 = vmatpush1.bf16.msra.mxu1 %v8191_v62 }
0x2d94   : > { %5802 = vadd.xlane.f32.xlu1 %v5801_v51  ;;  %6020 = vmatprep.subr.bf16.mxu1 %v8199_v9 }
0x2d95   : > { %6062 = vmatpush1.bf16.msra.mxu0 %v8194_v1 }
0x2d96   : > { %6063 = vmatprep.subr.bf16.mxu0 %v8202_v21 }
0x2d97   : > { %6021 = vmatpush1.bf16.msra.mxu1 %v8197_v30 }
0x2d98   : > { %6022 = vmatprep.subr.bf16.mxu1 %v8205_v49 }
0x2d99   : > { %6064 = vmatpush1.bf16.msra.mxu0 %v8200_v56 }
0x2d9a   : > { %6065 = vmatprep.subr.bf16.mxu0 %v8208_v41 }
0x2d9b   : > { %6023 = vmatpush1.bf16.msra.mxu1 %v8203_v44 }
0x2d9c   : > { %6024 = vmatprep.subr.bf16.mxu1 %v8211_v55 }
0x2d9d   : > { %6066 = vmatpush1.bf16.msra.mxu0 %v8206_v4 }
0x2d9e   : > { %6067 = vmatprep.subr.bf16.mxu0 %v8214_v5 }
0x2d9f   : > { %6025 = vmatpush1.bf16.msra.mxu1 %v8209_v6 }
0x2da0   : > { %6026 = vmatprep.subr.bf16.mxu1 %v8217_v43 }
0x2da1   : > { %6068 = vmatpush1.bf16.msra.mxu0 %v8212_v38 }
0x2da2   : > { %6069 = vmatprep.subr.bf16.mxu0 %v8220_v19 }
0x2da3   : > { %6027 = vmatpush1.bf16.msra.mxu1 %v8215_v34 }
0x2da4   : > { %7403 = vmatprep.subr.bf16.mxu1 %v8221_v36  ;;  %v8243_v36 = vld [vmem:[%s10863_s22 + $0x20] ss:$16 sps:$4 sm:$0xff]  }
0x2da5   : > { %6070 = vmatpush1.bf16.msra.mxu0 %v8218_v14 }
0x2e1e   : > { %v5800_v15 = vpop.xlane.xlu0 %5799 }
0x2e1f   : > { %v5804_v16 = vmul.f32 0.0078125, %v5800_v15 }
0x2e21   : > { %v5806_v8 = vadd.f32 1e-05, %v5804_v16  ;;  %v5803_v11 = vpop.xlane.xlu1 %5802 }
0x2e22   : > { %v5805_v13 = vmul.f32 0.0078125, %v5803_v11 }
0x2e23   : > { %8425 = vrsqrt.f32 %v5806_v8 }
0x2e24   : > { %v5807_v23 = vadd.f32 1e-05, %v5805_v13 }
0x2e26   : > { %8427 = vrsqrt.f32 %v5807_v23 }
0x2e2d   : > { %v8426_v7 = vpop.eup %8425 }
0x2e2e   : > { %v5810_v28 = vmul.f32 %v8426_v7, %v10518_v29 }
0x2e30   : > { %v8428_v20 = vpop.eup %8427  ;;  %v5816_v52 = vmul.f32 %v5815_v18, %v5810_v28 }
0x2e31   : > { %v5811_v3 = vmul.f32 %v8428_v20, %v10521_v45  ;;  %v8237_v20 = vld [vmem:[%s10863_s22] ss:$16 sps:$4 sm:$0xff]  }
0x2e33   : > { %v5817_v60 = vmul.f32 %v5815_v18, %v5811_v3  ;;  %v8239_v3 = vld [vmem:[%s10863_s22 + $0x4] ss:$16 sps:$4 sm:$0xff]  }
0x2e34   : > { %6518 = vmatprep.subr.bf16.mxu0 %v8239_v3 }
0x2e35   : > { %v5851_v24 = vpack.c.bf16 %v5817_v60, %v5816_v52  ;;  %v8240_v52 = vld [vmem:[%s10863_s22 + $0x8] ss:$16 sps:$4 sm:$0xff]   ;;  %v8242_v60 = vld [vmem:[%s10863_s22 + $0xc] ss:$16 sps:$4 sm:$0xff]  }
0x2e37   : > { %6045 = vmatmul.mubr.bf16.vlgmr.msra.gmra.mrb[112].mxu1 %v5851_v24  ;;  %6088 = vmatmul.mubr.bf16.vlgmr.msra.gmra.mrb[96].mxu0 %v5851_v24  ;;  %v8248_v24 = vld [vmem:[%s10863_s22 + $0x2c] ss:$16 sps:$4 sm:$0xff]  }
0x2e38   : > { %6550 = vmatprep.mubr.bf16.mxu0 %v8719_v0  ;;  %7404 = vmatpush3.bf16.msra.mxu1 %v8222_v25  ;;  %v8246_v25 = vld [vmem:[%s10863_s22 + $0x28] ss:$16 sps:$4 sm:$0xff]  }
0x2e39   : > { %7405 = vmatprep.subr.bf16.mxu1 %v8223_v59  ;;  %6519 = vmatpush1.bf16.msra.mxu0 %v8237_v20 }
0x2e3c   : > { %7406 = vmatpush3.bf16.msra.mxu1 %v8224_v53 }
0x2e3d   : > { %7407 = vmatprep.subr.bf16.mxu1 %v8225_v26 }
0x2e40   : > { %7408 = vmatpush3.bf16.msra.mxu1 %v8226_v58 }
0x2e41   : > { %7409 = vmatprep.subr.bf16.mxu1 %v8227_v35 }
0x2e44   : > { %7410 = vmatpush3.bf16.msra.mxu1 %v8228_v63 }
0x2e45   : > { %7411 = vmatprep.subr.bf16.mxu1 %v8229_v27 }
0x2e48   : > { %7412 = vmatpush3.bf16.msra.mxu1 %v8230_v31 }
0x2e49   : > { %7413 = vmatprep.subr.bf16.mxu1 %v8231_v42 }
0x2e4c   : > { %7414 = vmatpush3.bf16.msra.mxu1 %v8232_v33 }
0x2e4d   : > { %7415 = vmatprep.subr.bf16.mxu1 %v8233_v22 }
0x2e50   : > { %7416 = vmatpush3.bf16.msra.mxu1 %v8234_v40  ;;  %v8251_v40 = vld [vmem:[%s10863_s22 + $0x44] ss:$16 sps:$4 sm:$0xff]  }
0x2e51   : > { %7417 = vmatprep.subr.bf16.mxu1 %v8235_v2  ;;  %v8252_v2 = vld [vmem:[%s10863_s22 + $0x48] ss:$16 sps:$4 sm:$0xff]  }
0x2e54   : > { %7418 = vmatpush3.bf16.msra.mxu1 %v8236_v32  ;;  %v8257_v32 = vld [vmem:[%s10863_s22 + $0x64] ss:$16 sps:$4 sm:$0xff]  }
0x2e55   : > { %6561 = vmatprep.subr.bf16.mxu1 %v8242_v60 }
0x2f0a   : > { %v6046_v39 = vpop.f32.mrb[112].mxu1  ;;  %v6089_v46 = vpop.f32.mrb[96].mxu0 }
0x2f0b   : > { %v6098_v47 = vsub.f32 0.0, %v6046_v39  ;;  %v6048_v48 = vpop.f32.mrb[113].mxu1  ;;  %v6091_v51 = vpop.f32.mrb[97].mxu0 }
0x2f0c   : > { %v6099_v10 = vsub.f32 0.0, %v6048_v48  ;;  %v6050_v12 = vpop.f32.mrb[114].mxu1  ;;  %v6093_v50 = vpop.f32.mrb[98].mxu0 }
0x2f0d   : > { %v6102_v37 = vmul.f32 1.442695, %v6098_v47  ;;  %v6100_v54 = vsub.f32 0.0, %v6050_v12  ;;  %v6052_v61 = vpop.f32.mrb[115].mxu1  ;;  %v6095_v62 = vpop.f32.mrb[99].mxu0 }
0x2f0e   : > { %v6104_v1 = vmul.f32 1.442695, %v6099_v10  ;;  %v6101_v9 = vsub.f32 0.0, %v6052_v61  ;;  %v8258_v47 = vld [vmem:[%s10863_s22 + $0x68] ss:$16 sps:$4 sm:$0xff]  }
0x2f0f   : > { %8429 = vpow2.f32 %v6102_v37  ;;  %v6106_v21 = vmul.f32 1.442695, %v6100_v54  ;;  %v8261_v10 = vld [vmem:[%s10863_s22 + $0x80] ss:$16 sps:$4 sm:$0xff]   ;;  %v8272_v37 = vld [vmem:[%s10863_s22 + $0xac] ss:$16 sps:$4 sm:$0xff]  }
0x2f10   : > { %8431 = vpow2.f32 %v6104_v1  ;;  %v6108_v30 = vmul.f32 1.442695, %v6101_v9  ;;  %v8267_v54 = vld [vmem:[%s10863_s22 + $0xa0] ss:$16 sps:$4 sm:$0xff]   ;;  %v8278_v1 = vld [vmem:[%s10863_s22 + $0xcc] ss:$16 sps:$4 sm:$0xff]  }
0x2f11   : > { %8433 = vpow2.f32 %v6106_v21  ;;  %v8273_v9 = vld [vmem:[%s10863_s22 + $0xc0] ss:$16 sps:$4 sm:$0xff]   ;;  %v8276_v21 = vld [vmem:[%s10863_s22 + $0xc8] ss:$16 sps:$4 sm:$0xff]  }
0x2f12   : > { %8435 = vpow2.f32 %v6108_v30  ;;  %v8281_v30 = vld [vmem:[%s10863_s22 + $0xe4] ss:$16 sps:$4 sm:$0xff]  }
0x2f19   : > { %v8430_v56 = vpop.eup %8429 }
0x2f1a   : > { %v8432_v49 = vpop.eup %8431  ;;  %v6110_v41 = vadd.f32 1.0, %v8430_v56  ;;  %v8284_v56 = vld [vmem:[%s10863_s22 + $0xec] ss:$16 sps:$4 sm:$0xff]  }
0x2f1b   : > { %v8434_v44 = vpop.eup %8433  ;;  %v6111_v4 = vadd.f32 1.0, %v8432_v49  ;;  %v8279_v49 = vld [vmem:[%s10863_s22 + $0xe0] ss:$16 sps:$4 sm:$0xff]  }
0x2f1c   : > { %v8436_v55 = vpop.eup %8435  ;;  %8437 = vrcp.f32 %v6110_v41  ;;  %v6112_v5 = vadd.f32 1.0, %v8434_v44  ;;  %v8282_v41 = vld [vmem:[%s10863_s22 + $0xe8] ss:$16 sps:$4 sm:$0xff]  }
0x2f1d   : > { %8439 = vrcp.f32 %v6111_v4  ;;  %v6113_v6 = vadd.f32 1.0, %v8436_v55 }
0x2f1e   : > { %8441 = vrcp.f32 %v6112_v5 }
0x2f1f   : > { %8443 = vrcp.f32 %v6113_v6 }
0x2f26   : > { %v8438_v38 = vpop.eup %8437 }
0x2f27   : > { %v8440_v43 = vpop.eup %8439  ;;  %v6122_v19 = vmul.f32 %v8438_v38, %v6046_v39  ;;  %v8260_v39 = vld [vmem:[%s10863_s22 + $0x6c] ss:$16 sps:$4 sm:$0xff]  }
0x2f28   : > { %v8442_v34 = vpop.eup %8441  ;;  %v6123_v14 = vmul.f32 %v8440_v43, %v6048_v48  ;;  %v8263_v48 = vld [vmem:[%s10863_s22 + $0x84] ss:$16 sps:$4 sm:$0xff]  }
0x2f29   : > { %v8444_v15 = vpop.eup %8443  ;;  %v6126_v16 = vmul.f32 %v6122_v19, %v6089_v46  ;;  %v6124_v8 = vmul.f32 %v8442_v34, %v6050_v12  ;;  %v8255_v46 = vld [vmem:[%s10863_s22 + $0x60] ss:$16 sps:$4 sm:$0xff]   ;;  %v8264_v12 = vld [vmem:[%s10863_s22 + $0x88] ss:$16 sps:$4 sm:$0xff]   ;;  %v6322_v34 = vrot.slane %v10601_v57, %v9296_v17 }
0x2f2a   : > { %v6127_v11 = vmul.f32 %v6123_v14, %v6091_v51  ;;  %v6125_v13 = vmul.f32 %v8444_v15, %v6052_v61  ;;  %v8266_v51 = vld [vmem:[%s10863_s22 + $0x8c] ss:$16 sps:$4 sm:$0xff]   ;;  %v8270_v61 = vld [vmem:[%s10863_s22 + $0xa8] ss:$16 sps:$4 sm:$0xff]  }
0x2f2b   : > { %v6128_v23 = vmul.f32 %v6124_v8, %v6093_v50  ;;  %v8269_v50 = vld [vmem:[%s10863_s22 + $0xa4] ss:$16 sps:$4 sm:$0xff]  }
0x2f2c   : > { %v6129_v7 = vmul.f32 %v6125_v13, %v6095_v62  ;;  %v8275_v62 = vld [vmem:[%s10863_s22 + $0xc4] ss:$16 sps:$4 sm:$0xff]  }
0x2f2d   : > { %v6163_v28 = vpack.c.bf16 %v6128_v23, %v6126_v16 }
0x2f2e   : > { %v6164_v18 = vpack.c.bf16 %v6129_v7, %v6127_v11 }
0x2f30   : > { %6293 = vmatprep.mubr.bf16.mxu1 %v6164_v18 }
0x2f31   : > { %6294 = vmatmul.mubr.bf16.vlgmr.msra.gmra.mrb[116].mxu1 %v6163_v28 }
0x2f32   : > { %6593 = vmatprep.mubr.bf16.mxu1 %v8719_v0  ;;  %v8245_v0 = vld [vmem:[%s10863_s22 + $0x24] ss:$16 sps:$4 sm:$0xff]   ;;  %6562 = vmatpush1.bf16.msra.mxu1 %v8240_v52 }
0x2f33   : > { %6520 = vmatprep.subr.bf16.mxu0 %v8245_v0  ;;  %6563 = vmatprep.subr.bf16.mxu1 %v8248_v24 }
0x2f34   : > { %6521 = vmatpush1.bf16.msra.mxu0 %v8243_v36 }
0x2f35   : > { %6522 = vmatprep.subr.bf16.mxu0 %v8251_v40 }
0x2f36   : > { %6564 = vmatpush1.bf16.msra.mxu1 %v8246_v25 }
0x3004   : > { %v7419_v59 = vpop.f32.mrb[116].mxu1 }
0x3005   : > { %v7420_v53 = vpop.f32.mrb[117].mxu1 }
0x3006   : > { %v7421_v26 = vadd.f32 %v7420_v53, %v7419_v59  ;;  %v7422_v58 = vpop.f32.mrb[118].mxu1 }
0x3007   : > { %v7423_v35 = vpop.f32.mrb[119].mxu1 }
0x3008   : > { %v10681_v63 = vadd.f32 %v7421_v26, %v10518_v29  ;;  %v7424_v27 = vadd.f32 %v7423_v35, %v7422_v58  ;;  %v8254_v29 = vld [vmem:[%s10863_s22 + $0x4c] ss:$16 sps:$4 sm:$0xff]  }
0x3009   : > { %6565 = vmatprep.subr.bf16.mxu1 %v8254_v29 }
0x300a   : > { %v10684_v31 = vadd.f32 %v7424_v27, %v10521_v45  ;;  %v6304_v42 = vmul.f32 %v10681_v63, %v10681_v63  ;;  %v8249_v45 = vld [vmem:[%s10863_s22 + $0x40] ss:$16 sps:$4 sm:$0xff]   ;;  %6566 = vmatpush1.bf16.msra.mxu1 %v8252_v2 }
0x300b   : > { %6523 = vmatpush1.bf16.msra.mxu0 %v8249_v45  ;;  %6567 = vmatprep.subr.bf16.mxu1 %v8260_v39 }
0x300c   : > { %6306 = vadd.xlane.f32.xlu0 %v6304_v42  ;;  %v6305_v33 = vmul.f32 %v10684_v31, %v10684_v31  ;;  %6524 = vmatprep.subr.bf16.mxu0 %v8257_v32 }
0x300e   : > { %v6308_v22 = vsel %vm2972_vm9, %v6305_v33, 0.0  ;;  %6568 = vmatpush1.bf16.msra.mxu1 %v8258_v47 }
0x300f   : > { %6525 = vmatpush1.bf16.msra.mxu0 %v8255_v46  ;;  %6569 = vmatprep.subr.bf16.mxu1 %v8266_v51 }
0x3010   : > { %6309 = vadd.xlane.f32.xlu0 %v6308_v22  ;;  %6526 = vmatprep.subr.bf16.mxu0 %v8263_v48 }
0x3012   : > { %6570 = vmatpush1.bf16.msra.mxu1 %v8264_v12 }
0x3013   : > { %6527 = vmatpush1.bf16.msra.mxu0 %v8261_v10  ;;  %6571 = vmatprep.subr.bf16.mxu1 %v8272_v37 }
0x3014   : > { %6528 = vmatprep.subr.bf16.mxu0 %v8269_v50 }
0x3016   : > { %6572 = vmatpush1.bf16.msra.mxu1 %v8270_v61 }
0x3017   : > { %6529 = vmatpush1.bf16.msra.mxu0 %v8267_v54  ;;  %6573 = vmatprep.subr.bf16.mxu1 %v8278_v1 }
0x3018   : > { %6530 = vmatprep.subr.bf16.mxu0 %v8275_v62 }
0x301a   : > { %6574 = vmatpush1.bf16.msra.mxu1 %v8276_v21 }
0x301b   : > { %6531 = vmatpush1.bf16.msra.mxu0 %v8273_v9  ;;  %6575 = vmatprep.subr.bf16.mxu1 %v8284_v56 }
0x301c   : > { %6532 = vmatprep.subr.bf16.mxu0 %v8281_v30 }
0x301e   : > { %6576 = vmatpush1.bf16.msra.mxu1 %v8282_v41 }
0x301f   : > { %6533 = vmatpush1.bf16.msra.mxu0 %v8279_v49 }
0x3099   : > { %v6307_v44 = vpop.xlane.xlu0 %6306 }
0x309a   : > { %v6311_v4 = vmul.f32 0.0078125, %v6307_v44 }
0x309c   : > { %v6313_v55 = vadd.f32 1e-05, %v6311_v4 }
0x309d   : > { %v6310_v5 = vpop.xlane.xlu0 %6309 }
0x309e   : > { %8445 = vrsqrt.f32 %v6313_v55  ;;  %v6312_v6 = vmul.f32 0.0078125, %v6310_v5 }
0x30a0   : > { %v6314_v38 = vadd.f32 1e-05, %v6312_v6 }
0x30a2   : > { %8447 = vrsqrt.f32 %v6314_v38 }
0x30a8   : > { %v8446_v43 = vpop.eup %8445 }
0x30a9   : > { %v6317_v19 = vmul.f32 %v8446_v43, %v10681_v63 }
0x30ab   : > { %v6323_v16 = vmul.f32 %v6322_v34, %v6317_v19 }
0x30ac   : > { %v8448_v14 = vpop.eup %8447 }
0x30ad   : > { %v6318_v15 = vmul.f32 %v8448_v14, %v10684_v31 }
0x30af   : > { %v6324_v8 = vmul.f32 %v6322_v34, %v6318_v15 }
0x30b1   : > { %v6357_v11 = vpack.c.bf16 %v6324_v8, %v6323_v16 }
0x30b3   : > { %6551 = vmatmul.mubr.bf16.vlgmr.msra.gmra.mrb[100].mxu0 %v6357_v11  ;;  %6594 = vmatmul.mubr.bf16.vlgmr.msra.gmra.mrb[120].mxu1 %v6357_v11 }
0x3186   : > { %v6552_v13 = vpop.f32.mrb[100].mxu0  ;;  %v6595_v23 = vpop.f32.mrb[120].mxu1 }
0x3187   : > { %6604 = vst [vmem:[%s804_s29] sm:$0xff] %v6552_v13  ;;  %6606 = vst [vmem:[%s804_s29 + $0x10] sm:$0xff] %v6595_v23  ;;  %v6554_v7 = vpop.f32.mrb[101].mxu0  ;;  %v6597_v28 = vpop.f32.mrb[121].mxu1 }
0x3188   : > { %6605 = vst [vmem:[%s804_s29 + $0x8] sm:$0xff] %v6554_v7  ;;  %6607 = vst [vmem:[%s804_s29 + $0x18] sm:$0xff] %v6597_v28  ;;  %v6556_v17 = vpop.f32.mrb[102].mxu0  ;;  %v6599_v57 = vpop.f32.mrb[122].mxu1 }
0x3189   : > { %6608 = vst [vmem:[%s804_s29 + $0x20] sm:$0xf] %v6556_v17  ;;  %6610 = vst [vmem:[%s804_s29 + $0x30] sm:$0xf] %v6599_v57  ;;  %v6558_v18 = vpop.f32.mrb[103].mxu0  ;;  %v6601_v20 = vpop.f32.mrb[123].mxu1 }
0x318a   : > { %6609 = vst [vmem:[%s804_s29 + $0x28] sm:$0xf] %v6558_v18  ;;  %6611 = vst [vmem:[%s804_s29 + $0x38] sm:$0xf] %v6601_v20 }
0x318b PF: > { %s10865_s27 = sld [smem:[#allocation20_spill]] }
0x3191   : > { %s36_s2 = sadd.s32 1, %s10865_s27  }
0x3192   : > { %p33_p11 = scmp.ge.s32.totalorder %s36_s2, 4  }
0x3194   :  { %35 = sbr.rel (!%p33_p11) target bundleno = 17 (0x11), region = 182 }
0x319b   :  { %6633 = vsyncpa [#allocation3], 1 }
0x319c   :  { %6635 = vsyncpa [#allocation3 + $0x1], 1 }
0x319d   :  { %6636 = vsyncpa [#allocation5], 1 }
0x319e   :  { %6637 = vsyncpa [#allocation8], 1 }
0x319f   :  { %6638 = vsyncpa [#allocation11], 1 }
0x31a0   :  { %6639 = vsyncpa [#allocation14], 1 }

</bundles_post_ra>
